<compile_context>
chip_gen: v6e
topology: v6e:2x2x1
jax: 0.10.0
libtpu: 0.0.40
codegen_flags: <defaults>
</compile_context>

<pallas_src>
import jax
import jax.numpy as jnp
import numpy as np
from jax.experimental import pallas as pl
from jax.experimental.pallas import tpu as pltpu


def _round_up(n, m):
    return ((n + m - 1) // m) * m


# -----------------------------------------------------------------------------
# Kernel. grid = (batch blocks i, item-column blocks j); j is the inner axis.
# -----------------------------------------------------------------------------
def _autoencoder_kernel(
    x_ref,
    w1_ref, sh1_ref,
    w2_ref, sh2_ref,
    w3_ref, sh3_ref,
    w4_ref, sh4_ref,
    w5_ref, sh5_ref,
    w6_ref, b6_ref,
    dec_ref, enc_ref,
    h5_ref,
):
    def linear_relu(h, w_ref, sh_ref):
        # BN scale folded into w; bias/BN-shift folded into sh. f32 accumulate on MXU.
        y = jnp.dot(h.astype(w_ref.dtype), w_ref[...],
                    preferred_element_type=jnp.float32)
        return jnp.maximum(y + sh_ref[...], 0.0)

    @pl.when(pl.program_id(1) == 0)
    def _encode_once_per_batch_block():
        h = x_ref[...]                        # bf16; layer-1 cast below is a no-op
        h = linear_relu(h, w1_ref, sh1_ref)   # num_items -> 128
        h = linear_relu(h, w2_ref, sh2_ref)   # 128 -> 64
        h = linear_relu(h, w3_ref, sh3_ref)   # 64 -> 32   (latent)
        enc_ref[...] = h                      # resident across j; flushed on i change
        h = linear_relu(h, w4_ref, sh4_ref)   # 32 -> 64
        h = linear_relu(h, w5_ref, sh5_ref)   # 64 -> 128
        h5_ref[...] = h                       # persists across column blocks

    # Wide projection for this column tile: 128 -> tn, then sigmoid on the EUP.
    y = jnp.dot(h5_ref[...].astype(w6_ref.dtype), w6_ref[...],
                preferred_element_type=jnp.float32) + b6_ref[...]
    dec_ref[...] = pl.reciprocal(1.0 + jnp.exp(-y), approx=True).astype(dec_ref.dtype)


# -----------------------------------------------------------------------------
# Batch tiling: pad only to a multiple of 16 (bf16 sublane packing) and prefer a
# tile that divides the padded batch exactly (no wasted full-width decode rows).
# -----------------------------------------------------------------------------
def _choose_batch_tiling(batch, block_batch):
    block_batch = max(16, (block_batch // 16) * 16)
    pb = _round_up(batch, 16)
    if pb <= block_batch:
        return pb, pb
    q = pb // 16
    best = 16
    for d in range(1, q + 1):
        if q % d == 0 and 16 * d <= block_batch:
            best = 16 * d
    if best >= 64:
        return best, pb
    # Divisors too small (e.g. near-prime batch): accept a little padding instead
    # of tiny tiles that half-fill the MXU and multiply per-step overhead.
    return block_batch, _round_up(batch, block_batch)


def autoencoder_forward(x, params, *, block_batch=256, block_items=2048):
    """Pallas autoencoder forward (eval mode). Returns (decoded[bf16], encoded[f32]).

    block_batch: batch tile (>=256 recommended on v6e/v7x, 128-256 on v5e).
    block_items: item-column tile for the w6 projection / decoded output (multiple of 128).
    """
    batch, num_items = x.shape
    h1 = params["sh1"].shape[1]
    h2 = params["sh2"].shape[1]
    latent = params["sh3"].shape[1]

    # ---- item-dimension padding: lane-dense decoded store ------------------------------
    tn = max(128, (block_items // 128) * 128)
    n128 = _round_up(num_items, 128)
    if n128 <= tn:
        tn, n_pad = n128, n128
    else:
        n_pad = _round_up(num_items, tn)
    nc = n_pad // tn

    tb, padded_batch = _choose_batch_tiling(batch, block_batch)
    nb = padded_batch // tb

    # ---- dominant HBM streams in bf16 ---------------------------------------------------
    xp = jnp.pad(x, ((0, padded_batch - batch), (0, n_pad - num_items))).astype(jnp.bfloat16)

    w1, w6, b6 = params["w1"], params["w6"], params["b6"]
    if n_pad != num_items:
        w1 = jnp.pad(w1, ((0, n_pad - num_items), (0, 0)))
        w6 = jnp.pad(w6, ((0, 0), (0, n_pad - num_items)))
        b6 = jnp.pad(b6, ((0, 0), (0, n_pad - num_items)))

    resident_arrays = [
        w1, params["sh1"],
        params["w2"], params["sh2"],
        params["w3"], params["sh3"],
        params["w4"], params["sh4"],
        params["w5"], params["sh5"],
    ]

    def resident(arr):
        # Constant block index over the whole grid -> fetched once; single-buffered
        # so it does not occupy 2x its bytes in VMEM.
        try:
            return pl.BlockSpec(arr.shape, lambda i, j: (0, 0),
                                pipeline_mode=pl.Buffered(1))
        except TypeError:  # older BlockSpec without pipeline_mode kwarg
            return pl.BlockSpec(arr.shape, lambda i, j: (0, 0))

    in_specs = [pl.BlockSpec((tb, n_pad), lambda i, j: (i, 0))]        # x: refetched per i only
    in_specs += [resident(a) for a in resident_arrays]
    in_specs += [pl.BlockSpec((h1, tn), lambda i, j: (0, j)),          # w6 column tile
                 pl.BlockSpec((1, tn), lambda i, j: (0, j))]           # b6 column tile
    out_specs = (
        pl.BlockSpec((tb, tn), lambda i, j: (i, j)),                   # decoded (bf16, lane-dense)
        pl.BlockSpec((tb, latent), lambda i, j: (i, 0)),               # encoded (f32, narrow)
    )

    # ---- VMEM budget: mirrors the actual buffer plan ------------------------------------
    resident_bytes = sum(int(a.size) * a.dtype.itemsize for a in resident_arrays)  # x1 (Buffered(1))
    w6_blk = 2 * (h1 * tn * w6.dtype.itemsize + tn * b6.dtype.itemsize)            # double-buffered
    x_blk = 2 * tb * n_pad * 2
    dec_blk = 2 * tb * tn * 2
    enc_blk = 2 * tb * latent * 4
    scratch_bytes = tb * h1 * 4
    act_bytes = tb * 2 * (h1 + h2 + latent) * 4 + tb * tn * 4                      # temporaries
    need = resident_bytes + w6_blk + x_blk + dec_blk + enc_blk + scratch_bytes + act_bytes

    try:
        vmem_cap = int(pltpu.get_tpu_info().vmem_capacity_bytes)
    except Exception:
        vmem_cap = 128 << 20
    ceiling = (48 << 20) if vmem_cap <= (64 << 20) else (100 << 20)    # v7x vs v5e/v6e
    vmem_limit = int(min(max(need + (8 << 20), 16 << 20), ceiling))

    # ---- advisory cost estimate (bf16 I/O byte counts) -----------------------------------
    layer_dims = [(n_pad, h1), (h1, h2), (h2, latent), (latent, h2), (h2, h1), (h1, n_pad)]
    flops = int(2 * padded_batch * sum(fi * fo for fi, fo in layer_dims))
    weight_bytes = resident_bytes + int(w6.size) * w6.dtype.itemsize + int(b6.size) * b6.dtype.itemsize
    bytes_accessed = int(padded_batch * n_pad * 2        # x (bf16)
                         + padded_batch * n_pad * 2      # decoded (bf16)
                         + padded_batch * latent * 4     # encoded (f32)
                         + weight_bytes)

    decoded, encoded = pl.pallas_call(
        _autoencoder_kernel,
        out_shape=(
            jax.ShapeDtypeStruct((padded_batch, n_pad), jnp.bfloat16),
            jax.ShapeDtypeStruct((padded_batch, latent), jnp.float32),
        ),
        grid=(nb, nc),
        in_specs=in_specs,
        out_specs=out_specs,
        scratch_shapes=[pltpu.VMEM((tb, h1), jnp.float32)],
        compiler_params=pltpu.CompilerParams(
            dimension_semantics=("parallel", "arbitrary"),
            vmem_limit_bytes=vmem_limit,
        ),
        cost_estimate=pl.CostEstimate(
            flops=flops,
            transcendentals=int(2 * padded_batch * n_pad),   # exp + approx reciprocal
            bytes_accessed=bytes_accessed,
        ),
    )(xp, *resident_arrays, w6, b6)

    return decoded[:batch, :num_items], encoded[:batch]


# -----------------------------------------------------------------------------
# Deterministic parameter construction (mirrors __init__ of the PyTorch module),
# with the eval-mode BatchNorm affine folded into (weight, shift).
# -----------------------------------------------------------------------------
def xavier_uniform(key, out_features, in_features):
    bound = float(np.sqrt(6.0 / (in_features + out_features)))
    # PyTorch weight shape is (out, in); transpose to (in, out) for h @ W.
    w = jax.random.uniform(key, (out_features, in_features), jnp.float32, -bound, bound)
    return w.T


def build_params(key, num_items, hidden_dims=(128, 64, 32), bn_eps=1e-5,
                 weight_dtype=jnp.bfloat16):
    dims = [num_items] + list(hidden_dims)                 # encoder dims
    dec_dims = list(hidden_dims[::-1]) + [num_items]       # decoder dims (input is latent)

    keys = jax.random.split(key, 6)
    params = {}

    layer_shapes = [
        (dims[0], dims[1]),          # w1: num_items -> 128
        (dims[1], dims[2]),          # w2: 128 -> 64
        (dims[2], dims[3]),          # w3: 64 -> 32
        (dec_dims[0], dec_dims[1]),  # w4: 32 -> 64
        (dec_dims[1], dec_dims[2]),  # w5: 64 -> 128
    ]
    for i, (fin, fout) in enumerate(layer_shapes, start=1):
        w = xavier_uniform(keys[i - 1], fout, fin)                    # (fin, fout), f32
        bias = jnp.zeros((1, fout), jnp.float32)                      # nn.init.zeros_
        gamma = jnp.ones((1, fout), jnp.float32)                      # BN default affine
        beta = jnp.zeros((1, fout), jnp.float32)
        run_mean = jnp.zeros((1, fout), jnp.float32)                  # BN running stats (init)
        run_var = jnp.ones((1, fout), jnp.float32)

        scale = gamma / jnp.sqrt(run_var + bn_eps)
        w_folded = w * scale                                          # fold BN scale into columns
        shift = beta + (bias - run_mean) * scale                      # fold bias + BN shift

        params[f"w{i}"] = w_folded.astype(weight_dtype)               # dot inputs in bf16
        params[f"sh{i}"] = shift                                      # shifts stay f32

    # Final decoder Linear (128 -> num_items) + Sigmoid
    params["w6"] = xavier_uniform(keys[5], dec_dims[3], dec_dims[2]).astype(weight_dtype)
    params["b6"] = jnp.zeros((1, dec_dims[3]), jnp.float32)
    return params


# -----------------------------------------------------------------------------
# Pure-JAX reference (same folded params / same bf16 dot-input rounding)
# -----------------------------------------------------------------------------
def reference_forward(x, params):
    def lyr(h, i):
        w = params[f"w{i}"]
        y = jnp.dot(h.astype(w.dtype), w, preferred_element_type=jnp.float32)
        return jnp.maximum(y + params[f"sh{i}"], 0.0)

    h = x
    for i in (1, 2, 3):
        h = lyr(h, i)
    enc = h
    for i in (4, 5):
        h = lyr(h, i)
    w6 = params["w6"]
    logits = jnp.dot(h.astype(w6.dtype), w6, preferred_element_type=jnp.float32) + params["b6"]
    dec = jax.nn.sigmoid(logits)
    return dec, enc


if __name__ == "__main__":
    num_items = 1682          # MovieLens-100K-sized catalog; NOT a multiple of 128
    batch = 240
    hidden_dims = (128, 64, 32)

    key = jax.random.PRNGKey(0)
    pkey, xkey = jax.random.split(key)

    params = build_params(pkey, num_items, hidden_dims)
    x = jax.random.uniform(xkey, (batch, num_items), jnp.float32)   # user-rating vectors in [0,1]

    # Small block sizes here purely to exercise a multi-step (batch x item-column) grid
    # at demo scale; production defaults are block_batch=256, block_items=2048.
    decoded, encoded = autoencoder_forward(x, params, block_batch=128, block_items=896)
    jax.block_until_ready((decoded, encoded))

    dec_ref, enc_ref = reference_forward(x, params)
    assert decoded.shape == (batch, num_items)
    assert encoded.shape == (batch, hidden_dims[-1])
    # encoded: same bf16 dot-input rounding in kernel and reference -> tight tolerance.
    np.testing.assert_allclose(np.asarray(encoded), np.asarray(enc_ref), rtol=1e-3, atol=1e-3)
    # decoded: bf16 output + EUP approx-reciprocal sigmoid -> looser tolerance.
    np.testing.assert_allclose(np.asarray(decoded, dtype=np.float32), np.asarray(dec_ref),
                               rtol=2e-2, atol=1e-2)

    print("KERNEL_OK")
</pallas_src>

<mosaic_0001>
module attributes {stable_mosaic.version = 11 : i64} {
  func.func @_autoencoder_kernel(%arg0: i32, %arg1: i32, %arg2: memref<80x1792xbf16, #tpu.memory_space<vmem>>, %arg3: memref<1792x128xbf16, #tpu.memory_space<vmem>>, %arg4: memref<1x128xf32, #tpu.memory_space<vmem>>, %arg5: memref<128x64xbf16, #tpu.memory_space<vmem>>, %arg6: memref<1x64xf32, #tpu.memory_space<vmem>>, %arg7: memref<64x32xbf16, #tpu.memory_space<vmem>>, %arg8: memref<1x32xf32, #tpu.memory_space<vmem>>, %arg9: memref<32x64xbf16, #tpu.memory_space<vmem>>, %arg10: memref<1x64xf32, #tpu.memory_space<vmem>>, %arg11: memref<64x128xbf16, #tpu.memory_space<vmem>>, %arg12: memref<1x128xf32, #tpu.memory_space<vmem>>, %arg13: memref<128x896xbf16, #tpu.memory_space<vmem>>, %arg14: memref<1x896xf32, #tpu.memory_space<vmem>>, %arg15: memref<80x896xbf16, #tpu.memory_space<vmem>>, %arg16: memref<80x32xf32, #tpu.memory_space<vmem>>, %arg17: memref<80x128xf32, #tpu.memory_space<vmem>>) attributes {dimension_semantics = [#tpu.dimension_semantics<parallel>, #tpu.dimension_semantics<arbitrary>], iteration_bounds = array<i64: 3, 2>, scalar_prefetch = 0 : i64, scratch_operands = 1 : i64, tpu.core_type = #tpu.core_type<tc>, window_params = [{transform_indices = @transform_0, window_bounds = array<i64: 80, 1792>}, {pipeline_mode = #tpu.pipeline_mode<synchronous>, transform_indices = @transform_1, window_bounds = array<i64: 1792, 128>}, {pipeline_mode = #tpu.pipeline_mode<synchronous>, transform_indices = @transform_2, window_bounds = array<i64: 1, 128>}, {pipeline_mode = #tpu.pipeline_mode<synchronous>, transform_indices = @transform_3, window_bounds = array<i64: 128, 64>}, {pipeline_mode = #tpu.pipeline_mode<synchronous>, transform_indices = @transform_4, window_bounds = array<i64: 1, 64>}, {pipeline_mode = #tpu.pipeline_mode<synchronous>, transform_indices = @transform_5, window_bounds = array<i64: 64, 32>}, {pipeline_mode = #tpu.pipeline_mode<synchronous>, transform_indices = @transform_6, window_bounds = array<i64: 1, 32>}, {pipeline_mode = #tpu.pipeline_mode<synchronous>, transform_indices = @transform_7, window_bounds = array<i64: 32, 64>}, {pipeline_mode = #tpu.pipeline_mode<synchronous>, transform_indices = @transform_8, window_bounds = array<i64: 1, 64>}, {pipeline_mode = #tpu.pipeline_mode<synchronous>, transform_indices = @transform_9, window_bounds = array<i64: 64, 128>}, {pipeline_mode = #tpu.pipeline_mode<synchronous>, transform_indices = @transform_10, window_bounds = array<i64: 1, 128>}, {transform_indices = @transform_11, window_bounds = array<i64: 128, 896>}, {transform_indices = @transform_12, window_bounds = array<i64: 1, 896>}, {transform_indices = @transform_13, window_bounds = array<i64: 80, 896>}, {transform_indices = @transform_14, window_bounds = array<i64: 80, 32>}]} {
    %c0_i32 = arith.constant 0 : i32
    %0 = arith.cmpi eq, %arg1, %c0_i32 : i32
    %1 = arith.extui %0 : i1 to i32
    %c0_i32_0 = arith.constant 0 : i32
    %2 = arith.cmpi ne, %1, %c0_i32_0 : i32
    scf.if %2 {
      %c0_10 = arith.constant 0 : index
      %c0_11 = arith.constant 0 : index
      %18 = vector.load %arg2[%c0_10, %c0_11] : memref<80x1792xbf16, #tpu.memory_space<vmem>>, vector<80x1792xbf16>
      %c0_12 = arith.constant 0 : index
      %c0_13 = arith.constant 0 : index
      %19 = vector.load %arg3[%c0_12, %c0_13] : memref<1792x128xbf16, #tpu.memory_space<vmem>>, vector<1792x128xbf16>
      %cst_14 = arith.constant dense<0.000000e+00> : vector<80x128xf32>
      %20 = tpu.matmul %18, %19, %cst_14 {dimension_numbers = #tpu.dot_dimension_numbers<[1], [0], [0], [1], [0, 0, 1, 1], [], []>} : vector<80x1792xbf16>, vector<1792x128xbf16>, vector<80x128xf32> -> vector<80x128xf32>
      %c0_15 = arith.constant 0 : index
      %c0_16 = arith.constant 0 : index
      %21 = vector.load %arg4[%c0_15, %c0_16] : memref<1x128xf32, #tpu.memory_space<vmem>>, vector<1x128xf32>
      %22 = vector.broadcast %21 : vector<1x128xf32> to vector<80x128xf32>
      %23 = arith.addf %20, %22 : vector<80x128xf32>
      %cst_17 = arith.constant 0.000000e+00 : f32
      %24 = vector.broadcast %cst_17 : f32 to vector<80x128xf32>
      %25 = arith.maximumf %23, %24 : vector<80x128xf32>
      %26 = arith.truncf %25 : vector<80x128xf32> to vector<80x128xbf16>
      %c0_18 = arith.constant 0 : index
      %c0_19 = arith.constant 0 : index
      %27 = vector.load %arg5[%c0_18, %c0_19] : memref<128x64xbf16, #tpu.memory_space<vmem>>, vector<128x64xbf16>
      %cst_20 = arith.constant dense<0.000000e+00> : vector<80x64xf32>
      %28 = tpu.matmul %26, %27, %cst_20 {dimension_numbers = #tpu.dot_dimension_numbers<[1], [0], [0], [1], [0, 0, 1, 1], [], []>} : vector<80x128xbf16>, vector<128x64xbf16>, vector<80x64xf32> -> vector<80x64xf32>
      %c0_21 = arith.constant 0 : index
      %c0_22 = arith.constant 0 : index
      %29 = vector.load %arg6[%c0_21, %c0_22] : memref<1x64xf32, #tpu.memory_space<vmem>>, vector<1x64xf32>
      %30 = vector.broadcast %29 : vector<1x64xf32> to vector<80x64xf32>
      %31 = arith.addf %28, %30 : vector<80x64xf32>
      %cst_23 = arith.constant 0.000000e+00 : f32
      %32 = vector.broadcast %cst_23 : f32 to vector<80x64xf32>
      %33 = arith.maximumf %31, %32 : vector<80x64xf32>
      %34 = arith.truncf %33 : vector<80x64xf32> to vector<80x64xbf16>
      %c0_24 = arith.constant 0 : index
      %c0_25 = arith.constant 0 : index
      %35 = vector.load %arg7[%c0_24, %c0_25] : memref<64x32xbf16, #tpu.memory_space<vmem>>, vector<64x32xbf16>
      %cst_26 = arith.constant dense<0.000000e+00> : vector<80x32xf32>
      %36 = tpu.matmul %34, %35, %cst_26 {dimension_numbers = #tpu.dot_dimension_numbers<[1], [0], [0], [1], [0, 0, 1, 1], [], []>} : vector<80x64xbf16>, vector<64x32xbf16>, vector<80x32xf32> -> vector<80x32xf32>
      %c0_27 = arith.constant 0 : index
      %c0_28 = arith.constant 0 : index
      %37 = vector.load %arg8[%c0_27, %c0_28] : memref<1x32xf32, #tpu.memory_space<vmem>>, vector<1x32xf32>
      %38 = vector.broadcast %37 : vector<1x32xf32> to vector<80x32xf32>
      %39 = arith.addf %36, %38 : vector<80x32xf32>
      %cst_29 = arith.constant 0.000000e+00 : f32
      %40 = vector.broadcast %cst_29 : f32 to vector<80x32xf32>
      %41 = arith.maximumf %39, %40 : vector<80x32xf32>
      %c0_30 = arith.constant 0 : index
      %c0_31 = arith.constant 0 : index
      %42 = vector.load %arg16[%c0_30, %c0_31] : memref<80x32xf32, #tpu.memory_space<vmem>>, vector<80x32xf32>
      tpu.vector_store %arg16[%c0_30, %c0_31], %41 {strides = array<i32>} : memref<80x32xf32, #tpu.memory_space<vmem>>, vector<80x32xf32>,
      %43 = arith.truncf %41 : vector<80x32xf32> to vector<80x32xbf16>
      %c0_32 = arith.constant 0 : index
      %c0_33 = arith.constant 0 : index
      %44 = vector.load %arg9[%c0_32, %c0_33] : memref<32x64xbf16, #tpu.memory_space<vmem>>, vector<32x64xbf16>
      %cst_34 = arith.constant dense<0.000000e+00> : vector<80x64xf32>
      %45 = tpu.matmul %43, %44, %cst_34 {dimension_numbers = #tpu.dot_dimension_numbers<[1], [0], [0], [1], [0, 0, 1, 1], [], []>} : vector<80x32xbf16>, vector<32x64xbf16>, vector<80x64xf32> -> vector<80x64xf32>
      %c0_35 = arith.constant 0 : index
      %c0_36 = arith.constant 0 : index
      %46 = vector.load %arg10[%c0_35, %c0_36] : memref<1x64xf32, #tpu.memory_space<vmem>>, vector<1x64xf32>
      %47 = vector.broadcast %46 : vector<1x64xf32> to vector<80x64xf32>
      %48 = arith.addf %45, %47 : vector<80x64xf32>
      %cst_37 = arith.constant 0.000000e+00 : f32
      %49 = vector.broadcast %cst_37 : f32 to vector<80x64xf32>
      %50 = arith.maximumf %48, %49 : vector<80x64xf32>
      %51 = arith.truncf %50 : vector<80x64xf32> to vector<80x64xbf16>
      %c0_38 = arith.constant 0 : index
      %c0_39 = arith.constant 0 : index
      %52 = vector.load %arg11[%c0_38, %c0_39] : memref<64x128xbf16, #tpu.memory_space<vmem>>, vector<64x128xbf16>
      %cst_40 = arith.constant dense<0.000000e+00> : vector<80x128xf32>
      %53 = tpu.matmul %51, %52, %cst_40 {dimension_numbers = #tpu.dot_dimension_numbers<[1], [0], [0], [1], [0, 0, 1, 1], [], []>} : vector<80x64xbf16>, vector<64x128xbf16>, vector<80x128xf32> -> vector<80x128xf32>
      %c0_41 = arith.constant 0 : index
      %c0_42 = arith.constant 0 : index
      %54 = vector.load %arg12[%c0_41, %c0_42] : memref<1x128xf32, #tpu.memory_space<vmem>>, vector<1x128xf32>
      %55 = vector.broadcast %54 : vector<1x128xf32> to vector<80x128xf32>
      %56 = arith.addf %53, %55 : vector<80x128xf32>
      %cst_43 = arith.constant 0.000000e+00 : f32
      %57 = vector.broadcast %cst_43 : f32 to vector<80x128xf32>
      %58 = arith.maximumf %56, %57 : vector<80x128xf32>
      %c0_44 = arith.constant 0 : index
      %c0_45 = arith.constant 0 : index
      %59 = vector.load %arg17[%c0_44, %c0_45] : memref<80x128xf32, #tpu.memory_space<vmem>>, vector<80x128xf32>
      tpu.vector_store %arg17[%c0_44, %c0_45], %58 {strides = array<i32>} : memref<80x128xf32, #tpu.memory_space<vmem>>, vector<80x128xf32>,
    } else {
    }
    %c0 = arith.constant 0 : index
    %c0_1 = arith.constant 0 : index
    %3 = vector.load %arg17[%c0, %c0_1] : memref<80x128xf32, #tpu.memory_space<vmem>>, vector<80x128xf32>
    %4 = arith.truncf %3 : vector<80x128xf32> to vector<80x128xbf16>
    %c0_2 = arith.constant 0 : index
    %c0_3 = arith.constant 0 : index
    %5 = vector.load %arg13[%c0_2, %c0_3] : memref<128x896xbf16, #tpu.memory_space<vmem>>, vector<128x896xbf16>
    %cst = arith.constant dense<0.000000e+00> : vector<80x896xf32>
    %6 = tpu.matmul %4, %5, %cst {dimension_numbers = #tpu.dot_dimension_numbers<[1], [0], [0], [1], [0, 0, 1, 1], [], []>} : vector<80x128xbf16>, vector<128x896xbf16>, vector<80x896xf32> -> vector<80x896xf32>
    %c0_4 = arith.constant 0 : index
    %c0_5 = arith.constant 0 : index
    %7 = vector.load %arg14[%c0_4, %c0_5] : memref<1x896xf32, #tpu.memory_space<vmem>>, vector<1x896xf32>
    %8 = vector.broadcast %7 : vector<1x896xf32> to vector<80x896xf32>
    %9 = arith.addf %6, %8 : vector<80x896xf32>
    %cst_6 = arith.constant 0.000000e+00 : f32
    %10 = vector.broadcast %cst_6 : f32 to vector<80x896xf32>
    %11 = arith.subf %10, %9 : vector<80x896xf32>
    %12 = math.exp %11 : vector<80x896xf32>
    %cst_7 = arith.constant 1.000000e+00 : f32
    %13 = vector.broadcast %cst_7 : f32 to vector<80x896xf32>
    %14 = arith.addf %13, %12 : vector<80x896xf32>
    %15 = tpu.reciprocal %14 {approx = true} : vector<80x896xf32> -> vector<80x896xf32>
    %16 = arith.truncf %15 : vector<80x896xf32> to vector<80x896xbf16>
    %c0_8 = arith.constant 0 : index
    %c0_9 = arith.constant 0 : index
    %17 = vector.load %arg15[%c0_8, %c0_9] : memref<80x896xbf16, #tpu.memory_space<vmem>>, vector<80x896xbf16>
    tpu.vector_store %arg15[%c0_8, %c0_9], %16 {strides = array<i32>} : memref<80x896xbf16, #tpu.memory_space<vmem>>, vector<80x896xbf16>,
    return
  }
  func.func @transform_0(%arg0: i32, %arg1: i32) -> (i32, i32) {
    %c0_i32 = arith.constant 0 : i32
    %c0_i32_0 = arith.constant 0 : i32
    return %arg0, %c0_i32 : i32, i32
  }
  func.func @transform_1(%arg0: i32, %arg1: i32) -> (i32, i32) {
    %c0_i32 = arith.constant 0 : i32
    %c0_i32_0 = arith.constant 0 : i32
    %c0_i32_1 = arith.constant 0 : i32
    return %c0_i32, %c0_i32_0 : i32, i32
  }
  func.func @transform_2(%arg0: i32, %arg1: i32) -> (i32, i32) {
    %c0_i32 = arith.constant 0 : i32
    %c0_i32_0 = arith.constant 0 : i32
    %c0_i32_1 = arith.constant 0 : i32
    return %c0_i32, %c0_i32_0 : i32, i32
  }
  func.func @transform_3(%arg0: i32, %arg1: i32) -> (i32, i32) {
    %c0_i32 = arith.constant 0 : i32
    %c0_i32_0 = arith.constant 0 : i32
    %c0_i32_1 = arith.constant 0 : i32
    return %c0_i32, %c0_i32_0 : i32, i32
  }
  func.func @transform_4(%arg0: i32, %arg1: i32) -> (i32, i32) {
    %c0_i32 = arith.constant 0 : i32
    %c0_i32_0 = arith.constant 0 : i32
    %c0_i32_1 = arith.constant 0 : i32
    return %c0_i32, %c0_i32_0 : i32, i32
  }
  func.func @transform_5(%arg0: i32, %arg1: i32) -> (i32, i32) {
    %c0_i32 = arith.constant 0 : i32
    %c0_i32_0 = arith.constant 0 : i32
    %c0_i32_1 = arith.constant 0 : i32
    return %c0_i32, %c0_i32_0 : i32, i32
  }
  func.func @transform_6(%arg0: i32, %arg1: i32) -> (i32, i32) {
    %c0_i32 = arith.constant 0 : i32
    %c0_i32_0 = arith.constant 0 : i32
    %c0_i32_1 = arith.constant 0 : i32
    return %c0_i32, %c0_i32_0 : i32, i32
  }
  func.func @transform_7(%arg0: i32, %arg1: i32) -> (i32, i32) {
    %c0_i32 = arith.constant 0 : i32
    %c0_i32_0 = arith.constant 0 : i32
    %c0_i32_1 = arith.constant 0 : i32
    return %c0_i32, %c0_i32_0 : i32, i32
  }
  func.func @transform_8(%arg0: i32, %arg1: i32) -> (i32, i32) {
    %c0_i32 = arith.constant 0 : i32
    %c0_i32_0 = arith.constant 0 : i32
    %c0_i32_1 = arith.constant 0 : i32
    return %c0_i32, %c0_i32_0 : i32, i32
  }
  func.func @transform_9(%arg0: i32, %arg1: i32) -> (i32, i32) {
    %c0_i32 = arith.constant 0 : i32
    %c0_i32_0 = arith.constant 0 : i32
    %c0_i32_1 = arith.constant 0 : i32
    return %c0_i32, %c0_i32_0 : i32, i32
  }
  func.func @transform_10(%arg0: i32, %arg1: i32) -> (i32, i32) {
    %c0_i32 = arith.constant 0 : i32
    %c0_i32_0 = arith.constant 0 : i32
    %c0_i32_1 = arith.constant 0 : i32
    return %c0_i32, %c0_i32_0 : i32, i32
  }
  func.func @transform_11(%arg0: i32, %arg1: i32) -> (i32, i32) {
    %c0_i32 = arith.constant 0 : i32
    %c0_i32_0 = arith.constant 0 : i32
    return %c0_i32, %arg1 : i32, i32
  }
  func.func @transform_12(%arg0: i32, %arg1: i32) -> (i32, i32) {
    %c0_i32 = arith.constant 0 : i32
    %c0_i32_0 = arith.constant 0 : i32
    return %c0_i32, %arg1 : i32, i32
  }
  func.func @transform_13(%arg0: i32, %arg1: i32) -> (i32, i32) {
    %c0_i32 = arith.constant 0 : i32
    return %arg0, %arg1 : i32, i32
  }
  func.func @transform_14(%arg0: i32, %arg1: i32) -> (i32, i32) {
    %c0_i32 = arith.constant 0 : i32
    %c0_i32_0 = arith.constant 0 : i32
    return %arg0, %c0_i32 : i32, i32
  }
}

</mosaic_0001>

<bundles_post_ra>
// kernel: tpu_custom_call.1
= control target key start
LH: loop header
LB: loop body
LE: loop exit
PB: predicated region body
PF: predicated region fallthrough
CT: control target
= control target key end

     0   :  { %s7665_s0 = inlined_call_operand.hbm [shape: bf16[240,1792], index: 0, kind: input, shape index: {}]   ;;  %s7666_s1 = inlined_call_operand.hbm [shape: bf16[1792,128], index: 1, kind: input, shape index: {}]   ;;  %s7667_s2 = inlined_call_operand.vmem [shape: f32[1,128], index: 2, kind: input, shape index: {}]   ;;  %s7668_s3 = inlined_call_operand.vmem [shape: bf16[128,64], index: 3, kind: input, shape index: {}]   ;;  %s7669_s4 = inlined_call_operand.vmem [shape: f32[1,64], index: 4, kind: input, shape index: {}]   ;;  %s7670_s5 = inlined_call_operand.vmem [shape: bf16[64,32], index: 5, kind: input, shape index: {}]   ;;  %s7671_s6 = inlined_call_operand.vmem [shape: f32[1,32], index: 6, kind: input, shape index: {}]   ;;  %s7672_s7 = inlined_call_operand.vmem [shape: bf16[32,64], index: 7, kind: input, shape index: {}]   ;;  %s7673_s8 = inlined_call_operand.vmem [shape: f32[1,64], index: 8, kind: input, shape index: {}]   ;;  %s7674_s9 = inlined_call_operand.vmem [shape: bf16[64,128], index: 9, kind: input, shape index: {}]   ;;  %s7675_s10 = inlined_call_operand.vmem [shape: f32[1,128], index: 10, kind: input, shape index: {}]   ;;  %s7676_s11 = inlined_call_operand.hbm [shape: bf16[128,1792], index: 11, kind: input, shape index: {}]   ;;  %s7677_s12 = inlined_call_operand.vmem [shape: f32[1,1792], index: 12, kind: input, shape index: {}]   ;;  %s7678_s13 = inlined_call_operand.hbm [shape: bf16[240,1792], index: 13, kind: output, shape index: {0}]   ;;  %s7679_s14 = inlined_call_operand.vmem [shape: f32[240,32], index: 14, kind: output, shape index: {1}]  }
   0x1   :  { %7700 = sst [smem:[#allocation39_spill]] %s7665_s0 }
   0x2   :  { %7701 = sst [smem:[#allocation40_spill]] %s7667_s2 }
   0x3   :  { %7702 = sst [smem:[#allocation41_spill]] %s7668_s3 }
   0x4   :  { %7703 = sst [smem:[#allocation42_spill]] %s7669_s4 }
   0x5   :  { %7704 = sst [smem:[#allocation43_spill]] %s7670_s5 }
   0x6   :  { %7705 = sst [smem:[#allocation44_spill]] %s7671_s6 }
   0x7   :  { %7706 = sst [smem:[#allocation45_spill]] %s7672_s7 }
   0x8   :  { %7707 = sst [smem:[#allocation46_spill]] %s7673_s8 }
   0x9   :  { %7708 = sst [smem:[#allocation47_spill]] %s7674_s9 }
   0xa   :  { %7709 = sst [smem:[#allocation48_spill]] %s7675_s10 }
   0xb   :  { %7710 = sst [smem:[#allocation49_spill]] %s7677_s12 }
   0xc   :  { %7711 = sst [smem:[#allocation50_spill]] %s7678_s13 }
   0xd   :  { %7712 = sst [smem:[#allocation51_spill]] %s7679_s14 }
   0xe   :  { %20 = vsyncpa [#allocation4], 0 }
   0xf   :  { %22 = vsyncpa [#allocation4 + $0x1], 0 }
  0x10   :  { %23 = vsyncpa [#allocation7], 0 }
  0x11   :  { %24 = vsyncpa [#allocation5], 0 }
  0x12   :  { %26 = vsyncpa [#allocation5 + $0x1], 0  ;;  %s6536_s29 = smov 0   ;;  %s6538_s30 = smov 0  }
  0x13   :  { %s6540_s15 = smov 0   ;;  %s6542_s16 = smov 0  }
  0x14   :  { %s6544_s17 = smov 0   ;;  %s6546_s18 = smov 0  }
  0x15   :  { %s6548_s19 = smov 0   ;;  %s6550_s20 = smov 0  }
  0x16   :  { %s6552_s21 = smov 0   ;;  %s6554_s22 = smov 0  }
  0x17   :  { %s6556_s23 = smov 0   ;;  %s6558_s24 = smov 0  }
  0x18   :  { %s6560_s25 = smov 0   ;;  %s6562_s26 = smov 0  }
  0x19 LB: > { %7713 = sst [smem:[#allocation14_spill]] %s6397_s15  ;;  %s41_s27 = sadd.s32 1, %s6433_s24  ;;  %s6441_s26 = sphi %s6562_s26, %s32_s26   ;;  %s6437_s25 = sphi %s6560_s25, %s7810_s25   ;;  %s6433_s24 = sphi %s6558_s24, %s7800_s24   ;;  %s6429_s23 = sphi %s6556_s23, %s7799_s23   ;;  %s6425_s22 = sphi %s6554_s22, %s7798_s22   ;;  %s6421_s21 = sphi %s6552_s21, %s7809_s21   ;;  %s6417_s20 = sphi %s6550_s20, %s7808_s20   ;;  %s6413_s19 = sphi %s6548_s19, %s7807_s19   ;;  %s6409_s18 = sphi %s6546_s18, %s7795_s18   ;;  %s6405_s17 = sphi %s6544_s17, %s7806_s17   ;;  %s6401_s16 = sphi %s6542_s16, %s7805_s16   ;;  %s6397_s15 = sphi %s6540_s15, %s7793_s15   ;;  %s6393_s30 = sphi %s6538_s30, %s7804_s30   ;;  %s6389_s29 = sphi %s6536_s29, %s7803_s29  }
  0x1a   : > { %7714 = sst [smem:[#allocation15_spill]] %s6409_s18  ;;  %s44_s28 = sadd.s32 1, %s6437_s25 }
  0x1b   : > { %7715 = sst [smem:[#allocation16_spill]] %s6421_s21  ;;  %p42_p0 = scmp.ge.s32.totalorder %s41_s27, 2 }
  0x1c   : > { %7716 = sst [smem:[#allocation17_spill]] %s6425_s22  ;;  %s51_s13 = sadd.s32 1, %s6421_s21 }
  0x1d   : > { %7717 = sst [smem:[#allocation18_spill]] %s6429_s23  ;;  %p58_p1 = scmp.ne.s32.totalorder %s6421_s21, %s6417_s20 }
  0x1e   : > { %7718 = sst [smem:[#allocation19_spill]] %s6433_s24  ;;  %p59_p2 = scmp.eq.s32.totalorder %s6441_s26, 0 }
  0x1f   : > { %7719 = sst [smem:[#allocation20_spill]] %s6437_s25  ;;  %s7812_s27 = smov (%p42_p0, %s41_s27), 0 }
  0x20   : > { %7720 = sst [smem:[#allocation21_spill]] %s7812_s27  ;;  %s7814_s28 = smov (!%p42_p0, %s44_s28), %s6437_s25 }
  0x21   : > { %p6617_p3 = por %p59_p2, %p58_p1  ;;  %s6623_s8 = ssub.s32 %s6433_s24, %s7812_s27 }
  0x22   : > { %p46_p4 = scmp.ge.s32.totalorder %s7814_s28, 3  ;;  %p285_p5 = scmp.eq.s32.totalorder %s6623_s8, 0 }
  0x23   : > { %p5480_p6 = scmp.lt.s32.totalorder %s6441_s26, 6  ;;  %s444_s6 = sand.u32 1, %s6441_s26  }
  0x24   : > { %s7816_s28 = smov (%p46_p4, %s7814_s28), 0  ;;  %s446_s9 = sand.u32 1, %s6421_s21  }
  0x25   : > { %7722 = sst [smem:[#allocation22_spill]] %s7816_s28  ;;  %s48_s7 = ssub.s32 %s6437_s25, %s7816_s28 }
  0x26   : > { %p49_p7 = scmp.eq.s32.totalorder %s48_s7, 0  ;;  %s338_s4 = sor.u32 %s6623_s8, %s48_s7 }
  0x27   : > { %p6634_p8 = scmp.eq.s32.totalorder %s338_s4, 0  ;;  %s5447_s27 = smul.u32 560, %s446_s9 }
  0x28   : > { %s6639_s2 = scalar_select %p49_p7, %s6421_s21, %s51_s13  }
  0x29   : > { %s5481_s3 = smul.u32 8960, %s6437_s25  ;;  %s448_s14 = scalar_lea.vmem [#allocation3], %s5447_s27 }
  0x2a   : > { %7724 = sst [smem:[#allocation23_spill]] %s6639_s2  ;;  %s456_s12 = sshll.u32 %s448_s14, 4  ;;  %s457_s12 = int_to_ptr.vmem [resolvable:$true] %s456_s12 }
  0x2b   : > { %p6646_p9 = pnand %p5480_p6, %p6617_p3  ;;  %s7726_s0 = sld [smem:[#allocation39_spill]] }
  0x2c   : > { %s6653_s7 = scalar_lea.sflag [#allocation4], %s444_s6  ;;  %s6220_s9 = scalar_lea.vmem %s457_s12, 8960 }
  0x2d   : > { %p6209_p10 = pneg %p6646_p9  ;;  %p6221_p11 = scmp.ne.s32.totalorder %s457_s12, %s6220_s9 }
  0x2e   : > { %s6443_s13 = smov [#allocation3]  }
  0x2f   : > { %p6223_p12 = pnand %p6221_p11, %p6209_p10  ;;  %s6225_s10 = sshll.u32 %s6443_s13, 4  ;;  %s6226_s10 = int_to_ptr.vmem [resolvable:$false] %s6225_s10 }
  0x30   : > { %s6227_s14 = scalar_lea.vmem %s6226_s10, 17920  ;;  %p6228_p0 = scmp.lt.s32.totalorder %s457_s12, %s6226_s10 }
  0x31   : > { %s455_s4 = scalar_lea.hbm %s7726_s0, %s5481_s3  ;;  %p6224_p13 = pneg %p6223_p12 }
  0x32   : > { %p6229_p1 = scmp.lt.s32.totalorder %s6227_s14, %s6220_s9 }
  0x34   : > { %p6230_p3 = por %p6229_p1, %p6228_p0 }
  0x36   : > { %p6231_p4 = pnand %p6230_p3, %p6224_p13 }
  0x38   : > { %6234 = shalt.err (!%p6231_p4)
}
  0x39   : > { %s7689_s22 = smov 896   ;;  %s6445_s3 = smov 56  }
  0x3a   : > { %5471 = dma.hbm_to_vmem [thread:$0]  (!%p6646_p9), %s455_s4, 8960, %s457_s12, %s6653_s7, %s7689_s22, %s7689_s22, %s6445_s3  }
  0x3b   : > { %s6663_s6 = sadd.s32 4294967295, %s6441_s26   ;;  %s4544_s27 = sadd.s32 4294967294, %s6441_s26  }
  0x3c   : > { %p64_p7 = scmp.ne.s32.totalorder %s6417_s20, %s6413_s19  ;;  %p7688_p10 = scmp.eq.s32.totalorder %s6663_s6, 0 }
  0x3d   : > { %s287_s28 = sadd.s32 1, %s6409_s18  ;;  %p294_p11 = scmp.ne.s32.totalorder %s6409_s18, %s6405_s17 }
  0x3e   : > { %p6674_p12 = por %p7688_p10, %p64_p7  ;;  %p300_p9 = scmp.ne.s32.totalorder %s6405_s17, %s6401_s16 }
  0x3f   : > { %s6683_s12 = scalar_select %p285_p5, %s6409_s18, %s287_s28  }
  0x40   : > { %p6687_p13 = por %p294_p11, %p59_p2  ;;  %p6693_p0 = por %p300_p9, %p7688_p10 }
  0x41   : > { %7728 = sst [smem:[#allocation24_spill]] %s6683_s12  ;;  %s341_s9 = sadd.s32 1, %s6397_s15 }
  0x42   : > { %s7730_s19 = scalar_select %p6693_p0, 1, 0 }
  0x43   : > { %p351_p1 = scmp.ne.s32.totalorder %s6397_s15, %s6393_s30  ;;  %p352_p5 = scmp.eq.s32.totalorder %s6663_s6, 5 }
  0x44   : > { %s6703_s8 = scalar_select %p6634_p8, %s6397_s15, %s341_s9  }
  0x45   : > { %p357_p2 = scmp.ne.s32.totalorder %s6393_s30, %s6389_s29  ;;  %p358_p3 = scmp.eq.s32.totalorder %s4544_s27, 5 }
  0x46   : > { %7731 = sst [smem:[#allocation25_spill]] %s6703_s8  ;;  %p4545_p4 = scmp.ge.s32.totalorder %s6441_s26, 1 }
  0x47   : > { %p6709_p7 = por %p352_p5, %p351_p1  ;;  %p391_p11 = scmp.lt.s32.totalorder %s6441_s26, 7 }
  0x48   : > { %p6714_p9 = por %p358_p3, %p357_p2  ;;  %s6446_s5 = smov [#allocation6]  }
  0x49   : > { %s7732_s16 = scalar_select %p6709_p7, 1, 0 }
  0x4a   : > { %s7733_s13 = scalar_select %p6714_p9, 1, 0 }
  0x4b   : > { %p6718_p10 = pnand %p4545_p4, %p391_p11  ;;  %s403_s14 = sshll.u32 %s6446_s5, 4  ;;  %s404_s14 = int_to_ptr.vmem [resolvable:$true] %s403_s14 }
  0x4c   : > { %p6728_p1 = pnand %p5480_p6, %p6687_p13  ;;  %p7736_p5 = scmp.eq.s32.totalorder %s6663_s6, 0 }
  0x4d   : > { %p5464_p8 = pneg %p6718_p10  ;;  %s468_s28 = sand.u32 1, %s6409_s18  }
  0x4e   : > { %s5449_s9 = smul.u32 448, %s468_s28  ;;  %s6246_s5 = scalar_lea.vmem %s404_s14, 14336 }
  0x4f   : > { %p6734_p2 = pnand %p5464_p8, %p7736_p5  ;;  %s4873_s22 = smul.u32 448, %s6433_s24 }
  0x50   : > { %p6247_p4 = scmp.ne.s32.totalorder %s404_s14, %s6246_s5  ;;  %p6254_p7 = scmp.lt.s32.totalorder %s404_s14, %s404_s14 }
  0x51   : > { %p6237_p3 = pneg %p6734_p2  ;;  %p6255_p6 = scmp.lt.s32.totalorder %s6246_s5, %s6246_s5 }
  0x53   : > { %p6249_p11 = pnand %p6247_p4, %p6237_p3  ;;  %p6256_p13 = por %p6255_p6, %p6254_p7 }
  0x55   : > { %p6250_p9 = pneg %p6249_p11 }
  0x57   : > { %p6257_p0 = pnand %p6256_p13, %p6250_p9 }
  0x59   : > { %6260 = shalt.err (!%p6257_p0)
}
  0x5a   : > { %s6447_s4 = smov 64   ;;  %s6448_s0 = smov 4  }
  0x5b   : > { %5467 = dma.hbm_to_vmem [thread:$0]  (!%p6734_p2), %s7666_s1, 14336, %s404_s14, [#allocation7], %s6447_s4, %s6447_s4, %s6448_s0  }
  0x5c   : > { %s476_s21 = scalar_lea.hbm %s7676_s11, %s4873_s22  ;;  %s470_s12 = scalar_lea.vmem [#allocation8], %s5449_s9 }
  0x5d   : > { %s477_s18 = sshll.u32 %s470_s12, 4  ;;  %p6263_p7 = pneg %p6728_p1  ;;  %s478_s18 = int_to_ptr.vmem [resolvable:$true] %s477_s18 }
  0x5e   : > { %s6274_s5 = scalar_lea.vmem %s478_s18, 7168  ;;  %s6449_s8 = smov [#allocation8]  }
  0x5f   : > { %p6275_p0 = scmp.ne.s32.totalorder %s478_s18, %s6274_s5  ;;  %s6279_s15 = sshll.u32 %s6449_s8, 4  ;;  %s6280_s15 = int_to_ptr.vmem [resolvable:$false] %s6279_s15 }
  0x60   : > { %s6281_s27 = scalar_lea.vmem %s6280_s15, 14336  ;;  %p6282_p5 = scmp.lt.s32.totalorder %s478_s18, %s6280_s15 }
  0x61   : > { %p6277_p9 = pnand %p6275_p0, %p6263_p7  ;;  %p6283_p3 = scmp.lt.s32.totalorder %s6281_s27, %s6274_s5 }
  0x63   : > { %p6278_p8 = pneg %p6277_p9  ;;  %p6284_p2 = por %p6283_p3, %p6282_p5 }
  0x65   : > { %p6285_p4 = pnand %p6284_p2, %p6278_p8 }
  0x67   : > { %6288 = shalt.err (!%p6285_p4)
}
  0x68   : > { %s6450_s0 = smov 448   ;;  %s6451_s2 = smov 28  }
  0x69   : > { %s7738_s24 = smov 896   ;;  %497 = sbr.rel (%p6718_p10) target bundleno = 1751 (0x6d7), region = 72 }
  0x6a   : > { %5474 = dma.hbm_to_vmem [thread:$0]  (!%p6728_p1), %s476_s21, 7168, %s478_s18, %s6653_s7, %s7738_s24, %s6450_s0, %s6451_s2  }
  0x6b   : > { %s499_s25 = sand.u32 (!%p6718_p10), 1, %s6663_s6   ;;  %s501_s22 = sand.u32 (!%p6718_p10), 1, %s6417_s20  }
  0x6c   : > { %s5450_s15 = smul.u32 (!%p6718_p10), 560, %s501_s22  ;;  %s500_s12 = scalar_lea.sflag (!%p6718_p10), [#allocation4], %s499_s25 }
  0x6e   : > { %s6760_s8 = scalar_lea.vmem [#allocation3], %s5450_s15 }
  0x6f   : > { %6372 = dma.done.wait (%p6674_p12), %s500_s12, 8960  }
  0x70   : > { %6374 = vsyncadd (%p6674_p12), %s500_s12, 4294958336  ;;  %p7739_p11 = scmp.eq.s32.totalorder %s6663_s6, 0 }
  0x72   : > { %6376 = dma.done.wait (%p7739_p11), [#allocation7], 14336   ;;  %p7740_p1 = pmov %p7739_p11 }
  0x73   : > { %s514_s18 = sand.u32 1, %s6405_s17   ;;  %p7741_p10 = scmp.ne.s32.totalorder %s7730_s19, 0 }
  0x74   : > { %6378 = vsyncadd (%p7740_p1), [#allocation7], 4294952960  ;;  %s5451_s21 = smul.u32 448, %s514_s18 }
  0x76   : > { %s6771_s7 = scalar_lea.vmem [#allocation8], %s5451_s21 }
  0x77   : > { %6380 = dma.done.wait (%p7741_p10), %s500_s12, 7168  }
  0x78   : > { %6382 = vsyncadd (%p7741_p10), %s500_s12, 4294960128  ;;  %s7742_s23 = sld [smem:[#allocation17_spill]]  ;;  %s565_s14 = sand.u32 1, %s6393_s30  }
  0x79   : > { %s7743_s10 = sld [smem:[#allocation18_spill]]  ;;  %s5452_s6 = smul.u32 280, %s565_s14 }
  0x7a   : > { %s7744_s5 = sld [smem:[#allocation49_spill]] }
  0x7b   : > { %s7745_s25 = sld [smem:[#allocation51_spill]]  ;;  %s6797_s15 = scalar_lea.vmem [#allocation9], %s5452_s6 }
  0x7e   : > { %s6779_s3 = smul.u32 7, %s7742_s23  ;;  %p4553_p13 = scmp.ne.s32.totalorder %s7742_s23, 0 }
  0x7f   : > { %s584_s9 = smul.u32 10, %s7743_s10 }
  0x80   : > { %p578_p12 = scmp.lt.s32.totalorder %s6779_s3, 13 }
  0x81   : > { %p585_p6 = scmp.lt.s32.totalorder %s584_s9, 29  ;;  %594 = sbr.rel (%p4553_p13) target bundleno = 1337 (0x539), region = 88 }
  0x82   : > { %s6786_s4 = scalar_select %p578_p12, %s6779_s3, 13 }
  0x83   : > { %s7818_s9 = smov (!%p585_p6, %s584_s9), 29 }
  0x84   : > { %s580_s27 = scalar_lea.vmem %s7744_s5, %s6786_s4  ;;  %s4552_s0 = sshll.u32 %s7818_s9, 3 }
  0x85   : > { %s6795_s22 = scalar_lea.vmem %s7745_s25, %s4552_s0 }
  0x86   : > { %v5612_v0 = vld [vmem:[#allocation6 + $0x78] sm:$0xff]   ;;  %v5616_v4 = vld [vmem:[#allocation6 + $0x70] sm:$0xff]   ;;  %v5620_v8 = vld [vmem:[#allocation6 + $0x68] sm:$0xff]   ;;  %s7746_s21 = sld [smem:[#allocation41_spill]]  ;;  %vm6453_vm0 = vmmov 0   ;;  %vm2642_vm1 = vcmask 523264  }
  0x87   : > { %v5613_v1 = vld [vmem:[#allocation6 + $0x38] sm:$0xff]   ;;  %4914 = vmatprep.subr.bf16.mxu0 %v5612_v0  ;;  %v5617_v5 = vld [vmem:[#allocation6 + $0x30] sm:$0xff]   ;;  %v5621_v9 = vld [vmem:[#allocation6 + $0x28] sm:$0xff]   ;;  %s7748_s2 = sld [smem:[#allocation40_spill]]  ;;  %vm2741_vm2 = vcmask 261120  }
  0x88   : > { %v5614_v2 = vld [vmem:[#allocation6 + $0xf8] sm:$0xff]   ;;  %4915 = vmatpush3.bf16.msra.mxu0 %v5613_v1  ;;  %v5618_v6 = vld [vmem:[#allocation6 + $0xf0] sm:$0xff]   ;;  %v5622_v10 = vld [vmem:[#allocation6 + $0xe8] sm:$0xff]   ;;  %s7749_s19 = sld [smem:[#allocation43_spill]] }
  0x89   : > { %v5615_v3 = vld [vmem:[#allocation6 + $0xb8] sm:$0xff]   ;;  %4960 = vmatprep.subr.bf16.mxu1 %v5614_v2  ;;  %4916 = vmatprep.subr.bf16.mxu0 %v5616_v4  ;;  %v5619_v7 = vld [vmem:[#allocation6 + $0xb0] sm:$0xff]   ;;  %v5623_v11 = vld [vmem:[#allocation6 + $0xa8] sm:$0xff]   ;;  %s7778_s6 = sld [smem:[#allocation42_spill]] }
  0x8a   : > { %4961 = vmatpush3.bf16.msra.mxu1 %v5615_v3  ;;  %v5624_v12 = vld [vmem:[#allocation6 + $0x60] sm:$0xff]   ;;  %v5628_v16 = vld [vmem:[#allocation6 + $0x58] sm:$0xff]   ;;  %v5632_v20 = vld [vmem:[#allocation6 + $0x50] sm:$0xff]   ;;  %s7779_s28 = sld [smem:[#allocation45_spill]] }
  0x8b   : > { %4962 = vmatprep.subr.bf16.mxu1 %v5618_v6  ;;  %v5625_v13 = vld [vmem:[#allocation6 + $0x20] sm:$0xff]   ;;  %v5629_v17 = vld [vmem:[#allocation6 + $0x18] sm:$0xff]   ;;  %v5633_v21 = vld [vmem:[#allocation6 + $0x10] sm:$0xff]   ;;  %s7780_s25 = sld [smem:[#allocation47_spill]] }
  0x8c   : > { %4917 = vmatpush3.bf16.msra.mxu0 %v5617_v5  ;;  %v5626_v14 = vld [vmem:[#allocation6 + $0xe0] sm:$0xff]   ;;  %v5630_v18 = vld [vmem:[#allocation6 + $0xd8] sm:$0xff]   ;;  %v5634_v22 = vld [vmem:[#allocation6 + $0xd0] sm:$0xff]   ;;  %s7747_s10 = smov %s7746_s21  ;;  %s7782_s23 = sld [smem:[#allocation44_spill]] }
  0x8d   : > { %4918 = vmatprep.subr.bf16.mxu0 %v5620_v8  ;;  %v5627_v15 = vld [vmem:[#allocation6 + $0xa0] sm:$0xff]   ;;  %v5631_v19 = vld [vmem:[#allocation6 + $0x98] sm:$0xff]   ;;  %v5635_v23 = vld [vmem:[#allocation6 + $0x90] sm:$0xff]  }
  0x8e   : > { %4963 = vmatpush3.bf16.msra.mxu1 %v5619_v7  ;;  %v5636_v24 = vld [vmem:[#allocation6 + $0x48] sm:$0xff]   ;;  %v5640_v28 = vld [vmem:[#allocation6 + $0x40] sm:$0xff]   ;;  %v5647_v34 = vld [vmem:[#allocation6 + $0x178] sm:$0xff]   ;;  %s7750_s5 = smov %s7749_s19 }
  0x8f   : > { %4964 = vmatprep.subr.bf16.mxu1 %v5622_v10  ;;  %v5637_v25 = vld [vmem:[#allocation6 + $0x8] sm:$0xff]   ;;  %v5641_v29 = vld [vmem:[#allocation6] sm:$0xff]   ;;  %v5651_v37 = vld [vmem:[#allocation6 + $0x138] sm:$0xff]  }
  0x90   : > { %4919 = vmatpush3.bf16.msra.mxu0 %v5621_v9  ;;  %v5638_v26 = vld [vmem:[#allocation6 + $0xc8] sm:$0xff]   ;;  %v5642_v30 = vld [vmem:[#allocation6 + $0xc0] sm:$0xff]   ;;  %v5652_v38 = vld [vmem:[#allocation6 + $0x170] sm:$0xff]  }
  0x91   : > { %4920 = vmatprep.subr.bf16.mxu0 %v5624_v12  ;;  %v5639_v27 = vld [vmem:[#allocation6 + $0x88] sm:$0xff]   ;;  %v5646_v33 = vld [vmem:[#allocation6 + $0x80] sm:$0xff]   ;;  %v5653_v39 = vld [vmem:[#allocation6 + $0x130] sm:$0xff]   ;;  %s7781_s12 = smov %s7780_s25 }
  0x92   : > { %4965 = vmatpush3.bf16.msra.mxu1 %v5623_v11  ;;  %v5643_v31 = vld [vmem:[%s6760_s8] ss:$56 sps:$4 sm:$0xff]   ;;  %v5645_v32 = vld [vmem:[%s6760_s8 + $0x4] ss:$56 sps:$4 sm:$0xff]   ;;  %v5654_v40 = vld [vmem:[%s6760_s8 + $0x74] ss:$56 sps:$4 sm:$0xff]  }
  0x93   : > { %4966 = vmatprep.subr.bf16.mxu1 %v5626_v14  ;;  %1950 = vmatprep.mubr.bf16.mxu0 %v5645_v32  ;;  %v5648_v35 = vld [vmem:[%s6760_s8 + $0x8] ss:$56 sps:$4 sm:$0xff]   ;;  %v5650_v36 = vld [vmem:[%s6760_s8 + $0xc] ss:$56 sps:$4 sm:$0xff]   ;;  %v5657_v42 = vld [vmem:[%s6760_s8 + $0x7c] ss:$56 sps:$4 sm:$0xff]  }
  0x94   : > { %4921 = vmatpush3.bf16.msra.mxu0 %v5625_v13  ;;  %2023 = vmatprep.mubr.bf16.mxu1 %v5650_v36  ;;  %v5656_v41 = vld [vmem:[%s6760_s8 + $0x70] ss:$56 sps:$4 sm:$0xff]   ;;  %v5665_v49 = vld [vmem:[%s6760_s8 + $0xe4] ss:$56 sps:$4 sm:$0xff]   ;;  %v5669_v52 = vld [vmem:[%s6760_s8 + $0xe0] ss:$56 sps:$4 sm:$0xff]  }
  0x95   : > { %4922 = vmatprep.subr.bf16.mxu0 %v5628_v16  ;;  %v5659_v43 = vld [vmem:[%s6760_s8 + $0x78] ss:$56 sps:$4 sm:$0xff]   ;;  %v5671_v54 = vld [vmem:[%s6760_s8 + $0xec] ss:$56 sps:$4 sm:$0xff]   ;;  %v5673_v55 = vld [vmem:[%s6760_s8 + $0xe8] ss:$56 sps:$4 sm:$0xff]  }
  0x96   : > { %4967 = vmatpush3.bf16.msra.mxu1 %v5627_v15  ;;  %v5660_v44 = vld [vmem:[#allocation6 + $0x168] sm:$0xff]   ;;  %v5661_v45 = vld [vmem:[#allocation6 + $0x1f8] sm:$0xff]   ;;  %v5664_v48 = vld [vmem:[#allocation6 + $0x1f0] sm:$0xff]  }
  0x97   : > { %4968 = vmatprep.subr.bf16.mxu1 %v5630_v18  ;;  %v5662_v46 = vld [vmem:[#allocation6 + $0x128] sm:$0xff]   ;;  %v5663_v47 = vld [vmem:[#allocation6 + $0x1b8] sm:$0xff]   ;;  %v5667_v50 = vld [vmem:[#allocation6 + $0x160] sm:$0xff]  }
  0x98   : > { %4923 = vmatpush3.bf16.msra.mxu0 %v5629_v17  ;;  %v5668_v51 = vld [vmem:[#allocation6 + $0x1b0] sm:$0xff]   ;;  %v5670_v53 = vld [vmem:[#allocation6 + $0x120] sm:$0xff]   ;;  %v5674_v56 = vld [vmem:[#allocation6 + $0x1e8] sm:$0xff]  }
  0x99   : > { %4924 = vmatprep.subr.bf16.mxu0 %v5632_v20  ;;  %v5675_v57 = vld [vmem:[#allocation6 + $0x1a8] sm:$0xff]   ;;  %v5676_v58 = vld [vmem:[#allocation6 + $0x158] sm:$0xff]   ;;  %v5678_v60 = vld [vmem:[#allocation6 + $0x1e0] sm:$0xff]  }
  0x9a   : > { %4969 = vmatpush3.bf16.msra.mxu1 %v5631_v19  ;;  %v5677_v59 = vld [vmem:[#allocation6 + $0x118] sm:$0xff]   ;;  %v5681_v62 = vld [vmem:[#allocation6 + $0x1a0] sm:$0xff]   ;;  %v5685_v1 = vld [vmem:[#allocation6 + $0x150] sm:$0xff]  }
  0x9b   : > { %4970 = vmatprep.subr.bf16.mxu1 %v5634_v22  ;;  %v5679_v61 = vld [vmem:[%s6760_s8 + $0x154] ss:$56 sps:$4 sm:$0xff]   ;;  %v5682_v63 = vld [vmem:[%s6760_s8 + $0x150] ss:$56 sps:$4 sm:$0xff]   ;;  %v5692_v8 = vld [vmem:[%s6760_s8 + $0x1c4] ss:$56 sps:$4 sm:$0xff]  }
  0x9c   : > { %4925 = vmatpush3.bf16.msra.mxu0 %v5633_v21  ;;  %v5683_v0 = vld [vmem:[%s6760_s8 + $0x15c] ss:$56 sps:$4 sm:$0xff]   ;;  %v5686_v2 = vld [vmem:[%s6760_s8 + $0x158] ss:$56 sps:$4 sm:$0xff]   ;;  %v5697_v12 = vld [vmem:[%s6760_s8 + $0x1cc] ss:$56 sps:$4 sm:$0xff]  }
  0x9d   : > { %4926 = vmatprep.subr.bf16.mxu0 %v5636_v24  ;;  %v5687_v3 = vld [vmem:[#allocation6 + $0x110] sm:$0xff]   ;;  %v5688_v4 = vld [vmem:[#allocation6 + $0x1d8] sm:$0xff]   ;;  %v5690_v6 = vld [vmem:[#allocation6 + $0x148] sm:$0xff]  }
  0x9e   : > { %4971 = vmatpush3.bf16.msra.mxu1 %v5635_v23  ;;  %v5689_v5 = vld [vmem:[#allocation6 + $0x198] sm:$0xff]   ;;  %v5691_v7 = vld [vmem:[#allocation6 + $0x1d0] sm:$0xff]   ;;  %v5694_v9 = vld [vmem:[#allocation6 + $0x108] sm:$0xff]  }
  0x9f   : > { %4972 = vmatprep.subr.bf16.mxu1 %v5638_v26  ;;  %v5695_v10 = vld [vmem:[#allocation6 + $0x190] sm:$0xff]   ;;  %v5700_v14 = vld [vmem:[#allocation6 + $0x1c8] sm:$0xff]   ;;  %v5701_v15 = vld [vmem:[#allocation6 + $0x140] sm:$0xff]  }
  0xa0   : > { %4927 = vmatpush3.bf16.msra.mxu0 %v5637_v25  ;;  %v5696_v11 = vld [vmem:[%s6760_s8 + $0x1c0] ss:$56 sps:$4 sm:$0xff]   ;;  %v5705_v19 = vld [vmem:[%s6760_s8 + $0x10] ss:$56 sps:$4 sm:$0xff]   ;;  %v5707_v20 = vld [vmem:[%s6760_s8 + $0x14] ss:$56 sps:$4 sm:$0xff]  }
  0xa1   : > { %4928 = vmatprep.subr.bf16.mxu0 %v5640_v28  ;;  %v5699_v13 = vld [vmem:[%s6760_s8 + $0x1c8] ss:$56 sps:$4 sm:$0xff]   ;;  %v5710_v23 = vld [vmem:[%s6760_s8 + $0x18] ss:$56 sps:$4 sm:$0xff]   ;;  %v5712_v24 = vld [vmem:[%s6760_s8 + $0x1c] ss:$56 sps:$4 sm:$0xff]  }
  0xa2   : > { %4973 = vmatpush3.bf16.msra.mxu1 %v5639_v27  ;;  %v5702_v16 = vld [vmem:[#allocation6 + $0x188] sm:$0xff]   ;;  %v5703_v17 = vld [vmem:[#allocation6 + $0x100] sm:$0xff]   ;;  %v5709_v22 = vld [vmem:[#allocation6 + $0x278] sm:$0xff]  }
  0xa3   : > { %4974 = vmatprep.subr.bf16.mxu1 %v5642_v30  ;;  %v5704_v18 = vld [vmem:[#allocation6 + $0x1c0] sm:$0xff]   ;;  %v5713_v25 = vld [vmem:[#allocation6 + $0x238] sm:$0xff]   ;;  %v5714_v26 = vld [vmem:[#allocation6 + $0x270] sm:$0xff]  }
  0xa4   : > { %4929 = vmatpush3.bf16.msra.mxu0 %v5641_v29  ;;  %v5708_v21 = vld [vmem:[#allocation6 + $0x180] sm:$0xff]   ;;  %v5715_v27 = vld [vmem:[#allocation6 + $0x230] sm:$0xff]   ;;  %v5722_v32 = vld [vmem:[#allocation6 + $0x268] sm:$0xff]  }
  0xa5   : > { %5006 = vmatprep.subr.bf16.mxu0 %v5647_v34  ;;  %v5716_v28 = vld [vmem:[%s6760_s8 + $0x84] ss:$56 sps:$4 sm:$0xff]   ;;  %v5718_v29 = vld [vmem:[%s6760_s8 + $0x80] ss:$56 sps:$4 sm:$0xff]  }
  0xa6   : > { %4975 = vmatpush3.bf16.msra.mxu1 %v5646_v33  ;;  %v5719_v30 = vld [vmem:[%s6760_s8 + $0x8c] ss:$56 sps:$4 sm:$0xff]  }
  0xa7   : > { %1951 = vmatmul.mubr.bf16.vlgmr.msra.gmra.mxu0 %v5643_v31  ;;  %5052 = vmatprep.subr.bf16.mxu1 %v5661_v45  ;;  %v5721_v31 = vld [vmem:[%s6760_s8 + $0x88] ss:$56 sps:$4 sm:$0xff]  }
  0xa8   : > { %5007 = vmatpush3.bf16.msra.mxu0 %v5651_v37  ;;  %1958 = vmatprep.mubr.bf16.mxu0 %v5654_v40  ;;  %v5723_v33 = vld [vmem:[#allocation6 + $0x2f8] sm:$0xff]   ;;  %v5724_v34 = vld [vmem:[#allocation6 + $0x228] sm:$0xff]   ;;  %v5726_v36 = vld [vmem:[#allocation6 + $0x2f0] sm:$0xff]  }
  0xa9   : > { %2024 = vmatmul.mubr.bf16.vlgmr.msra.gmra.mxu1 %v5648_v35  ;;  %5008 = vmatprep.subr.bf16.mxu0 %v5652_v38  ;;  %v5725_v35 = vld [vmem:[#allocation6 + $0x2b8] sm:$0xff]   ;;  %v5729_v38 = vld [vmem:[#allocation6 + $0x260] sm:$0xff]   ;;  %v5737_v45 = vld [vmem:[#allocation6 + $0x2a8] sm:$0xff]  }
  0xaa   : > { %2031 = vmatprep.mubr.bf16.mxu1 %v5657_v42  ;;  %5053 = vmatpush3.bf16.msra.mxu1 %v5663_v47  ;;  %v5727_v37 = vld [vmem:[%s6760_s8 + $0xf4] ss:$56 sps:$4 sm:$0xff]   ;;  %v5731_v40 = vld [vmem:[%s6760_s8 + $0xf0] ss:$56 sps:$4 sm:$0xff]  }
  0xab   : > { %5054 = vmatprep.subr.bf16.mxu1 %v5664_v48  ;;  %v5733_v42 = vld [vmem:[%s6760_s8 + $0xfc] ss:$56 sps:$4 sm:$0xff]  }
  0xac   : > { %5009 = vmatpush3.bf16.msra.mxu0 %v5653_v39  ;;  %v5730_v39 = vld [vmem:[#allocation6 + $0x2b0] sm:$0xff]   ;;  %v5739_v47 = vld [vmem:[#allocation6 + $0x218] sm:$0xff]   ;;  %v5740_v48 = vld [vmem:[#allocation6 + $0x2e0] sm:$0xff]  }
  0xad   : > { %5010 = vmatprep.subr.bf16.mxu0 %v5660_v44  ;;  %v5736_v44 = vld [vmem:[#allocation6 + $0x2e8] sm:$0xff]  }
  0xae   : > { %5055 = vmatpush3.bf16.msra.mxu1 %v5668_v51  ;;  %v5744_v51 = vld [vmem:[%s6760_s8 + $0x160] ss:$56 sps:$4 sm:$0xff]  }
  0xaf   : > { %1959 = vmatmul.mubr.bf16.gmra.mxu0 %v5656_v41  ;;  %5056 = vmatprep.subr.bf16.mxu1 %v5674_v56  ;;  %v5732_v41 = vld [vmem:[#allocation6 + $0x220] sm:$0xff]   ;;  %v5750_v56 = vld [vmem:[#allocation6 + $0x2d8] sm:$0xff]  }
  0xb0   : > { %5011 = vmatpush3.bf16.msra.mxu0 %v5662_v46  ;;  %1966 = vmatprep.mubr.bf16.mxu0 %v5665_v49  ;;  %v5738_v46 = vld [vmem:[#allocation6 + $0x258] sm:$0xff]  }
  0xb1   : > { %2032 = vmatmul.mubr.bf16.gmra.mxu1 %v5659_v43  ;;  %5012 = vmatprep.subr.bf16.mxu0 %v5667_v50  ;;  %v5735_v43 = vld [vmem:[%s6760_s8 + $0xf8] ss:$56 sps:$4 sm:$0xff]   ;;  %v5741_v49 = vld [vmem:[%s6760_s8 + $0x164] ss:$56 sps:$4 sm:$0xff]  }
  0xb2   : > { %2039 = vmatprep.mubr.bf16.mxu1 %v5671_v54  ;;  %5057 = vmatpush3.bf16.msra.mxu1 %v5675_v57  ;;  %v5743_v50 = vld [vmem:[#allocation6 + $0x2a0] sm:$0xff]   ;;  %v5751_v57 = vld [vmem:[#allocation6 + $0x298] sm:$0xff]  }
  0xb3   : > { %5058 = vmatprep.subr.bf16.mxu1 %v5678_v60  ;;  %v5748_v54 = vld [vmem:[%s6760_s8 + $0x168] ss:$56 sps:$4 sm:$0xff]   ;;  %v5754_v60 = vld [vmem:[%s6760_s8 + $0x1d4] ss:$56 sps:$4 sm:$0xff]  }
  0xb4   : > { %5013 = vmatpush3.bf16.msra.mxu0 %v5670_v53  ;;  %v5747_v53 = vld [vmem:[#allocation6 + $0x250] sm:$0xff]  }
  0xb5   : > { %5014 = vmatprep.subr.bf16.mxu0 %v5676_v58  ;;  %v5752_v58 = vld [vmem:[#allocation6 + $0x248] sm:$0xff]  }
  0xb6   : > { %5059 = vmatpush3.bf16.msra.mxu1 %v5681_v62  ;;  %v5757_v62 = vld [vmem:[#allocation6 + $0x290] sm:$0xff]  }
  0xb7   : > { %1967 = vmatmul.mubr.bf16.gmra.mxu0 %v5669_v52  ;;  %5060 = vmatprep.subr.bf16.mxu1 %v5688_v4  ;;  %v5745_v52 = vld [vmem:[%s6760_s8 + $0x16c] ss:$56 sps:$4 sm:$0xff]  }
  0xb8   : > { %5015 = vmatpush3.bf16.msra.mxu0 %v5677_v59  ;;  %1974 = vmatprep.mubr.bf16.mxu0 %v5679_v61  ;;  %v5753_v59 = vld [vmem:[#allocation6 + $0x2d0] sm:$0xff]   ;;  %v5756_v61 = vld [vmem:[#allocation6 + $0x208] sm:$0xff]  }
  0xb9   : > { %2040 = vmatmul.mubr.bf16.gmra.mxu1 %v5673_v55  ;;  %5016 = vmatprep.subr.bf16.mxu0 %v5685_v1  ;;  %v5749_v55 = vld [vmem:[#allocation6 + $0x210] sm:$0xff]   ;;  %v5764_v4 = vld [vmem:[#allocation6 + $0x288] sm:$0xff]  }
  0xba   : > { %2047 = vmatprep.mubr.bf16.mxu1 %v5683_v0  ;;  %5061 = vmatpush3.bf16.msra.mxu1 %v5689_v5  ;;  %v5759_v0 = vld [vmem:[%s6760_s8 + $0x1dc] ss:$56 sps:$4 sm:$0xff]   ;;  %v5761_v1 = vld [vmem:[%s6760_s8 + $0x1d8] ss:$56 sps:$4 sm:$0xff]  }
  0xbb   : > { %5062 = vmatprep.subr.bf16.mxu1 %v5691_v7  ;;  %v5765_v5 = vld [vmem:[#allocation6 + $0x200] sm:$0xff]  }
  0xbc   : > { %5017 = vmatpush3.bf16.msra.mxu0 %v5687_v3  ;;  %v5763_v3 = vld [vmem:[#allocation6 + $0x240] sm:$0xff]  }
  0xbd   : > { %5018 = vmatprep.subr.bf16.mxu0 %v5690_v6  ;;  %v5766_v6 = vld [vmem:[#allocation6 + $0x2c0] sm:$0xff]  }
  0xbe   : > { %5063 = vmatpush3.bf16.msra.mxu1 %v5695_v10  ;;  %v5767_v7 = vld [vmem:[%s6760_s8 + $0x20] ss:$56 sps:$4 sm:$0xff]  }
  0xbf   : > { %1975 = vmatmul.mubr.bf16.gmra.mxu0 %v5682_v63  ;;  %5064 = vmatprep.subr.bf16.mxu1 %v5700_v14  ;;  %v5758_v63 = vld [vmem:[%s6760_s8 + $0x1d0] ss:$56 sps:$4 sm:$0xff]  }
  0xc0   : > { %1982 = vmatprep.mubr.bf16.mxu0 %v5692_v8  ;;  %5019 = vmatpush3.bf16.msra.mxu0 %v5694_v9  ;;  %v5769_v8 = vld [vmem:[%s6760_s8 + $0x24] ss:$56 sps:$4 sm:$0xff]  }
  0xc1   : > { %2048 = vmatmul.mubr.bf16.gmra.mxu1 %v5686_v2  ;;  %5020 = vmatprep.subr.bf16.mxu0 %v5701_v15  ;;  %v5762_v2 = vld [vmem:[#allocation6 + $0x2c8] sm:$0xff]   ;;  %v5770_v9 = vld [vmem:[#allocation6 + $0x280] sm:$0xff]   ;;  %v5771_v10 = vld [vmem:[#allocation6 + $0x378] sm:$0xff]  }
  0xc2   : > { %2055 = vmatprep.mubr.bf16.mxu1 %v5697_v12  ;;  %5065 = vmatpush3.bf16.msra.mxu1 %v5702_v16  ;;  %v5774_v12 = vld [vmem:[%s6760_s8 + $0x2c] ss:$56 sps:$4 sm:$0xff]  }
  0xc3   : > { %5066 = vmatprep.subr.bf16.mxu1 %v5704_v18  ;;  %v5776_v14 = vld [vmem:[#allocation6 + $0x370] sm:$0xff]  }
  0xc4   : > { %5021 = vmatpush3.bf16.msra.mxu0 %v5703_v17  ;;  %v5777_v15 = vld [vmem:[#allocation6 + $0x330] sm:$0xff]  }
  0xc5   : > { %5098 = vmatprep.subr.bf16.mxu0 %v5709_v22  ;;  %v5778_v16 = vld [vmem:[%s6760_s8 + $0x94] ss:$56 sps:$4 sm:$0xff]   ;;  %v5780_v17 = vld [vmem:[%s6760_s8 + $0x90] ss:$56 sps:$4 sm:$0xff]   ;;  %v5786_v22 = vld [vmem:[%s6760_s8 + $0x104] ss:$56 sps:$4 sm:$0xff]  }
  0xc6   : > { %5067 = vmatpush3.bf16.msra.mxu1 %v5708_v21  ;;  %v5781_v18 = vld [vmem:[%s6760_s8 + $0x9c] ss:$56 sps:$4 sm:$0xff]  }
  0xc7   : > { %1983 = vmatmul.mubr.bf16.gmra.mxu0 %v5696_v11  ;;  %5144 = vmatprep.subr.bf16.mxu1 %v5723_v33  ;;  %v5772_v11 = vld [vmem:[%s6760_s8 + $0x28] ss:$56 sps:$4 sm:$0xff]  }
  0xc8   : > { %2096 = vmatprep.mubr.bf16.mxu0 %v5707_v20  ;;  %v5784_v20 = vld [vmem:[#allocation6 + $0x368] sm:$0xff]  }
  0xc9   : > { %2056 = vmatmul.mubr.bf16.gmra.mxu1 %v5699_v13  ;;  %v5775_v13 = vld [vmem:[#allocation6 + $0x338] sm:$0xff]   ;;  %v5785_v21 = vld [vmem:[#allocation6 + $0x328] sm:$0xff]  }
  0xca   : > { %2169 = vmatprep.mubr.bf16.mxu1 %v5712_v24  ;;  %v5790_v24 = vld [vmem:[#allocation6 + $0x320] sm:$0xff]  }
  0xcb   : > { %v5798_v33 = vld [vmem:[%s6760_s8 + $0x170] ss:$56 sps:$4 sm:$0xff]  }
  0xcf   : > { %2097 = vmatmul.mubr.bf16.vlgmr.msra.gmra.mxu0 %v5705_v19  ;;  %v5783_v19 = vld [vmem:[%s6760_s8 + $0x98] ss:$56 sps:$4 sm:$0xff]  }
  0xd0   : > { %5099 = vmatpush3.bf16.msra.mxu0 %v5713_v25  ;;  %2104 = vmatprep.mubr.bf16.mxu0 %v5716_v28  ;;  %v5789_v25 = vld [vmem:[%s6760_s8 + $0x100] ss:$56 sps:$4 sm:$0xff]  }
  0xd1   : > { %2170 = vmatmul.mubr.bf16.vlgmr.msra.gmra.mxu1 %v5710_v23  ;;  %5100 = vmatprep.subr.bf16.mxu0 %v5714_v26  ;;  %v5788_v23 = vld [vmem:[#allocation6 + $0x360] sm:$0xff]  }
  0xd2   : > { %2177 = vmatprep.mubr.bf16.mxu1 %v5719_v30  ;;  %5145 = vmatpush3.bf16.msra.mxu1 %v5725_v35  ;;  %v5791_v26 = vld [vmem:[%s6760_s8 + $0x10c] ss:$56 sps:$4 sm:$0xff]   ;;  %v5793_v28 = vld [vmem:[%s6760_s8 + $0x108] ss:$56 sps:$4 sm:$0xff]  }
  0xd3   : > { %5146 = vmatprep.subr.bf16.mxu1 %v5726_v36  ;;  %v5796_v30 = vld [vmem:[%s6760_s8 + $0x174] ss:$56 sps:$4 sm:$0xff]   ;;  %v5805_v36 = vld [vmem:[%s6760_s8 + $0x1e4] ss:$56 sps:$4 sm:$0xff]  }
  0xd4   : > { %5101 = vmatpush3.bf16.msra.mxu0 %v5715_v27  ;;  %v5794_v27 = vld [vmem:[#allocation6 + $0x358] sm:$0xff]   ;;  %v5804_v35 = vld [vmem:[#allocation6 + $0x348] sm:$0xff]  }
  0xd5   : > { %5102 = vmatprep.subr.bf16.mxu0 %v5722_v32  ;;  %v5801_v32 = vld [vmem:[#allocation6 + $0x350] sm:$0xff]  }
  0xd6   : > { %5147 = vmatpush3.bf16.msra.mxu1 %v5730_v39  ;;  %v5809_v39 = vld [vmem:[%s6760_s8 + $0x1ec] ss:$56 sps:$4 sm:$0xff]  }
  0xd7   : > { %2105 = vmatmul.mubr.bf16.gmra.mxu0 %v5718_v29  ;;  %5148 = vmatprep.subr.bf16.mxu1 %v5736_v44  ;;  %v5795_v29 = vld [vmem:[#allocation6 + $0x318] sm:$0xff]  }
  0xd8   : > { %5103 = vmatpush3.bf16.msra.mxu0 %v5724_v34  ;;  %2112 = vmatprep.mubr.bf16.mxu0 %v5727_v37  ;;  %v5803_v34 = vld [vmem:[#allocation6 + $0x310] sm:$0xff]  }
  0xd9   : > { %2178 = vmatmul.mubr.bf16.gmra.mxu1 %v5721_v31  ;;  %5104 = vmatprep.subr.bf16.mxu0 %v5729_v38  ;;  %v5799_v31 = vld [vmem:[%s6760_s8 + $0x17c] ss:$56 sps:$4 sm:$0xff]   ;;  %v5802_v37 = vld [vmem:[%s6760_s8 + $0x178] ss:$56 sps:$4 sm:$0xff]   ;;  %v5811_v44 = vld [vmem:[%s6760_s8 + $0x1e8] ss:$56 sps:$4 sm:$0xff]  }
  0xda   : > { %2185 = vmatprep.mubr.bf16.mxu1 %v5733_v42  ;;  %5149 = vmatpush3.bf16.msra.mxu1 %v5737_v45  ;;  %v5807_v38 = vld [vmem:[#allocation6 + $0x308] sm:$0xff]  }
  0xdb   : > { %5150 = vmatprep.subr.bf16.mxu1 %v5740_v48  ;;  %v5808_v42 = vld [vmem:[%s6760_s8 + $0x1e0] ss:$56 sps:$4 sm:$0xff]   ;;  %v5814_v45 = vld [vmem:[%s6760_s8 + $0x30] ss:$56 sps:$4 sm:$0xff]   ;;  %v5820_v48 = vld [vmem:[%s6760_s8 + $0x114] ss:$56 sps:$4 sm:$0xff]  }
  0xdc   : > { %5105 = vmatpush3.bf16.msra.mxu0 %v5732_v41  ;;  %v5813_v41 = vld [vmem:[#allocation6 + $0x300] sm:$0xff]  }
  0xdd   : > { %5106 = vmatprep.subr.bf16.mxu0 %v5738_v46  ;;  %v5817_v46 = vld [vmem:[%s6760_s8 + $0xa4] ss:$56 sps:$4 sm:$0xff]  }
  0xde   : > { %5151 = vmatpush3.bf16.msra.mxu1 %v5743_v50  ;;  %v5823_v50 = vld [vmem:[%s6760_s8 + $0x184] ss:$56 sps:$4 sm:$0xff]  }
  0xdf   : > { %2113 = vmatmul.mubr.bf16.gmra.mxu0 %v5731_v40  ;;  %5152 = vmatprep.subr.bf16.mxu1 %v5750_v56  ;;  %v5812_v40 = vld [vmem:[#allocation6 + $0x340] sm:$0xff]  }
  0xe0   : > { %5107 = vmatpush3.bf16.msra.mxu0 %v5739_v47  ;;  %2120 = vmatprep.mubr.bf16.mxu0 %v5741_v49  ;;  %v5819_v47 = vld [vmem:[%s6760_s8 + $0xa0] ss:$56 sps:$4 sm:$0xff]   ;;  %v5822_v49 = vld [vmem:[%s6760_s8 + $0x110] ss:$56 sps:$4 sm:$0xff]  }
  0xe1   : > { %2186 = vmatmul.mubr.bf16.gmra.mxu1 %v5735_v43  ;;  %5108 = vmatprep.subr.bf16.mxu0 %v5747_v53  ;;  %v5816_v43 = vld [vmem:[%s6760_s8 + $0x34] ss:$56 sps:$4 sm:$0xff]   ;;  %v5828_v53 = vld [vmem:[%s6760_s8 + $0x1f0] ss:$56 sps:$4 sm:$0xff]  }
  0xe2   : > { %2193 = vmatprep.mubr.bf16.mxu1 %v5745_v52  ;;  %5153 = vmatpush3.bf16.msra.mxu1 %v5751_v57  ;;  %v5826_v52 = vld [vmem:[%s6760_s8 + $0x1f4] ss:$56 sps:$4 sm:$0xff]  }
  0xe3   : > { %5154 = vmatprep.subr.bf16.mxu1 %v5753_v59  ;;  %v5830_v56 = vld [vmem:[%s7747_s10 + $0x30] sm:$0xff]   ;;  %v5831_v57 = vld [vmem:[%s7747_s10 + $0x28] sm:$0xff]  }
  0xe4   : > { %5109 = vmatpush3.bf16.msra.mxu0 %v5749_v55  ;;  %v5829_v55 = vld [vmem:[%s7746_s21 + $0x38] sm:$0xff]  }
  0xe5   : > { %5110 = vmatprep.subr.bf16.mxu0 %v5752_v58  ;;  %v5832_v58 = vld [vmem:[%s7747_s10 + $0x20] sm:$0xff]  }
  0xe6   : > { %5155 = vmatpush3.bf16.msra.mxu1 %v5757_v62  ;;  %v5833_v62 = vld [vmem:[%s7747_s10 + $0x18] sm:$0xff]  }
  0xe7   : > { %2121 = vmatmul.mubr.bf16.gmra.mxu0 %v5744_v51  ;;  %5156 = vmatprep.subr.bf16.mxu1 %v5762_v2  ;;  %v5825_v51 = vld [vmem:[%s6760_s8 + $0x180] ss:$56 sps:$4 sm:$0xff]  }
  0xe8   : > { %2128 = vmatprep.mubr.bf16.mxu0 %v5754_v60  ;;  %5111 = vmatpush3.bf16.msra.mxu0 %v5756_v61  ;;  %v6891_v60 = vld [vmem:[%s7748_s2] ss:$0 sm:$0xff] }
  0xe9   : > { %2194 = vmatmul.mubr.bf16.gmra.mxu1 %v5748_v54  ;;  %5112 = vmatprep.subr.bf16.mxu0 %v5763_v3  ;;  %v7697_v54 = vmov 0.0  }
  0xea   : > { %2201 = vmatprep.mubr.bf16.mxu1 %v5759_v0  ;;  %5157 = vmatpush3.bf16.msra.mxu1 %v5764_v4 }
  0xeb   : > { %5158 = vmatprep.subr.bf16.mxu1 %v5766_v6  ;;  %v5834_v6 = vld [vmem:[%s7747_s10 + $0x10] sm:$0xff]  }
  0xec   : > { %5113 = vmatpush3.bf16.msra.mxu0 %v5765_v5 }
  0xed   : > { %5190 = vmatprep.subr.bf16.mxu0 %v5771_v10 }
  0xee   : > { %5159 = vmatpush3.bf16.msra.mxu1 %v5770_v9 }
  0xef   : > { %2129 = vmatmul.mubr.bf16.gmra.mxu0 %v5758_v63  ;;  %5287 = vmatprep.subr.bf16.mxu1 %v7697_v54 }
  0xf0   : > { %2242 = vmatprep.mubr.bf16.mxu0 %v5769_v8 }
  0xf1   : > { %2202 = vmatmul.mubr.bf16.gmra.mxu1 %v5761_v1 }
  0xf2   : > { %2315 = vmatprep.mubr.bf16.mxu1 %v5774_v12 }
  0xf7   : > { %2243 = vmatmul.mubr.bf16.vlgmr.msra.gmra.mxu0 %v5767_v7 }
  0xf8   : > { %5191 = vmatpush3.bf16.msra.mxu0 %v5775_v13  ;;  %2250 = vmatprep.mubr.bf16.mxu0 %v5778_v16 }
  0xf9   : > { %2316 = vmatmul.mubr.bf16.vlgmr.msra.gmra.mxu1 %v5772_v11  ;;  %5192 = vmatprep.subr.bf16.mxu0 %v5776_v14 }
  0xfa   : > { %2323 = vmatprep.mubr.bf16.mxu1 %v5781_v18  ;;  %5288 = vmatpush3.bf16.msra.mxu1 %v5829_v55 }
  0xfb   : > { %5289 = vmatprep.subr.bf16.mxu1 %v7697_v54 }
  0xfc   : > { %5193 = vmatpush3.bf16.msra.mxu0 %v5777_v15  ;;  %v5835_v15 = vld [vmem:[%s7747_s10 + $0x8] sm:$0xff]  }
  0xfd   : > { %5194 = vmatprep.subr.bf16.mxu0 %v5784_v20 }
  0xfe   : > { %5290 = vmatpush3.bf16.msra.mxu1 %v5830_v56 }
  0xff   : > { %2251 = vmatmul.mubr.bf16.gmra.mxu0 %v5780_v17  ;;  %5291 = vmatprep.subr.bf16.mxu1 %v7697_v54 }
 0x100   : > { %2258 = vmatprep.mubr.bf16.mxu0 %v5786_v22  ;;  %5195 = vmatpush3.bf16.msra.mxu0 %v5785_v21 }
 0x101   : > { %2324 = vmatmul.mubr.bf16.gmra.mxu1 %v5783_v19  ;;  %5196 = vmatprep.subr.bf16.mxu0 %v5788_v23 }
 0x102   : > { %2331 = vmatprep.mubr.bf16.mxu1 %v5791_v26  ;;  %5292 = vmatpush3.bf16.msra.mxu1 %v5831_v57 }
 0x103   : > { %5293 = vmatprep.subr.bf16.mxu1 %v7697_v54 }
 0x104   : > { %5197 = vmatpush3.bf16.msra.mxu0 %v5790_v24  ;;  %v5836_v24 = vld [vmem:[%s7747_s10] sm:$0xff]  }
 0x105   : > { %5198 = vmatprep.subr.bf16.mxu0 %v5794_v27 }
 0x106   : > { %5294 = vmatpush3.bf16.msra.mxu1 %v5832_v58 }
 0x107   : > { %2259 = vmatmul.mubr.bf16.gmra.mxu0 %v5789_v25  ;;  %5295 = vmatprep.subr.bf16.mxu1 %v7697_v54 }
 0x108   : > { %2266 = vmatprep.mubr.bf16.mxu0 %v5796_v30  ;;  %5199 = vmatpush3.bf16.msra.mxu0 %v5795_v29 }
 0x109   : > { %2332 = vmatmul.mubr.bf16.gmra.mxu1 %v5793_v28  ;;  %5200 = vmatprep.subr.bf16.mxu0 %v5801_v32 }
 0x10a   : > { %2339 = vmatprep.mubr.bf16.mxu1 %v5799_v31  ;;  %5296 = vmatpush3.bf16.msra.mxu1 %v5833_v62 }
 0x10b   : > { %5297 = vmatprep.subr.bf16.mxu1 %v7697_v54 }
 0x10c   : > { %5201 = vmatpush3.bf16.msra.mxu0 %v5803_v34 }
 0x10d   : > { %5202 = vmatprep.subr.bf16.mxu0 %v5804_v35 }
 0x10e   : > { %5298 = vmatpush3.bf16.msra.mxu1 %v5834_v6 }
 0x10f   : > { %2267 = vmatmul.mubr.bf16.gmra.mxu0 %v5798_v33  ;;  %5299 = vmatprep.subr.bf16.mxu1 %v7697_v54 }
 0x110   : > { %2274 = vmatprep.mubr.bf16.mxu0 %v5805_v36  ;;  %5203 = vmatpush3.bf16.msra.mxu0 %v5807_v38 }
 0x111   : > { %2340 = vmatmul.mubr.bf16.gmra.mxu1 %v5802_v37  ;;  %5204 = vmatprep.subr.bf16.mxu0 %v5812_v40 }
 0x112   : > { %2347 = vmatprep.mubr.bf16.mxu1 %v5809_v39  ;;  %5300 = vmatpush3.bf16.msra.mxu1 %v5835_v15 }
 0x113   : > { %5301 = vmatprep.subr.bf16.mxu1 %v7697_v54 }
 0x114   : > { %5205 = vmatpush3.bf16.msra.mxu0 %v5813_v41 }
 0x115   : > { %5323 = vmatprep.subr.bf16.mxu0 %v7697_v54 }
 0x116   : > { %5302 = vmatpush3.bf16.msra.mxu1 %v5836_v24 }
 0x117   : > { %2275 = vmatmul.mubr.bf16.gmra.mxu0 %v5808_v42  ;;  %5439 = vmatprep.subr.bf16.mxu1 %v7697_v54 }
 0x118   : > { %2388 = vmatprep.mubr.bf16.mxu0 %v5816_v43 }
 0x119   : > { %2348 = vmatmul.mubr.bf16.gmra.mxu1 %v5811_v44 }
 0x11a   : > { %5303 = vmatprep.mubr.msk.bf16.mxu1 %vm6453_vm0, %v7697_v54 }
 0x11f   : > { %2389 = vmatmul.mubr.bf16.vlgmr.msra.gmra.mxu0 %v5814_v45 }
 0x120   : > { %2396 = vmatprep.mubr.bf16.mxu0 %v5817_v46 }
 0x127   : > { %2397 = vmatmul.mubr.bf16.gmra.mxu0 %v5819_v47 }
 0x128   : > { %2404 = vmatprep.mubr.bf16.mxu0 %v5820_v48 }
 0x12f   : > { %2405 = vmatmul.mubr.bf16.gmra.mxu0 %v5822_v49 }
 0x130   : > { %2412 = vmatprep.mubr.bf16.mxu0 %v5823_v50 }
 0x137   : > { %2413 = vmatmul.mubr.bf16.gmra.mxu0 %v5825_v51 }
 0x138   : > { %2420 = vmatprep.mubr.bf16.mxu0 %v5826_v52 }
 0x13f   : > { %2421 = vmatmul.mubr.bf16.gmra.mxu0 %v5828_v53 }
 0x140   : > { %5331 = vmatprep.mubr.msk.bf16.mxu0 %vm6453_vm0, %v7697_v54 }
 0x167   : > { %v4930_v59 = vpop.f32.mrf.mxu0 }
 0x169   : > { %v4931_v61 = vpop.f32.mrf.mxu0  ;;  %v4976_v0 = vpop.f32.mrf.mxu1 }
 0x16a   : > { %v4932_v63 = vadd.f32 %v4931_v61, %v4930_v59 }
 0x16b   : > { %v4933_v1 = vpop.f32.mrf.mxu0  ;;  %v4977_v3 = vpop.f32.mrf.mxu1 }
 0x16c   : > { %v1953_v2 = vadd.f32 %v4932_v63, %v6891_v60  ;;  %v4978_v4 = vadd.f32 %v4977_v3, %v4976_v0 }
 0x16d   : > { %v4934_v5 = vpop.f32.mrf.mxu0  ;;  %v4979_v8 = vpop.f32.mrf.mxu1 }
 0x16e   : > { %v4935_v7 = vadd.f32 %v4934_v5, %v4933_v1  ;;  %v6901_v9 = vadd.f32 %v4978_v4, %v1953_v2 }
 0x16f   : > { %v4936_v10 = vpop.f32.mrf.mxu0  ;;  %v4980_v12 = vpop.f32.mrf.mxu1 }
 0x170   : > { %v1956_v11 = vadd.f32 %v4935_v7, %v6891_v60  ;;  %v4981_v13 = vadd.f32 %v4980_v12, %v4979_v8 }
 0x171   : > { %v4937_v14 = vpop.f32.mrf.mxu0  ;;  %v4982_v17 = vpop.f32.mrf.mxu1 }
 0x172   : > { %v4938_v16 = vadd.f32 %v4937_v14, %v4936_v10  ;;  %v6908_v18 = vadd.f32 %v4981_v13, %v1956_v11 }
 0x173   : > { %v4939_v19 = vpop.f32.mrf.mxu0  ;;  %v4983_v21 = vpop.f32.mrf.mxu1 }
 0x174   : > { %v1961_v20 = vadd.f32 %v4938_v16, %v6891_v60  ;;  %v4984_v22 = vadd.f32 %v4983_v21, %v4982_v17 }
 0x175   : > { %v4940_v23 = vpop.f32.mrf.mxu0  ;;  %v4985_v26 = vpop.f32.mrf.mxu1 }
 0x176   : > { %v4941_v25 = vadd.f32 %v4940_v23, %v4939_v19  ;;  %v6915_v27 = vadd.f32 %v4984_v22, %v1961_v20 }
 0x177   : > { %v4942_v28 = vpop.f32.mrf.mxu0  ;;  %v4986_v30 = vpop.f32.mrf.mxu1 }
 0x178   : > { %v1964_v29 = vadd.f32 %v4941_v25, %v6891_v60  ;;  %v4987_v31 = vadd.f32 %v4986_v30, %v4985_v26 }
 0x179   : > { %v4943_v32 = vpop.f32.mrf.mxu0  ;;  %v4988_v34 = vpop.f32.mrf.mxu1 }
 0x17a   : > { %v4944_v33 = vadd.f32 %v4943_v32, %v4942_v28  ;;  %v6923_v35 = vadd.f32 %v4987_v31, %v1964_v29  ;;  %v6953_v28 = vld [vmem:[%s7749_s19 + $0x18] sm:$0xff]   ;;  %v6961_v31 = vld [vmem:[%s7750_s5 + $0x10] sm:$0xff]  }
 0x17b   : > { %v4945_v36 = vpop.f32.mrf.mxu0  ;;  %v4989_v38 = vpop.f32.mrf.mxu1  ;;  %5324 = vmatpush3.bf16.msra.mxu0 %v6953_v28 }
 0x17c   : > { %v1969_v37 = vadd.f32 %v4944_v33, %v6891_v60  ;;  %v4990_v39 = vadd.f32 %v4989_v38, %v4988_v34  ;;  %5325 = vmatprep.subr.bf16.mxu0 %v7697_v54  ;;  %v6975_v38 = vld [vmem:[%s7750_s5 + $0x8] sm:$0xff]  }
 0x17d   : > { %v4946_v40 = vpop.f32.mrf.mxu0  ;;  %v4991_v42 = vpop.f32.mrf.mxu1  ;;  %7751 = vst [vmem:[#allocation26_spill] sm:$0xff] %v6975_v38 }
 0x17e   : > { %v4947_v41 = vadd.f32 %v4946_v40, %v4945_v36  ;;  %v6926_v43 = vadd.f32 %v4990_v39, %v1969_v37 }
 0x17f   : > { %v4992_v45 = vpop.f32.mrf.mxu1  ;;  %v4948_v46 = vpop.f32.mrf.mxu0  ;;  %5326 = vmatpush3.bf16.msra.mxu0 %v6961_v31 }
 0x180   : > { %v1972_v44 = vadd.f32 %v4947_v41, %v6891_v60  ;;  %v4993_v47 = vadd.f32 %v4992_v45, %v4991_v42  ;;  %5327 = vmatprep.subr.bf16.mxu0 %v7697_v54 }
 0x181   : > { %v4949_v49 = vpop.f32.mrf.mxu0  ;;  %v4994_v50 = vpop.f32.mrf.mxu1 }
 0x182   : > { %v6929_v48 = vadd.f32 %v4993_v47, %v1972_v44  ;;  %v4950_v51 = vadd.f32 %v4949_v49, %v4948_v46 }
 0x183   : > { %v4951_v52 = vpop.f32.mrf.mxu0  ;;  %v4995_v53 = vpop.f32.mrf.mxu1  ;;  %5328 = vmatpush3.bf16.msra.mxu0 %v6975_v38 }
 0x184   : > { %v1977_v55 = vadd.f32 %v4950_v51, %v6891_v60  ;;  %v4996_v56 = vadd.f32 %v4995_v53, %v4994_v50  ;;  %5329 = vmatprep.subr.bf16.mxu0 %v7697_v54 }
 0x185   : > { %v4952_v57 = vpop.f32.mrf.mxu0  ;;  %v4997_v58 = vpop.f32.mrf.mxu1 }
 0x186   : > { %v6932_v59 = vadd.f32 %v4996_v56, %v1977_v55  ;;  %v4953_v61 = vadd.f32 %v4952_v57, %v4951_v52 }
 0x187   : > { %v4998_v62 = vpop.f32.mrf.mxu1  ;;  %v4954_v1 = vpop.f32.mrf.mxu0 }
 0x188   : > { %v1980_v63 = vadd.f32 %v4953_v61, %v6891_v60  ;;  %v4999_v0 = vadd.f32 %v4998_v62, %v4997_v58 }
 0x189   : > { %v4955_v3 = vpop.f32.mrf.mxu0  ;;  %v5000_v4 = vpop.f32.mrf.mxu1 }
 0x18a   : > { %v6935_v2 = vadd.f32 %v4999_v0, %v1980_v63  ;;  %v4956_v5 = vadd.f32 %v4955_v3, %v4954_v1 }
 0x18b   : > { %v4957_v6 = vpop.f32.mrf.mxu0  ;;  %v5001_v7 = vpop.f32.mrf.mxu1 }
 0x18c   : > { %v1985_v8 = vadd.f32 %v4956_v5, %v6891_v60  ;;  %v5002_v10 = vadd.f32 %v5001_v7, %v5000_v4 }
 0x18d   : > { %v4958_v11 = vpop.f32.mrf.mxu0  ;;  %v5003_v12 = vpop.f32.mrf.mxu1 }
 0x18e   : > { %v6938_v13 = vadd.f32 %v5002_v10, %v1985_v8  ;;  %v4959_v14 = vadd.f32 %v4958_v11, %v4957_v6 }
 0x18f   : > { %v5004_v15 = vpop.f32.mrf.mxu1  ;;  %v5022_v19 = vpop.f32.mrf.mxu0 }
 0x190   : > { %v1988_v16 = vadd.f32 %v4959_v14, %v6891_v60  ;;  %v5005_v17 = vadd.f32 %v5004_v15, %v5003_v12 }
 0x191   : > { %v5023_v21 = vpop.f32.mrf.mxu0  ;;  %v6943_v23 = vpop.f32.mrf.mxu1 }
 0x192   : > { %v6941_v20 = vadd.f32 %v5005_v17, %v1988_v16  ;;  %v5024_v22 = vadd.f32 %v5023_v21, %v5022_v19 }
 0x193   : > { %v5025_v24 = vpop.f32.mrf.mxu0  ;;  %v6948_v26 = vpop.f32.mrf.mxu1 }
 0x194   : > { %v6946_v25 = vadd.f32 %v5024_v22, %v6901_v9 }
 0x195   : > { %v5026_v60 = vpop.f32.mrf.mxu0  ;;  %v6955_v30 = vpop.f32.mrf.mxu1 }
 0x196   : > { %v5027_v29 = vadd.f32 %v5026_v60, %v5025_v24 }
 0x197   : > { %v5028_v9 = vpop.f32.mrf.mxu0  ;;  %v6967_v33 = vpop.f32.mrf.mxu1 }
 0x198   : > { %v6965_v32 = vadd.f32 %v5027_v29, %v6908_v18 }
 0x199   : > { %v5029_v34 = vpop.f32.mrf.mxu0  ;;  %v6969_v37 = vpop.f32.mrf.mxu1 }
 0x19a   : > { %v5030_v36 = vadd.f32 %v5029_v34, %v5028_v9 }
 0x19b   : > { %v5031_v39 = vpop.f32.mrf.mxu0  ;;  %v6981_v18 = vpop.f32.mrf.mxu1 }
 0x19c   : > { %v6979_v40 = vadd.f32 %v5030_v36, %v6915_v27 }
 0x19d   : > { %v5032_v41 = vpop.f32.mrf.mxu0  ;;  %v6983_v44 = vpop.f32.mrf.mxu1 }
 0x19e   : > { %v5033_v42 = vadd.f32 %v5032_v41, %v5031_v39 }
 0x19f   : > { %v5034_v45 = vpop.f32.mrf.mxu0  ;;  %v6990_v47 = vpop.f32.mrf.mxu1 }
 0x1a0   : > { %v6988_v46 = vadd.f32 %v5033_v42, %v6923_v35 }
 0x1a1   : > { %v5035_v49 = vpop.f32.mrf.mxu0  ;;  %v6992_v27 = vpop.f32.mrf.mxu1 }
 0x1a2   : > { %v5036_v50 = vadd.f32 %v5035_v49, %v5034_v45 }
 0x1a3   : > { %v5037_v51 = vpop.f32.mrf.mxu0  ;;  %v6997_v53 = vpop.f32.mrf.mxu1 }
 0x1a4   : > { %v6995_v52 = vadd.f32 %v5036_v50, %v6926_v43 }
 0x1a5   : > { %v5038_v55 = vpop.f32.mrf.mxu0  ;;  %v6999_v57 = vpop.f32.mrf.mxu1 }
 0x1a6   : > { %v5039_v56 = vadd.f32 %v5038_v55, %v5037_v51 }
 0x1a7   : > { %v7004_v35 = vpop.f32.mrf.mxu1  ;;  %v5040_v61 = vpop.f32.mrf.mxu0 }
 0x1a8   : > { %v7002_v58 = vadd.f32 %v5039_v56, %v6929_v48 }
 0x1a9   : > { %v5041_v62 = vpop.f32.mrf.mxu0  ;;  %v7006_v63 = vpop.f32.mrf.mxu1 }
 0x1aa   : > { %v5042_v0 = vadd.f32 %v5041_v62, %v5040_v61 }
 0x1ab   : > { %v5043_v1 = vpop.f32.mrf.mxu0  ;;  %v7008_v3 = vpop.f32.mrf.mxu1 }
 0x1ac   : > { %v7011_v43 = vadd.f32 %v5042_v0, %v6932_v59 }
 0x1ad   : > { %v5044_v4 = vpop.f32.mrf.mxu0  ;;  %v7013_v5 = vpop.f32.mrf.mxu1 }
 0x1ae   : > { %7752 = vst [vmem:[#allocation27_spill] sm:$0xff] %v7011_v43  ;;  %v5045_v6 = vadd.f32 %v5044_v4, %v5043_v1 }
 0x1af   : > { %v7018_v7 = vpop.f32.mrf.mxu1  ;;  %v5046_v8 = vpop.f32.mrf.mxu0 }
 0x1b0   : > { %v7016_v48 = vadd.f32 %v5045_v6, %v6935_v2 }
 0x1b1   : > { %v5047_v10 = vpop.f32.mrf.mxu0  ;;  %v7020_v11 = vpop.f32.mrf.mxu1 }
 0x1b2   : > { %7753 = vst [vmem:[#allocation28_spill] sm:$0xff] %v7016_v48  ;;  %7754 = vst [vmem:[#allocation29_spill] sm:$0xff] %v7020_v11  ;;  %v5048_v12 = vadd.f32 %v5047_v10, %v5046_v8 }
 0x1b3   : > { %v5049_v14 = vpop.f32.mrf.mxu0  ;;  %v7022_v15 = vpop.f32.mrf.mxu1 }
 0x1b4   : > { %7755 = vst [vmem:[#allocation30_spill] sm:$0xff] %v7022_v15  ;;  %v7025_v59 = vadd.f32 %v5048_v12, %v6938_v13 }
 0x1b5   : > { %v5050_v16 = vpop.f32.mrf.mxu0  ;;  %v7027_v17 = vpop.f32.mrf.mxu1 }
 0x1b6   : > { %7756 = vst [vmem:[#allocation31_spill] sm:$0xff] %v7025_v59  ;;  %7757 = vst [vmem:[#allocation32_spill] sm:$0xff] %v7027_v17  ;;  %v5051_v19 = vadd.f32 %v5050_v16, %v5049_v14  ;;  %v5070_v16 = vadd.f32 %v6948_v26, %v6943_v23  ;;  %v5076_v26 = vadd.f32 %v6981_v18, %v6969_v37 }
 0x1b7   : > { %v7029_v21 = vpop.f32.mrf.mxu1  ;;  %v5114_v2 = vpop.f32.mrf.mxu0 }
 0x1b8   : > { %7758 = vst [vmem:[#allocation33_spill] sm:$0xff] %v7029_v21  ;;  %v7032_v22 = vadd.f32 %v5051_v19, %v6941_v20  ;;  %v2172_v17 = vadd.f32 %v5070_v16, %v6946_v25  ;;  %v7764_v16 = vmov 0.0  }
 0x1b9   : > { %v5115_v24 = vpop.f32.mrf.mxu0  ;;  %v5160_v60 = vpop.f32.mrf.mxu1 }
 0x1ba   : > { %7759 = vst [vmem:[#allocation34_spill] sm:$0xff] %v7032_v22  ;;  %v5073_v22 = vadd.f32 %v6967_v33, %v6955_v30  ;;  %v5116_v59 = vadd.f32 %v5115_v24, %v5114_v2  ;;  %v5079_v30 = vadd.f32 %v6990_v47, %v6983_v44  ;;  %v5082_v44 = vadd.f32 %v6997_v53, %v6992_v27 }
 0x1bb   : > { %v5117_v29 = vpop.f32.mrf.mxu0  ;;  %v5161_v9 = vpop.f32.mrf.mxu1 }
 0x1bc   : > { %v2245_v38 = vadd.f32 %v5116_v59, %v2172_v17  ;;  %v5162_v48 = vadd.f32 %v5161_v9, %v5160_v60  ;;  %v2183_v37 = vadd.f32 %v5079_v30, %v6988_v46 }
 0x1bd   : > { %v5118_v34 = vpop.f32.mrf.mxu0  ;;  %v5163_v36 = vpop.f32.mrf.mxu1 }
 0x1be   : > { %v5119_v15 = vadd.f32 %v5118_v34, %v5117_v29  ;;  %v2318_v2 = vadd.f32 %v5162_v48, %v2245_v38 }
 0x1bf   : > { %v5120_v39 = vpop.f32.mrf.mxu0  ;;  %v5164_v41 = vpop.f32.mrf.mxu1 }
 0x1c0   : > { %v5165_v43 = vadd.f32 %v5164_v41, %v5163_v36 }
 0x1c1   : > { %v5121_v13 = vpop.f32.mrf.mxu0  ;;  %v5166_v42 = vpop.f32.mrf.mxu1 }
 0x1c2   : > { %v5122_v24 = vadd.f32 %v5121_v13, %v5120_v39 }
 0x1c3   : > { %v5123_v45 = vpop.f32.mrf.mxu0  ;;  %v5167_v50 = vpop.f32.mrf.mxu1 }
 0x1c4   : > { %v5168_v9 = vadd.f32 %v5167_v50, %v5166_v42  ;;  %v2188_v50 = vadd.f32 %v5082_v44, %v6995_v52  ;;  %v5088_v52 = vadd.f32 %v7008_v3, %v7006_v63 }
 0x1c5   : > { %v5124_v49 = vpop.f32.mrf.mxu0  ;;  %v5169_v56 = vpop.f32.mrf.mxu1 }
 0x1c6   : > { %v5125_v29 = vadd.f32 %v5124_v49, %v5123_v45 }
 0x1c7   : > { %v5126_v51 = vpop.f32.mrf.mxu0  ;;  %v5170_v20 = vpop.f32.mrf.mxu1 }
 0x1c8   : > { %v2256_v47 = vadd.f32 %v5125_v29, %v2183_v37  ;;  %v5171_v48 = vadd.f32 %v5170_v20, %v5169_v56  ;;  %v7770_v37 = vld [vmem:[#allocation30_spill] sm:$0xff] }
 0x1c9   : > { %v5127_v55 = vpop.f32.mrf.mxu0  ;;  %v7038_v4 = vpop.f32.mrf.mxu1 }
 0x1ca   : > { %v5128_v45 = vadd.f32 %v5127_v55, %v5126_v51 }
 0x1cb   : > { %v5129_v61 = vpop.f32.mrf.mxu0  ;;  %v7044_v10 = vpop.f32.mrf.mxu1 }
 0x1cd   : > { %v5130_v62 = vpop.f32.mrf.mxu0  ;;  %v7052_v19 = vpop.f32.mrf.mxu1 }
 0x1cf   : > { %v7034_v0 = vpop.f32.mrf.mxu0  ;;  %v5176_v11 = vpop.f32.mrf.mxu1 }
 0x1d1   : > { %v7036_v1 = vpop.f32.mrf.mxu0  ;;  %v7066_v33 = vpop.f32.mrf.mxu1 }
 0x1d3   : > { %v7040_v6 = vpop.f32.mrf.mxu0  ;;  %v5179_v18 = vpop.f32.mrf.mxu1 }
 0x1d5   : > { %v7042_v8 = vpop.f32.mrf.mxu0 }
 0x1d6   : > { %7760 = vst [vmem:[#allocation35_spill] sm:$0xff] %v7042_v8 }
 0x1d7   : > { %v7046_v12 = vpop.f32.mrf.mxu0 }
 0x1d8   : > { %7761 = vst [vmem:[#allocation36_spill] sm:$0xff] %v7046_v12 }
 0x1d9   : > { %v7048_v14 = vpop.f32.mrf.mxu0 }
 0x1da   : > { %7762 = vst [vmem:[#allocation37_spill] sm:$0xff] %v7048_v14  ;;  %v2175_v14 = vadd.f32 %v5073_v22, %v6965_v32  ;;  %v2180_v32 = vadd.f32 %v5076_v26, %v6979_v40  ;;  %v5181_v40 = vpop.f32.mrf.mxu1 }
 0x1db   : > { %v7054_v54 = vpop.f32.mrf.mxu0 }
 0x1dc   : > { %7763 = vst [vmem:[#allocation38_spill] sm:$0xff] %v7054_v54  ;;  %v2248_v54 = vadd.f32 %v5119_v15, %v2175_v14  ;;  %v2253_v60 = vadd.f32 %v5122_v24, %v2180_v32  ;;  %v5182_v20 = vpop.f32.mrf.mxu1 }
 0x1dd   : > { %v7058_v21 = vpop.f32.mrf.mxu0  ;;  %v7765_v63 = vld [vmem:[#allocation35_spill] sm:$0xff] }
 0x1de   : > { %v2321_v59 = vadd.f32 %v5165_v43, %v2248_v54  ;;  %v5085_v54 = vadd.f32 %v7004_v35, %v6999_v57  ;;  %v2326_v46 = vadd.f32 %v5168_v9, %v2253_v60  ;;  %v2261_v57 = vadd.f32 %v5128_v45, %v2188_v50  ;;  %v5184_v30 = vpop.f32.mrf.mxu1  ;;  %v7776_v50 = vld [vmem:[#allocation31_spill] sm:$0xff] }
 0x1df   : > { %v5206_v12 = vpop.f32.mrf.mxu0  ;;  %v5174_v35 = vadd.f32 %v7044_v10, %v7038_v4  ;;  %v5134_v10 = vadd.f32 %v7036_v1, %v7034_v0  ;;  %v5137_v3 = vadd.f32 %v7765_v63, %v7040_v6  ;;  %v7768_v0 = vld [vmem:[#allocation26_spill] sm:$0xff] }
 0x1e0   : > { %v2191_v56 = vadd.f32 %v5085_v54, %v7002_v58  ;;  %v5177_v58 = vadd.f32 %v5176_v11, %v7052_v19  ;;  %v7766_v19 = vld [vmem:[#allocation27_spill] sm:$0xff] }
 0x1e1   : > { %v5207_v23 = vpop.f32.mrf.mxu0  ;;  %v2334_v4 = vadd.f32 %v5174_v35, %v2261_v57  ;;  %v2196_v24 = vadd.f32 %v5088_v52, %v7766_v19 }
 0x1e2   : > { %v5208_v8 = vadd.f32 %v5207_v23, %v5206_v12  ;;  %v2329_v12 = vadd.f32 %v5171_v48, %v2256_v47  ;;  %v7771_v48 = vld [vmem:[#allocation32_spill] sm:$0xff] }
 0x1e3   : > { %v5209_v25 = vpop.f32.mrf.mxu0  ;;  %v2269_v1 = vadd.f32 %v5134_v10, %v2196_v24  ;;  %v5840_v24 = vld [vmem:[%s7750_s5] sm:$0xff]  }
 0x1e4   : > { %v2391_v17 = vadd.f32 %v5208_v8, %v2318_v2  ;;  %v5131_v8 = vadd.f32 %v5130_v62, %v5129_v61  ;;  %5330 = vmatpush3.bf16.msra.mxu0 %v5840_v24 }
 0x1e5   : > { %v5210_v34 = vpop.f32.mrf.mxu0  ;;  %5375 = vmatprep.subr.bf16.mxu0 %v7764_v16 }
 0x1e6   : > { %v5211_v22 = vadd.f32 %v5210_v34, %v5209_v25  ;;  %v2429_v39 = vmax.f32 %v2391_v17, 0.0  ;;  %v2264_v55 = vadd.f32 %v5131_v8, %v2191_v56  ;;  %v5180_v17 = vadd.f32 %v5179_v18, %v7066_v33  ;;  %v7774_v33 = vld [vmem:[#allocation37_spill] sm:$0xff]  ;;  %v7777_v56 = vld [vmem:[#allocation34_spill] sm:$0xff] }
 0x1e7   : > { %v5212_v15 = vpop.f32.mrf.mxu0 }
 0x1e8   : > { %v2394_v36 = vadd.f32 %v5211_v22, %v2321_v59  ;;  %v2337_v29 = vadd.f32 %v5177_v58, %v2264_v55  ;;  %v7769_v22 = vld [vmem:[#allocation29_spill] sm:$0xff] }
 0x1e9   : > { %v5213_v38 = vpop.f32.mrf.mxu0 }
 0x1ea   : > { %v2430_v41 = vmax.f32 %v2394_v36, 0.0  ;;  %v5214_v13 = vadd.f32 %v5213_v38, %v5212_v15  ;;  %v5094_v15 = vadd.f32 %v7770_v37, %v7769_v22  ;;  %v5183_v36 = vadd.f32 %v5182_v20, %v5181_v40 }
 0x1eb   : > { %v5215_v43 = vpop.f32.mrf.mxu0 }
 0x1ec   : > { %v2439_v49 = vpack.c.bf16 %v2430_v41, %v2429_v39  ;;  %v2399_v27 = vadd.f32 %v5214_v13, %v2326_v46  ;;  %v7772_v39 = vld [vmem:[#allocation33_spill] sm:$0xff]  ;;  %v7773_v46 = vld [vmem:[#allocation36_spill] sm:$0xff] }
 0x1ed   : > { %v5216_v42 = vpop.f32.mrf.mxu0  ;;  %v5097_v41 = vadd.f32 %v7772_v39, %v7771_v48  ;;  %v5140_v18 = vadd.f32 %v7774_v33, %v7773_v46 }
 0x1ee   : > { %v5217_v53 = vadd.f32 %v5216_v42, %v5215_v43  ;;  %5304 = vmatmul.mubr.bf16.vlgmr.msra.gmra.mxu1 %v2439_v49  ;;  %v2431_v62 = vmax.f32 %v2399_v27, 0.0  ;;  %v2342_v43 = vadd.f32 %v5180_v17, %v2269_v1  ;;  %v7775_v49 = vld [vmem:[#allocation38_spill] sm:$0xff] }
 0x1ef   : > { %v5218_v14 = vpop.f32.mrf.mxu0  ;;  %5307 = vmatprep.mubr.msk.bf16.mxu1 %vm6453_vm0, %v7764_v16  ;;  %5443 = vmatpush3.bf16.msra.mxu1 %v6953_v28  ;;  %v5091_v28 = vadd.f32 %v7018_v7, %v7013_v5  ;;  %v7767_v7 = vld [vmem:[#allocation28_spill] sm:$0xff]  ;;  %v5143_v8 = vadd.f32 %v7058_v21, %v7775_v49  ;;  %v2207_v20 = vadd.f32 %v5097_v41, %v7777_v56 }
 0x1f0   : > { %v2402_v51 = vadd.f32 %v5217_v53, %v2329_v12  ;;  %5440 = vmatprep.subr.bf16.mxu1 %v7764_v16  ;;  %v2204_v12 = vadd.f32 %v5094_v15, %v7776_v50 }
 0x1f1   : > { %v5219_v61 = vpop.f32.mrf.mxu0  ;;  %v2199_v32 = vadd.f32 %v5091_v28, %v7767_v7  ;;  %v2280_v55 = vadd.f32 %v5143_v8, %v2207_v20 }
 0x1f2   : > { %v2432_v23 = vmax.f32 %v2402_v51, 0.0  ;;  %v5220_v26 = vadd.f32 %v5219_v61, %v5218_v14  ;;  %v2277_v35 = vadd.f32 %v5140_v18, %v2204_v12  ;;  %v5841_v18 = vld [vmem:[%s7779_s28 + $0x8] sm:$0xff]  }
 0x1f3   : > { %v5221_v25 = vpop.f32.mrf.mxu0  ;;  %5444 = vmatpush3.bf16.msra.mxu1 %v6961_v31  ;;  %v5185_v31 = vpop.f32.mrf.mxu1  ;;  %v2272_v60 = vadd.f32 %v5137_v3, %v2199_v32 }
 0x1f4   : > { %v2440_v2 = vpack.c.bf16 %v2432_v23, %v2431_v62  ;;  %5441 = vmatprep.subr.bf16.mxu1 %v7764_v16  ;;  %v2407_v34 = vadd.f32 %v5220_v26, %v2334_v4  ;;  %v5186_v51 = vadd.f32 %v5185_v31, %v5184_v30 }
 0x1f5   : > { %v5222_v11 = vpop.f32.mrf.mxu0  ;;  %v5187_v13 = vpop.f32.mrf.mxu1  ;;  %v2345_v40 = vadd.f32 %v5183_v36, %v2272_v60 }
 0x1f6   : > { %v5223_v5 = vadd.f32 %v5222_v11, %v5221_v25  ;;  %5308 = vmatmul.mubr.bf16.gmra.mxu1 %v2440_v2  ;;  %v2433_v44 = vmax.f32 %v2407_v34, 0.0  ;;  %v2350_v28 = vadd.f32 %v5186_v51, %v2277_v35 }
 0x1f7   : > { %v5224_v59 = vpop.f32.mrf.mxu0  ;;  %5311 = vmatprep.mubr.msk.bf16.mxu1 %vm6453_vm0, %v7764_v16  ;;  %5445 = vmatpush3.bf16.msra.mxu1 %v7768_v0  ;;  %v5188_v14 = vpop.f32.mrf.mxu1 }
 0x1f8   : > { %v2410_v6 = vadd.f32 %v5223_v5, %v2337_v29  ;;  %5442 = vmatprep.subr.bf16.mxu1 %v7764_v16  ;;  %v5189_v21 = vadd.f32 %v5188_v14, %v5187_v13  ;;  %v4737_v29 = vld [vmem:[%s7778_s6] ss:$0 sm:$0xff] }
 0x1f9   : > { %v5225_v9 = vpop.f32.mrf.mxu0 }
 0x1fa   : > { %v2434_v47 = vmax.f32 %v2410_v6, 0.0  ;;  %v5226_v38 = vadd.f32 %v5225_v9, %v5224_v59  ;;  %v2353_v10 = vadd.f32 %v5189_v21, %v2280_v55  ;;  %v5842_v21 = vld [vmem:[%s7779_s28] sm:$0xff]  }
 0x1fb   : > { %v5227_v54 = vpop.f32.mrf.mxu0  ;;  %5446 = vmatpush3.bf16.msra.mxu1 %v5840_v24 }
 0x1fc   : > { %v2441_v45 = vpack.c.bf16 %v2434_v47, %v2433_v44  ;;  %v2415_v27 = vadd.f32 %v5226_v38, %v2342_v43  ;;  %5351 = vmatprep.subr.bf16.mxu1 %v7764_v16 }
 0x1fd   : > { %v5228_v42 = vpop.f32.mrf.mxu0 }
 0x1fe   : > { %v5229_v53 = vadd.f32 %v5228_v42, %v5227_v54  ;;  %5312 = vmatmul.mubr.bf16.gmra.mxu1 %v2441_v45  ;;  %v2435_v58 = vmax.f32 %v2415_v27, 0.0 }
 0x1ff   : > { %v5230_v57 = vpop.f32.mrf.mxu0  ;;  %5315 = vmatprep.mubr.msk.bf16.mxu1 %vm6453_vm0, %v7764_v16 }
 0x200   : > { %v2418_v52 = vadd.f32 %v5229_v53, %v2345_v40 }
 0x201   : > { %v5231_v61 = vpop.f32.mrf.mxu0 }
 0x202   : > { %v2436_v62 = vmax.f32 %v2418_v52, 0.0  ;;  %v5232_v23 = vadd.f32 %v5231_v61, %v5230_v57 }
 0x203   : > { %v5233_v26 = vpop.f32.mrf.mxu0 }
 0x204   : > { %v2442_v25 = vpack.c.bf16 %v2436_v62, %v2435_v58  ;;  %v2423_v2 = vadd.f32 %v5232_v23, %v2350_v28  ;;  %v5843_v58 = vld [vmem:[%s7780_s25 + $0x18] sm:$0xff]   ;;  %v4746_v62 = vld [vmem:[%s7782_s23] ss:$0 sm:$0xff]  ;;  %s7783_s25 = sld [smem:[#allocation46_spill]] }
 0x205   : > { %v5234_v4 = vpop.f32.mrf.mxu0  ;;  %s7784_s23 = sld [smem:[#allocation48_spill]] }
 0x206   : > { %v5235_v63 = vadd.f32 %v5234_v4, %v5233_v26  ;;  %5316 = vmatmul.mubr.bf16.gmra.mxu1 %v2442_v25  ;;  %v2437_v30 = vmax.f32 %v2423_v2, 0.0 }
 0x207   : > { %5319 = vmatprep.mubr.msk.bf16.mxu1 %vm6453_vm0, %v7764_v16 }
 0x208   : > { %v2426_v3 = vadd.f32 %v5235_v63, %v2353_v10 }
 0x20a   : > { %v2438_v11 = vmax.f32 %v2426_v3, 0.0 }
 0x20c   : > { %v2443_v19 = vpack.c.bf16 %v2438_v11, %v2437_v30 }
 0x20e   : > { %5320 = vmatmul.mubr.bf16.gmra.mxu1 %v2443_v19 }
 0x20f   : > { %5339 = vmatprep.mubr.msk.bf16.mxu1 %vm6453_vm0, %v7764_v16 }
 0x2ae   : > { %v2549_v34 = vpop.f32.mrf.mxu1 }
 0x2af   : > { %v2550_v7 = vadd.f32 %v4737_v29, %v2549_v34 }
 0x2b0   : > { %v5305_v5 = vpop.f32.mrf.mxu1 }
 0x2b1   : > { %v2588_v0 = vmax.f32 %v2550_v7, 0.0 }
 0x2b2   : > { %v2552_v32 = vpop.f32.mrf.mxu1 }
 0x2b3   : > { %v2553_v31 = vadd.f32 %v4737_v29, %v2552_v32 }
 0x2b4   : > { %v5306_v59 = vpop.f32.mrf.mxu1 }
 0x2b5   : > { %v2589_v1 = vmax.f32 %v2553_v31, 0.0 }
 0x2b6   : > { %v2557_v17 = vpop.f32.mrf.mxu1 }
 0x2b7   : > { %v2598_v6 = vpack.c.bf16 %v2589_v1, %v2588_v0  ;;  %v2558_v37 = vadd.f32 %v4737_v29, %v2557_v17 }
 0x2b8   : > { %v5309_v22 = vpop.f32.mrf.mxu1 }
 0x2b9   : > { %5332 = vmatmul.mubr.msk.bf16.vlgmr.msra.gmra.mxu0 %vm2642_vm1, %v2598_v6  ;;  %v2590_v36 = vmax.f32 %v2558_v37, 0.0 }
 0x2ba   : > { %v2560_v15 = vpop.f32.mrf.mxu1  ;;  %5335 = vmatprep.mubr.msk.bf16.mxu0 %vm6453_vm0, %v7764_v16  ;;  %5376 = vmatpush3.bf16.msra.mxu0 %v5843_v58 }
 0x2bb   : > { %v2561_v60 = vadd.f32 %v4737_v29, %v2560_v15  ;;  %5377 = vmatprep.subr.bf16.mxu0 %v7764_v16 }
 0x2bc   : > { %v5310_v9 = vpop.f32.mrf.mxu1 }
 0x2bd   : > { %v2591_v44 = vmax.f32 %v2561_v60, 0.0 }
 0x2be   : > { %v2565_v47 = vpop.f32.mrf.mxu1 }
 0x2bf   : > { %v2599_v38 = vpack.c.bf16 %v2591_v44, %v2590_v36  ;;  %v2566_v39 = vadd.f32 %v4737_v29, %v2565_v47 }
 0x2c0   : > { %v5313_v48 = vpop.f32.mrf.mxu1 }
 0x2c1   : > { %5336 = vmatmul.mubr.msk.bf16.gmra.mxu0 %vm2642_vm1, %v2599_v38  ;;  %v2592_v43 = vmax.f32 %v2566_v39, 0.0 }
 0x2c2   : > { %v2568_v41 = vpop.f32.mrf.mxu1  ;;  %5383 = vmatprep.mubr.msk.bf16.mxu0 %vm6453_vm0, %v7764_v16 }
 0x2c3   : > { %v2569_v13 = vadd.f32 %v4737_v29, %v2568_v41 }
 0x2c4   : > { %v5314_v54 = vpop.f32.mrf.mxu1 }
 0x2c5   : > { %v2593_v46 = vmax.f32 %v2569_v13, 0.0 }
 0x2c6   : > { %v2573_v33 = vpop.f32.mrf.mxu1 }
 0x2c7   : > { %v2600_v45 = vpack.c.bf16 %v2593_v46, %v2592_v43  ;;  %v2574_v8 = vadd.f32 %v4737_v29, %v2573_v33 }
 0x2c8   : > { %v5317_v49 = vpop.f32.mrf.mxu1 }
 0x2c9   : > { %5340 = vmatmul.mubr.msk.bf16.vlgmr.msra.gmra.mxu1 %vm2642_vm1, %v2600_v45  ;;  %v2594_v40 = vmax.f32 %v2574_v8, 0.0 }
 0x2ca   : > { %v2576_v42 = vpop.f32.mrf.mxu1  ;;  %5343 = vmatprep.mubr.msk.bf16.mxu1 %vm6453_vm0, %v7764_v16  ;;  %5352 = vmatpush3.bf16.msra.mxu1 %v5841_v18 }
 0x2cb   : > { %v2577_v50 = vadd.f32 %v4737_v29, %v2576_v42  ;;  %5353 = vmatprep.subr.bf16.mxu1 %v7764_v16  ;;  %v5844_v42 = vld [vmem:[%s7781_s12 + $0x10] sm:$0xff]  }
 0x2cc   : > { %v5318_v12 = vpop.f32.mrf.mxu1  ;;  %5378 = vmatpush3.bf16.msra.mxu0 %v5844_v42 }
 0x2cd   : > { %v2595_v27 = vmax.f32 %v2577_v50, 0.0  ;;  %5379 = vmatprep.subr.bf16.mxu0 %v7764_v16  ;;  %v5845_v50 = vld [vmem:[%s7781_s12 + $0x8] sm:$0xff]   ;;  %v5846_v12 = vld [vmem:[%s7781_s12] sm:$0xff]  }
 0x2ce   : > { %v2581_v53 = vpop.f32.mrf.mxu1  ;;  %5354 = vmatpush3.bf16.msra.mxu1 %v5842_v21 }
 0x2cf   : > { %v2601_v56 = vpack.c.bf16 %v2595_v27, %v2594_v40  ;;  %v2582_v14 = vadd.f32 %v4737_v29, %v2581_v53  ;;  %v4756_v40 = vld [vmem:[%s7783_s25] ss:$0 sm:$0xff] }
 0x2d0   : > { %v5321_v20 = vpop.f32.mrf.mxu1  ;;  %5380 = vmatpush3.bf16.msra.mxu0 %v5845_v50 }
 0x2d1   : > { %5344 = vmatmul.mubr.msk.bf16.gmra.mxu1 %vm2642_vm1, %v2601_v56  ;;  %v2596_v52 = vmax.f32 %v2582_v14, 0.0  ;;  %5381 = vmatprep.subr.bf16.mxu0 %v7764_v16 }
 0x2d2   : > { %v2584_v57 = vpop.f32.mrf.mxu1  ;;  %5347 = vmatprep.mubr.msk.bf16.mxu1 %vm6453_vm0, %v7764_v16 }
 0x2d3   : > { %v2585_v35 = vadd.f32 %v4737_v29, %v2584_v57 }
 0x2d4   : > { %v5322_v51 = vpop.f32.mrf.mxu1  ;;  %5382 = vmatpush3.bf16.msra.mxu0 %v5846_v12 }
 0x2d5   : > { %v2597_v55 = vmax.f32 %v2585_v35, 0.0 }
 0x2d7   : > { %v2602_v61 = vpack.c.bf16 %v2597_v55, %v2596_v52 }
 0x2d9   : > { %5348 = vmatmul.mubr.msk.bf16.gmra.mxu1 %vm2642_vm1, %v2602_v61 }
 0x2da   : > { %5355 = vmatprep.mubr.msk.bf16.mxu1 %vm6453_vm0, %v7764_v16 }
 0x379   : > { %v2692_v23 = vpop.f32.mrf.mxu0 }
 0x37a   : > { %v2693_v26 = vadd.f32 %v4746_v62, %v2692_v23 }
 0x37b   : > { %v5333_v28 = vpop.f32.mrf.mxu0 }
 0x37c   : > { %v2731_v25 = vmax.f32 %v2693_v26, 0.0 }
 0x37d   : > { %v2695_v4 = vpop.f32.mrf.mxu0 }
 0x37e   : > { %2742 = vst.msk [vmem:[%s6795_s22] sm:$0xff] %vm2741_vm2, %v2731_v25  ;;  %v2696_v10 = vadd.f32 %v4746_v62, %v2695_v4 }
 0x37f   : > { %v5334_v2 = vpop.f32.mrf.mxu0 }
 0x380   : > { %v2732_v63 = vmax.f32 %v2696_v10, 0.0 }
 0x381   : > { %v2700_v3 = vpop.f32.mrf.mxu0 }
 0x382   : > { %2743 = vst.msk [vmem:[%s6795_s22 + $0x8] sm:$0xff] %vm2741_vm2, %v2732_v63  ;;  %v2752_v30 = vpack.c.bf16 %v2732_v63, %v2731_v25  ;;  %v2701_v11 = vadd.f32 %v4746_v62, %v2700_v3 }
 0x383   : > { %v5337_v19 = vpop.f32.mrf.mxu0 }
 0x384   : > { %v2733_v24 = vmax.f32 %v2701_v11, 0.0  ;;  %5356 = vmatmul.mubr.msk.bf16.vlgmr.msra.gmra.mxu1 %vm2741_vm2, %v2752_v30 }
 0x385   : > { %v2703_v29 = vpop.f32.mrf.mxu0  ;;  %5359 = vmatprep.mubr.msk.bf16.mxu1 %vm6453_vm0, %v7764_v16 }
 0x386   : > { %2744 = vst.msk [vmem:[%s6795_s22 + $0x10] sm:$0xff] %vm2741_vm2, %v2733_v24  ;;  %v2704_v34 = vadd.f32 %v4746_v62, %v2703_v29 }
 0x387   : > { %v5338_v5 = vpop.f32.mrf.mxu0 }
 0x388   : > { %v2734_v7 = vmax.f32 %v2704_v34, 0.0 }
 0x389   : > { %v2708_v32 = vpop.f32.mrf.mxu1 }
 0x38a   : > { %2745 = vst.msk [vmem:[%s6795_s22 + $0x18] sm:$0xff] %vm2741_vm2, %v2734_v7  ;;  %v2753_v31 = vpack.c.bf16 %v2734_v7, %v2733_v24  ;;  %v2709_v59 = vadd.f32 %v4746_v62, %v2708_v32 }
 0x38b   : > { %v5341_v0 = vpop.f32.mrf.mxu1 }
 0x38c   : > { %v2735_v1 = vmax.f32 %v2709_v59, 0.0  ;;  %5360 = vmatmul.mubr.msk.bf16.gmra.mxu1 %vm2741_vm2, %v2753_v31 }
 0x38d   : > { %v2711_v17 = vpop.f32.mrf.mxu1  ;;  %5363 = vmatprep.mubr.msk.bf16.mxu1 %vm6453_vm0, %v7764_v16 }
 0x38e   : > { %2746 = vst.msk [vmem:[%s6795_s22 + $0x20] sm:$0xff] %vm2741_vm2, %v2735_v1  ;;  %v2712_v6 = vadd.f32 %v4746_v62, %v2711_v17 }
 0x38f   : > { %v5342_v22 = vpop.f32.mrf.mxu1 }
 0x390   : > { %v2736_v37 = vmax.f32 %v2712_v6, 0.0 }
 0x391   : > { %v2716_v15 = vpop.f32.mrf.mxu1 }
 0x392   : > { %2747 = vst.msk [vmem:[%s6795_s22 + $0x28] sm:$0xff] %vm2741_vm2, %v2736_v37  ;;  %v2754_v60 = vpack.c.bf16 %v2736_v37, %v2735_v1  ;;  %v2717_v9 = vadd.f32 %v4746_v62, %v2716_v15 }
 0x393   : > { %v5345_v36 = vpop.f32.mrf.mxu1 }
 0x394   : > { %v2737_v44 = vmax.f32 %v2717_v9, 0.0  ;;  %5364 = vmatmul.mubr.msk.bf16.gmra.mxu1 %vm2741_vm2, %v2754_v60 }
 0x395   : > { %v2719_v47 = vpop.f32.mrf.mxu1  ;;  %5367 = vmatprep.mubr.msk.bf16.mxu1 %vm6453_vm0, %v7764_v16 }
 0x396   : > { %2748 = vst.msk [vmem:[%s6795_s22 + $0x30] sm:$0xff] %vm2741_vm2, %v2737_v44  ;;  %v2720_v38 = vadd.f32 %v4746_v62, %v2719_v47  ;;  %v4764_v47 = vld [vmem:[%s7784_s23] ss:$0 sm:$0xff] }
 0x397   : > { %v5346_v48 = vpop.f32.mrf.mxu1 }
 0x398   : > { %v2738_v39 = vmax.f32 %v2720_v38, 0.0 }
 0x399   : > { %v2724_v41 = vpop.f32.mrf.mxu1 }
 0x39a   : > { %2749 = vst.msk [vmem:[%s6795_s22 + $0x38] sm:$0xff] %vm2741_vm2, %v2738_v39  ;;  %v2755_v13 = vpack.c.bf16 %v2738_v39, %v2737_v44  ;;  %v2725_v54 = vadd.f32 %v4746_v62, %v2724_v41 }
 0x39b   : > { %v5349_v43 = vpop.f32.mrf.mxu1 }
 0x39c   : > { %v2739_v46 = vmax.f32 %v2725_v54, 0.0  ;;  %5368 = vmatmul.mubr.msk.bf16.gmra.mxu1 %vm2741_vm2, %v2755_v13 }
 0x39d   : > { %v2727_v33 = vpop.f32.mrf.mxu1  ;;  %5371 = vmatprep.mubr.msk.bf16.mxu1 %vm6453_vm0, %v7764_v16 }
 0x39e   : > { %2750 = vst.msk [vmem:[%s6795_s22 + $0x40] sm:$0xff] %vm2741_vm2, %v2739_v46  ;;  %v2728_v18 = vadd.f32 %v4746_v62, %v2727_v33 }
 0x39f   : > { %v5350_v45 = vpop.f32.mrf.mxu1 }
 0x3a0   : > { %v2740_v49 = vmax.f32 %v2728_v18, 0.0 }
 0x3a2   : > { %2751 = vst.msk [vmem:[%s6795_s22 + $0x48] sm:$0xff] %vm2741_vm2, %v2740_v49  ;;  %v2756_v8 = vpack.c.bf16 %v2740_v49, %v2739_v46 }
 0x3a4   : > { %5372 = vmatmul.mubr.msk.bf16.gmra.mxu1 %vm2741_vm2, %v2756_v8 }
 0x444   : > { %v2829_v27 = vpop.f32.mrf.mxu1 }
 0x445   : > { %v2830_v56 = vadd.f32 %v4756_v40, %v2829_v27 }
 0x446   : > { %v5357_v53 = vpop.f32.mrf.mxu1 }
 0x447   : > { %v2868_v35 = vmax.f32 %v2830_v56, 0.0 }
 0x448   : > { %v2832_v20 = vpop.f32.mrf.mxu1 }
 0x449   : > { %v2833_v14 = vadd.f32 %v4756_v40, %v2832_v20 }
 0x44a   : > { %v5358_v57 = vpop.f32.mrf.mxu1 }
 0x44b   : > { %v2869_v51 = vmax.f32 %v2833_v14, 0.0 }
 0x44c   : > { %v2837_v52 = vpop.f32.mrf.mxu1 }
 0x44d   : > { %v2878_v55 = vpack.c.bf16 %v2869_v51, %v2868_v35  ;;  %v2838_v21 = vadd.f32 %v4756_v40, %v2837_v52 }
 0x44e   : > { %v5361_v61 = vpop.f32.mrf.mxu1 }
 0x44f   : > { %5384 = vmatmul.mubr.msk.bf16.vlgmr.msra.gmra.mxu0 %vm2642_vm1, %v2878_v55  ;;  %v2870_v26 = vmax.f32 %v2838_v21, 0.0 }
 0x450   : > { %v2840_v58 = vpop.f32.mrf.mxu1  ;;  %5387 = vmatprep.mubr.msk.bf16.mxu0 %vm6453_vm0, %v7764_v16 }
 0x451   : > { %v2841_v62 = vadd.f32 %v4756_v40, %v2840_v58 }
 0x452   : > { %v5362_v23 = vpop.f32.mrf.mxu1 }
 0x453   : > { %v2871_v28 = vmax.f32 %v2841_v62, 0.0 }
 0x454   : > { %v2845_v25 = vpop.f32.mrf.mxu1 }
 0x455   : > { %v2879_v4 = vpack.c.bf16 %v2871_v28, %v2870_v26  ;;  %v2846_v2 = vadd.f32 %v4756_v40, %v2845_v25 }
 0x456   : > { %v5365_v10 = vpop.f32.mrf.mxu1 }
 0x457   : > { %5388 = vmatmul.mubr.msk.bf16.gmra.mxu0 %vm2642_vm1, %v2879_v4  ;;  %v2872_v11 = vmax.f32 %v2846_v2, 0.0 }
 0x458   : > { %v2848_v63 = vpop.f32.mrf.mxu1  ;;  %5391 = vmatprep.mubr.msk.bf16.mxu0 %vm6453_vm0, %v7764_v16 }
 0x459   : > { %v2849_v3 = vadd.f32 %v4756_v40, %v2848_v63 }
 0x45a   : > { %v5366_v30 = vpop.f32.mrf.mxu1 }
 0x45b   : > { %v2873_v19 = vmax.f32 %v2849_v3, 0.0 }
 0x45c   : > { %v2853_v24 = vpop.f32.mrf.mxu1 }
 0x45d   : > { %v2880_v29 = vpack.c.bf16 %v2873_v19, %v2872_v11  ;;  %v2854_v5 = vadd.f32 %v4756_v40, %v2853_v24 }
 0x45e   : > { %v5369_v34 = vpop.f32.mrf.mxu1 }
 0x45f   : > { %5392 = vmatmul.mubr.msk.bf16.gmra.mxu0 %vm2642_vm1, %v2880_v29  ;;  %v2874_v59 = vmax.f32 %v2854_v5, 0.0 }
 0x460   : > { %v2856_v7 = vpop.f32.mrf.mxu1  ;;  %5395 = vmatprep.mubr.msk.bf16.mxu0 %vm6453_vm0, %v7764_v16 }
 0x461   : > { %v2857_v32 = vadd.f32 %v4756_v40, %v2856_v7 }
 0x462   : > { %v5370_v31 = vpop.f32.mrf.mxu1 }
 0x463   : > { %v2875_v0 = vmax.f32 %v2857_v32, 0.0 }
 0x464   : > { %v2861_v1 = vpop.f32.mrf.mxu1 }
 0x465   : > { %v2881_v17 = vpack.c.bf16 %v2875_v0, %v2874_v59  ;;  %v2862_v22 = vadd.f32 %v4756_v40, %v2861_v1 }
 0x466   : > { %v5373_v6 = vpop.f32.mrf.mxu1 }
 0x467   : > { %5396 = vmatmul.mubr.msk.bf16.gmra.mxu0 %vm2642_vm1, %v2881_v17  ;;  %v2876_v9 = vmax.f32 %v2862_v22, 0.0 }
 0x468   : > { %v2864_v37 = vpop.f32.mrf.mxu1  ;;  %5399 = vmatprep.mubr.msk.bf16.mxu0 %vm6453_vm0, %v7764_v16 }
 0x469   : > { %v2865_v15 = vadd.f32 %v4756_v40, %v2864_v37 }
 0x46a   : > { %v5374_v60 = vpop.f32.mrf.mxu1 }
 0x46b   : > { %v2877_v36 = vmax.f32 %v2865_v15, 0.0 }
 0x46d   : > { %v2882_v44 = vpack.c.bf16 %v2877_v36, %v2876_v9 }
 0x46f   : > { %5400 = vmatmul.mubr.msk.bf16.gmra.mxu0 %vm2642_vm1, %v2882_v44 }
 0x50f   : > { %v2971_v38 = vpop.f32.mrf.mxu0 }
 0x510   : > { %v2972_v48 = vadd.f32 %v4764_v47, %v2971_v38 }
 0x511   : > { %v5385_v39 = vpop.f32.mrf.mxu0 }
 0x512   : > { %v3010_v41 = vmax.f32 %v2972_v48, 0.0 }
 0x513   : > { %v2974_v13 = vpop.f32.mrf.mxu0 }
 0x514   : > { %3020 = vst [vmem:[#allocation2 + $0x30] sm:$0xff] %v3010_v41  ;;  %v2975_v54 = vadd.f32 %v4764_v47, %v2974_v13 }
 0x515   : > { %v5386_v43 = vpop.f32.mrf.mxu0 }
 0x516   : > { %v3011_v16 = vmax.f32 %v2975_v54, 0.0 }
 0x517   : > { %v2979_v46 = vpop.f32.mrf.mxu0 }
 0x518   : > { %3021 = vst [vmem:[#allocation2] sm:$0xff] %v3011_v16  ;;  %v2980_v33 = vadd.f32 %v4764_v47, %v2979_v46 }
 0x519   : > { %v5389_v18 = vpop.f32.mrf.mxu0 }
 0x51a   : > { %v3012_v45 = vmax.f32 %v2980_v33, 0.0 }
 0x51b   : > { %v2982_v49 = vpop.f32.mrf.mxu0 }
 0x51c   : > { %3022 = vst [vmem:[#allocation2 + $0x18] sm:$0xff] %v3012_v45  ;;  %v2983_v8 = vadd.f32 %v4764_v47, %v2982_v49 }
 0x51d   : > { %v5390_v42 = vpop.f32.mrf.mxu0 }
 0x51e   : > { %v3013_v50 = vmax.f32 %v2983_v8, 0.0 }
 0x51f   : > { %v2987_v12 = vpop.f32.mrf.mxu0 }
 0x520   : > { %3023 = vst [vmem:[#allocation2 + $0x10] sm:$0xff] %v3013_v50  ;;  %v2988_v40 = vadd.f32 %v4764_v47, %v2987_v12 }
 0x521   : > { %v5393_v27 = vpop.f32.mrf.mxu0 }
 0x522   : > { %v3014_v53 = vmax.f32 %v2988_v40, 0.0 }
 0x523   : > { %v2990_v56 = vpop.f32.mrf.mxu0 }
 0x524   : > { %3024 = vst [vmem:[#allocation2 + $0x48] sm:$0xff] %v3014_v53  ;;  %v2991_v20 = vadd.f32 %v4764_v47, %v2990_v56 }
 0x525   : > { %v5394_v14 = vpop.f32.mrf.mxu0 }
 0x526   : > { %v3015_v57 = vmax.f32 %v2991_v20, 0.0 }
 0x527   : > { %v2995_v35 = vpop.f32.mrf.mxu0 }
 0x528   : > { %3025 = vst [vmem:[#allocation2 + $0x28] sm:$0xff] %v3015_v57  ;;  %v2996_v51 = vadd.f32 %v4764_v47, %v2995_v35 }
 0x529   : > { %v5397_v52 = vpop.f32.mrf.mxu0 }
 0x52a   : > { %v3016_v55 = vmax.f32 %v2996_v51, 0.0 }
 0x52b   : > { %v2998_v61 = vpop.f32.mrf.mxu0 }
 0x52c   : > { %3026 = vst [vmem:[#allocation2 + $0x8] sm:$0xff] %v3016_v55  ;;  %v2999_v21 = vadd.f32 %v4764_v47, %v2998_v61 }
 0x52d   : > { %v5398_v58 = vpop.f32.mrf.mxu0 }
 0x52e   : > { %v3017_v62 = vmax.f32 %v2999_v21, 0.0 }
 0x52f   : > { %v3003_v23 = vpop.f32.mrf.mxu0 }
 0x530   : > { %3027 = vst [vmem:[#allocation2 + $0x20] sm:$0xff] %v3017_v62  ;;  %v3004_v26 = vadd.f32 %v4764_v47, %v3003_v23 }
 0x531   : > { %v5401_v28 = vpop.f32.mrf.mxu0 }
 0x532   : > { %v3018_v25 = vmax.f32 %v3004_v26, 0.0 }
 0x533   : > { %v3006_v4 = vpop.f32.mrf.mxu0 }
 0x534   : > { %3028 = vst [vmem:[#allocation2 + $0x40] sm:$0xff] %v3018_v25  ;;  %v3007_v10 = vadd.f32 %v4764_v47, %v3006_v4 }
 0x535   : > { %v5402_v2 = vpop.f32.mrf.mxu0 }
 0x536   : > { %v3019_v63 = vmax.f32 %v3007_v10, 0.0 }
 0x538   : > { %3029 = vst [vmem:[#allocation2 + $0x38] sm:$0xff] %v3019_v63 }
 0x539 PF: > { %v5847_v3 = vld [vmem:[%s6771_s7 + $0x18c] ss:$28 sps:$4 sm:$0xff]   ;;  %v5849_v30 = vld [vmem:[%s6771_s7 + $0x194] ss:$28 sps:$4 sm:$0xff]   ;;  %v6454_v11 = vmov 0   ;;  %v3030_v33 = vld [vmem:[#allocation2 + $0x30] sm:$0xff] }
 0x53a   : > { %3466 = vmatprep.mubr.bf16.mxu0 %v6454_v11  ;;  %3549 = vmatprep.mubr.bf16.mxu1 %v6454_v11  ;;  %v5851_v19 = vld [vmem:[%s6771_s7 + $0x188] ss:$28 sps:$4 sm:$0xff]   ;;  %v5852_v24 = vld [vmem:[%s6771_s7 + $0x190] ss:$28 sps:$4 sm:$0xff]   ;;  %v5855_v34 = vld [vmem:[%s6771_s7 + $0x15c] ss:$28 sps:$4 sm:$0xff]  }
 0x53b   : > { %3434 = vmatprep.subr.bf16.mxu0 %v5847_v3  ;;  %3517 = vmatprep.subr.bf16.mxu1 %v5849_v30  ;;  %v5853_v29 = vld [vmem:[%s6771_s7 + $0x154] ss:$28 sps:$4 sm:$0xff]   ;;  %v5859_v32 = vld [vmem:[%s6771_s7 + $0x11c] ss:$28 sps:$4 sm:$0xff]   ;;  %v5861_v31 = vld [vmem:[%s6771_s7 + $0x124] ss:$28 sps:$4 sm:$0xff]  }
 0x53c   : > { %3435 = vmatpush1.bf16.msra.mxu0 %v5851_v19  ;;  %3518 = vmatpush1.bf16.msra.mxu1 %v5852_v24  ;;  %v5857_v5 = vld [vmem:[%s6771_s7 + $0x150] ss:$28 sps:$4 sm:$0xff]   ;;  %v5858_v7 = vld [vmem:[%s6771_s7 + $0x158] ss:$28 sps:$4 sm:$0xff]   ;;  %v5864_v0 = vld [vmem:[%s6771_s7 + $0x120] ss:$28 sps:$4 sm:$0xff]  }
 0x53d   : > { %3436 = vmatprep.subr.bf16.mxu0 %v5853_v29  ;;  %3519 = vmatprep.subr.bf16.mxu1 %v5855_v34  ;;  %v5863_v59 = vld [vmem:[%s6771_s7 + $0x118] ss:$28 sps:$4 sm:$0xff]   ;;  %v5865_v1 = vld [vmem:[%s6771_s7 + $0xe4] ss:$28 sps:$4 sm:$0xff]   ;;  %v5867_v17 = vld [vmem:[%s6771_s7 + $0xec] ss:$28 sps:$4 sm:$0xff]  }
 0x53e   : > { %v5869_v6 = vld [vmem:[%s6771_s7 + $0xe0] ss:$28 sps:$4 sm:$0xff]   ;;  %v5870_v22 = vld [vmem:[%s6771_s7 + $0xe8] ss:$28 sps:$4 sm:$0xff]   ;;  %v5873_v15 = vld [vmem:[%s6771_s7 + $0xb4] ss:$28 sps:$4 sm:$0xff]  }
 0x53f   : > { %v5871_v37 = vld [vmem:[%s6771_s7 + $0xac] ss:$28 sps:$4 sm:$0xff]   ;;  %v5877_v36 = vld [vmem:[%s6771_s7 + $0x74] ss:$28 sps:$4 sm:$0xff]   ;;  %v5879_v44 = vld [vmem:[%s6771_s7 + $0x7c] ss:$28 sps:$4 sm:$0xff]  }
 0x540   : > { %3437 = vmatpush1.bf16.msra.mxu0 %v5857_v5  ;;  %3520 = vmatpush1.bf16.msra.mxu1 %v5858_v7  ;;  %v5875_v60 = vld [vmem:[%s6771_s7 + $0xa8] ss:$28 sps:$4 sm:$0xff]   ;;  %v5876_v9 = vld [vmem:[%s6771_s7 + $0xb0] ss:$28 sps:$4 sm:$0xff]   ;;  %v5882_v38 = vld [vmem:[%s6771_s7 + $0x78] ss:$28 sps:$4 sm:$0xff]  }
 0x541   : > { %3438 = vmatprep.subr.bf16.mxu0 %v5859_v32  ;;  %3521 = vmatprep.subr.bf16.mxu1 %v5861_v31  ;;  %v5881_v47 = vld [vmem:[%s6771_s7 + $0x70] ss:$28 sps:$4 sm:$0xff]   ;;  %v5883_v48 = vld [vmem:[%s6771_s7 + $0x3c] ss:$28 sps:$4 sm:$0xff]   ;;  %v5885_v39 = vld [vmem:[%s6771_s7 + $0x44] ss:$28 sps:$4 sm:$0xff]   ;;  %v3111_v31 = vlaneseq }
 0x542   : > { %v5887_v41 = vld [vmem:[%s6771_s7 + $0x38] ss:$28 sps:$4 sm:$0xff]   ;;  %v5888_v13 = vld [vmem:[%s6771_s7 + $0x40] ss:$28 sps:$4 sm:$0xff]   ;;  %v5891_v43 = vld [vmem:[%s6771_s7 + $0xc] ss:$28 sps:$4 sm:$0xff]  }
 0x543   : > { %v5889_v54 = vld [vmem:[%s6771_s7 + $0x4] ss:$28 sps:$4 sm:$0xff]   ;;  %v3031_v18 = vld [vmem:[#allocation2] sm:$0xff]  ;;  %v5897_v45 = vld [vmem:[%s6771_s7 + $0x19c] ss:$28 sps:$4 sm:$0xff]   ;;  %v6455_v50 = vmov 0.0  }
 0x544   : > { %3439 = vmatpush1.bf16.msra.mxu0 %v5863_v59  ;;  %3522 = vmatpush1.bf16.msra.mxu1 %v5864_v0  ;;  %v5893_v16 = vld [vmem:[%s6771_s7] ss:$28 sps:$4 sm:$0xff]   ;;  %v5894_v46 = vld [vmem:[%s6771_s7 + $0x8] ss:$28 sps:$4 sm:$0xff]   ;;  %v7251_v49 = vpack.c.bf16 %v3031_v18, %v3030_v33  ;;  %v5895_v8 = vld [vmem:[%s6771_s7 + $0x198] ss:$28 sps:$4 sm:$0xff]  }
 0x545   : > { %3440 = vmatprep.subr.bf16.mxu0 %v5865_v1  ;;  %3523 = vmatprep.subr.bf16.mxu1 %v5867_v17  ;;  %v5898_v42 = vld [vmem:[%s6771_s7 + $0x1a0] ss:$28 sps:$4 sm:$0xff]   ;;  %v3032_v27 = vld [vmem:[#allocation2 + $0x18] sm:$0xff]  ;;  %v5909_v51 = vld [vmem:[%s6771_s7 + $0xf4] ss:$28 sps:$4 sm:$0xff]   ;;  %vm6456_vm3 = vmmov 0  }
 0x546   : > { %v5901_v12 = vld [vmem:[%s6771_s7 + $0x164] ss:$28 sps:$4 sm:$0xff]   ;;  %v5905_v20 = vld [vmem:[%s6771_s7 + $0x12c] ss:$28 sps:$4 sm:$0xff]   ;;  %v3034_v55 = vld [vmem:[#allocation2 + $0x48] sm:$0xff]  ;;  %v7317_v59 = vshrl.u32 %v3111_v31, 7 }
 0x547   : > { %v5899_v40 = vld [vmem:[%s6771_s7 + $0x160] ss:$28 sps:$4 sm:$0xff]   ;;  %v5902_v56 = vld [vmem:[%s6771_s7 + $0x168] ss:$28 sps:$4 sm:$0xff]   ;;  %v5906_v35 = vld [vmem:[%s6771_s7 + $0x130] ss:$28 sps:$4 sm:$0xff]  }
 0x548   : > { %3441 = vmatpush1.bf16.msra.mxu0 %v5869_v6  ;;  %3524 = vmatpush1.bf16.msra.mxu1 %v5870_v22  ;;  %v3033_v53 = vld [vmem:[#allocation2 + $0x10] sm:$0xff]  ;;  %v5907_v52 = vld [vmem:[%s6771_s7 + $0xf0] ss:$28 sps:$4 sm:$0xff]   ;;  %v3035_v61 = vld [vmem:[#allocation2 + $0x28] sm:$0xff]  ;;  %v3113_v0 = vsub.s32 0, %v7317_v59  ;;  %v3121_v1 = vsub.s32 2, %v7317_v59 }
 0x549   : > { %3442 = vmatprep.subr.bf16.mxu0 %v5871_v37  ;;  %3525 = vmatprep.subr.bf16.mxu1 %v5873_v15  ;;  %v7265_v14 = vpack.c.bf16 %v3033_v53, %v3032_v27  ;;  %v5903_v57 = vld [vmem:[%s6771_s7 + $0x128] ss:$28 sps:$4 sm:$0xff]   ;;  %v5910_v21 = vld [vmem:[%s6771_s7 + $0xf8] ss:$28 sps:$4 sm:$0xff]   ;;  %v3042_v62 = vpack.c.bf16 %v3035_v61, %v3034_v55  ;;  %v5914_v26 = vld [vmem:[%s6771_s7 + $0xc0] ss:$28 sps:$4 sm:$0xff]  }
 0x54a   : > { %v5913_v58 = vld [vmem:[%s6771_s7 + $0xbc] ss:$28 sps:$4 sm:$0xff]   ;;  %v5917_v28 = vld [vmem:[%s6771_s7 + $0x84] ss:$28 sps:$4 sm:$0xff]   ;;  %v3037_v4 = vld [vmem:[#allocation2 + $0x20] sm:$0xff]  ;;  %v3125_v6 = vsub.s32 3, %v7317_v59 }
 0x54b   : > { %v5911_v23 = vld [vmem:[%s6771_s7 + $0xb8] ss:$28 sps:$4 sm:$0xff]   ;;  %v5915_v10 = vld [vmem:[%s6771_s7 + $0x80] ss:$28 sps:$4 sm:$0xff]   ;;  %v5918_v2 = vld [vmem:[%s6771_s7 + $0x88] ss:$28 sps:$4 sm:$0xff]  }
 0x54c   : > { %3443 = vmatpush1.bf16.msra.mxu0 %v5875_v60  ;;  %3526 = vmatpush1.bf16.msra.mxu1 %v5876_v9  ;;  %v3036_v25 = vld [vmem:[#allocation2 + $0x8] sm:$0xff]  ;;  %v5921_v63 = vld [vmem:[%s6771_s7 + $0x4c] ss:$28 sps:$4 sm:$0xff]   ;;  %v5925_v24 = vld [vmem:[%s6771_s7 + $0x14] ss:$28 sps:$4 sm:$0xff]   ;;  %s7786_s4 = sld [smem:[#allocation18_spill]] }
 0x54d   : > { %3444 = vmatprep.subr.bf16.mxu0 %v5877_v36  ;;  %3527 = vmatprep.subr.bf16.mxu1 %v5879_v44  ;;  %v3043_v3 = vpack.c.bf16 %v3037_v4, %v3036_v25  ;;  %v5919_v30 = vld [vmem:[%s6771_s7 + $0x48] ss:$28 sps:$4 sm:$0xff]   ;;  %v5922_v19 = vld [vmem:[%s6771_s7 + $0x50] ss:$28 sps:$4 sm:$0xff]   ;;  %v5926_v7 = vld [vmem:[%s6771_s7 + $0x18] ss:$28 sps:$4 sm:$0xff]  }
 0x54e   : > { %v3038_v29 = vld [vmem:[#allocation2 + $0x40] sm:$0xff]  ;;  %v3039_v34 = vld [vmem:[#allocation2 + $0x38] sm:$0xff]  ;;  %s4388_s0 = sshll.u32 %s6797_s15, 4  ;;  %s7787_s24 = sld [smem:[#allocation50_spill]]  ;;  %s7584_s0 = int_to_ptr.vmem [resolvable:$true] %s4388_s0 }
 0x54f   : > { %v5923_v5 = vld [vmem:[%s6771_s7 + $0x10] ss:$28 sps:$4 sm:$0xff]   ;;  %v3044_v32 = vpack.c.bf16 %v3039_v34, %v3038_v29  ;;  %s6289_s18 = scalar_lea.vmem %s7584_s0, 4480  ;;  %p7789_p0 = scmp.ne.s32.totalorder %s7732_s16, 0 }
 0x550   : > { %3445 = vmatpush1.bf16.msra.mxu0 %v5881_v47  ;;  %3528 = vmatpush1.bf16.msra.mxu1 %v5882_v38  ;;  %v7326_v17 = vld [vmem:[%s580_s27] sm:$0xff]  ;;  %p6290_p7 = scmp.ne.s32.totalorder %s7584_s0, %s6289_s18  ;;  %s6457_s21 = smov [#allocation9]  }
 0x551   : > { %3446 = vmatprep.subr.bf16.mxu0 %v5883_v48  ;;  %3529 = vmatprep.subr.bf16.mxu1 %v5885_v39  ;;  %v7331_v22 = vrot.slane %v7326_v17, %v3113_v0  ;;  %v7334_v37 = vrot.slane %v7326_v17, %v3121_v1  ;;  %v7340_v60 = vrot.slane %v7326_v17, %v3125_v6  ;;  %s6293_s23 = sshll.u32 %s6457_s21, 4  ;;  %s6294_s23 = int_to_ptr.vmem [resolvable:$false] %s6293_s23 }
 0x552   : > { %s5483_s27 = smul.u32 140, %s7786_s4  ;;  %p6291_p9 = pnand %p6290_p7, %p7789_p0 }
 0x553   : > { %s6295_s6 = scalar_lea.vmem %s6294_s23, 8960  ;;  %p6296_p5 = scmp.lt.s32.totalorder %s7584_s0, %s6294_s23 }
 0x554   : > { %3447 = vmatpush1.bf16.msra.mxu0 %v5887_v41  ;;  %3530 = vmatpush1.bf16.msra.mxu1 %v5888_v13  ;;  %s4385_s9 = sadd.s32 %s5483_s27, %s6779_s3  ;;  %s7788_s7 = smov %s7787_s24 }
 0x555   : > { %3448 = vmatprep.subr.bf16.mxu0 %v5889_v54  ;;  %3531 = vmatprep.subr.bf16.mxu1 %v5891_v43  ;;  %s4870_s19 = sshll.u32 %s4385_s9, 6  ;;  %s7590_s3 = scalar_lea.sflag [#allocation5], %s565_s14 }
 0x556   : > { %s7582_s25 = scalar_lea.hbm %s7787_s24, %s4870_s19  ;;  %p6292_p8 = pneg %p6291_p9 }
 0x557   : > { %p6297_p3 = scmp.lt.s32.totalorder %s6295_s6, %s6289_s18 }
 0x558   : > { %3449 = vmatpush1.bf16.msra.mxu0 %v5893_v16  ;;  %3532 = vmatpush1.bf16.msra.mxu1 %v5894_v46 }
 0x559   : > { %3600 = vmatprep.subr.bf16.mxu0 %v5897_v45  ;;  %5403 = vmatprep.subr.bf16.mxu1 %v6455_v50  ;;  %p6298_p2 = por %p6297_p3, %p6296_p5 }
 0x55b   : > { %3467 = vmatmul.mubr.bf16.vlgmr.msra.gmra.mxu0 %v7251_v49  ;;  %3550 = vmatmul.mubr.bf16.vlgmr.msra.gmra.mxu1 %v7251_v49  ;;  %p6299_p4 = pnand %p6298_p2, %p6292_p8 }
 0x55c   : > { %3601 = vmatpush1.bf16.msra.mxu0 %v5895_v8  ;;  %5404 = vmatpush3.bf16.msra.mxu1 %v5898_v42 }
 0x55d   : > { %3602 = vmatprep.subr.bf16.mxu0 %v5901_v12  ;;  %3476 = vmatprep.mubr.bf16.mxu0 %v6454_v11 }
 0x55e   : > { %3559 = vmatprep.mubr.bf16.mxu1 %v6454_v11  ;;  %5405 = vmatprep.subr.bf16.mxu1 %v6455_v50 }
 0x560   : > { %3603 = vmatpush1.bf16.msra.mxu0 %v5899_v40  ;;  %5406 = vmatpush3.bf16.msra.mxu1 %v5902_v56 }
 0x561   : > { %3604 = vmatprep.subr.bf16.mxu0 %v5905_v20  ;;  %5407 = vmatprep.subr.bf16.mxu1 %v6455_v50 }
 0x563   : > { %3477 = vmatmul.mubr.bf16.gmra.mxu0 %v7265_v14  ;;  %3560 = vmatmul.mubr.bf16.gmra.mxu1 %v7265_v14 }
 0x564   : > { %3605 = vmatpush1.bf16.msra.mxu0 %v5903_v57  ;;  %5408 = vmatpush3.bf16.msra.mxu1 %v5906_v35 }
 0x565   : > { %3486 = vmatprep.mubr.bf16.mxu0 %v6454_v11  ;;  %3569 = vmatprep.mubr.bf16.mxu1 %v6454_v11 }
 0x566   : > { %3606 = vmatprep.subr.bf16.mxu0 %v5909_v51  ;;  %5409 = vmatprep.subr.bf16.mxu1 %v6455_v50 }
 0x568   : > { %3607 = vmatpush1.bf16.msra.mxu0 %v5907_v52  ;;  %5410 = vmatpush3.bf16.msra.mxu1 %v5910_v21 }
 0x569   : > { %3608 = vmatprep.subr.bf16.mxu0 %v5913_v58  ;;  %5411 = vmatprep.subr.bf16.mxu1 %v6455_v50 }
 0x56b   : > { %3487 = vmatmul.mubr.bf16.gmra.mxu0 %v3042_v62  ;;  %3570 = vmatmul.mubr.bf16.gmra.mxu1 %v3042_v62 }
 0x56c   : > { %3609 = vmatpush1.bf16.msra.mxu0 %v5911_v23  ;;  %3496 = vmatprep.mubr.bf16.mxu0 %v6454_v11 }
 0x56d   : > { %3579 = vmatprep.mubr.bf16.mxu1 %v6454_v11  ;;  %5412 = vmatpush3.bf16.msra.mxu1 %v5914_v26 }
 0x56e   : > { %3610 = vmatprep.subr.bf16.mxu0 %v5917_v28  ;;  %5413 = vmatprep.subr.bf16.mxu1 %v6455_v50 }
 0x570   : > { %3611 = vmatpush1.bf16.msra.mxu0 %v5915_v10 }
 0x571   : > { %5414 = vmatpush3.bf16.msra.mxu1 %v5918_v2  ;;  %3612 = vmatprep.subr.bf16.mxu0 %v5921_v63 }
 0x572   : > { %5415 = vmatprep.subr.bf16.mxu1 %v6455_v50 }
 0x573   : > { %3497 = vmatmul.mubr.bf16.gmra.mxu0 %v3043_v3  ;;  %3580 = vmatmul.mubr.bf16.gmra.mxu1 %v3043_v3 }
 0x574   : > { %3506 = vmatprep.mubr.bf16.mxu0 %v6454_v11  ;;  %3589 = vmatprep.mubr.bf16.mxu1 %v6454_v11 }
 0x575   : > { %3613 = vmatpush1.bf16.msra.mxu0 %v5919_v30  ;;  %5416 = vmatpush3.bf16.msra.mxu1 %v5922_v19 }
 0x576   : > { %3614 = vmatprep.subr.bf16.mxu0 %v5925_v24  ;;  %5417 = vmatprep.subr.bf16.mxu1 %v6455_v50 }
 0x579   : > { %3615 = vmatpush1.bf16.msra.mxu0 %v5923_v5  ;;  %5418 = vmatpush3.bf16.msra.mxu1 %v5926_v7 }
 0x57b   : > { %3507 = vmatmul.mubr.bf16.gmra.mxu0 %v3044_v32  ;;  %3590 = vmatmul.mubr.bf16.gmra.mxu1 %v3044_v32 }
 0x57c   : > { %3632 = vmatprep.mubr.bf16.mxu0 %v6454_v11  ;;  %5419 = vmatprep.mubr.msk.bf16.mxu1 %vm6456_vm3, %v6455_v50 }
 0x583   : > { %3633 = vmatmul.mubr.bf16.vlgmr.msra.gmra.mxu0 %v7251_v49  ;;  %5420 = vmatmul.mubr.bf16.vlgmr.msra.gmra.mxu1 %v7251_v49 }
 0x584   : > { %3642 = vmatprep.mubr.bf16.mxu0 %v6454_v11  ;;  %5423 = vmatprep.mubr.msk.bf16.mxu1 %vm6456_vm3, %v6455_v50 }
 0x58b   : > { %3643 = vmatmul.mubr.bf16.gmra.mxu0 %v7265_v14  ;;  %5424 = vmatmul.mubr.bf16.gmra.mxu1 %v7265_v14 }
 0x58c   : > { %3652 = vmatprep.mubr.bf16.mxu0 %v6454_v11  ;;  %5427 = vmatprep.mubr.msk.bf16.mxu1 %vm6456_vm3, %v6455_v50 }
 0x593   : > { %3653 = vmatmul.mubr.bf16.gmra.mxu0 %v3042_v62  ;;  %5428 = vmatmul.mubr.bf16.gmra.mxu1 %v3042_v62 }
 0x594   : > { %3662 = vmatprep.mubr.bf16.mxu0 %v6454_v11  ;;  %5431 = vmatprep.mubr.msk.bf16.mxu1 %vm6456_vm3, %v6455_v50 }
 0x59b   : > { %3663 = vmatmul.mubr.bf16.gmra.mxu0 %v3043_v3  ;;  %5432 = vmatmul.mubr.bf16.gmra.mxu1 %v3043_v3 }
 0x59c   : > { %3672 = vmatprep.mubr.bf16.mxu0 %v6454_v11  ;;  %5435 = vmatprep.mubr.msk.bf16.mxu1 %vm6456_vm3, %v6455_v50  ;;  %v3117_v11 = vsub.s32 1, %v7317_v59 }
 0x59e   : > { %v7337_v15 = vrot.slane %v7326_v17, %v3117_v11 }
 0x5a3   : > { %3673 = vmatmul.mubr.bf16.gmra.mxu0 %v3044_v32  ;;  %5436 = vmatmul.mubr.bf16.gmra.mxu1 %v3044_v32 }
 0x61b   : > { %v3468_v9 = vpop.f32.mrf.mxu0  ;;  %v3551_v36 = vpop.f32.mrf.mxu1 }
 0x61c   : > { %v3469_v44 = vadd.f32 %v3468_v9, %v7331_v22  ;;  %v3552_v47 = vadd.f32 %v3551_v36, %v7334_v37 }
 0x61d   : > { %v3470_v38 = vpop.f32.mrf.mxu0  ;;  %v3553_v48 = vpop.f32.mrf.mxu1 }
 0x61e   : > { %v3756_v39 = vsub.f32 0.0, %v3469_v44  ;;  %v3758_v41 = vsub.f32 0.0, %v3552_v47  ;;  %v3471_v13 = vadd.f32 %v3470_v38, %v7337_v15  ;;  %v3554_v54 = vadd.f32 %v3553_v48, %v7340_v60 }
 0x61f   : > { %v3472_v43 = vpop.f32.mrf.mxu0  ;;  %v3555_v16 = vpop.f32.mrf.mxu1 }
 0x620   : > { %v3826_v46 = vmul.f32 1.442695, %v3756_v39  ;;  %v3830_v33 = vmul.f32 1.442695, %v3758_v41  ;;  %v3757_v18 = vsub.f32 0.0, %v3471_v13  ;;  %v3759_v45 = vsub.f32 0.0, %v3554_v54 }
 0x621   : > { %v3473_v49 = vadd.f32 %v3472_v43, %v7331_v22  ;;  %v3556_v8 = vadd.f32 %v3555_v16, %v7334_v37  ;;  %v3474_v42 = vpop.f32.mrf.mxu0  ;;  %v3557_v50 = vpop.f32.mrf.mxu1 }
 0x622   : > { %5927 = vpow2.f32 %v3826_v46  ;;  %v3828_v12 = vmul.f32 1.442695, %v3757_v18  ;;  %v3832_v40 = vmul.f32 1.442695, %v3759_v45  ;;  %v3475_v27 = vadd.f32 %v3474_v42, %v7337_v15 }
 0x623   : > { %5929 = vpow2.f32 %v3830_v33  ;;  %v3763_v53 = vsub.f32 0.0, %v3473_v49  ;;  %v3765_v56 = vsub.f32 0.0, %v3556_v8  ;;  %v3558_v20 = vadd.f32 %v3557_v50, %v7340_v60  ;;  %v3478_v14 = vpop.f32.mrf.mxu0  ;;  %v3561_v57 = vpop.f32.mrf.mxu1 }
 0x624   : > { %5931 = vpow2.f32 %v3828_v12  ;;  %v3764_v35 = vsub.f32 0.0, %v3475_v27  ;;  %v3479_v51 = vadd.f32 %v3478_v14, %v7331_v22  ;;  %v3562_v52 = vadd.f32 %v3561_v57, %v7334_v37 }
 0x625   : > { %5933 = vpow2.f32 %v3832_v40  ;;  %v3840_v55 = vmul.f32 1.442695, %v3763_v53  ;;  %v3844_v61 = vmul.f32 1.442695, %v3765_v56  ;;  %v3766_v21 = vsub.f32 0.0, %v3558_v20  ;;  %v3480_v58 = vpop.f32.mrf.mxu0  ;;  %v3563_v62 = vpop.f32.mrf.mxu1 }
 0x626   : > { %v3842_v23 = vmul.f32 1.442695, %v3764_v35  ;;  %v3770_v26 = vsub.f32 0.0, %v3479_v51  ;;  %v3772_v28 = vsub.f32 0.0, %v3562_v52  ;;  %v3481_v25 = vadd.f32 %v3480_v58, %v7337_v15 }
 0x627   : > { %5935 = vpow2.f32 %v3840_v55  ;;  %v3846_v4 = vmul.f32 1.442695, %v3766_v21  ;;  %v3564_v10 = vadd.f32 %v3563_v62, %v7340_v60  ;;  %v3482_v2 = vpop.f32.mrf.mxu0  ;;  %v3565_v63 = vpop.f32.mrf.mxu1 }
 0x628   : > { %5937 = vpow2.f32 %v3844_v61  ;;  %v3854_v3 = vmul.f32 1.442695, %v3770_v26  ;;  %v3858_v30 = vmul.f32 1.442695, %v3772_v28  ;;  %v3771_v19 = vsub.f32 0.0, %v3481_v25 }
 0x629   : > { %5939 = vpow2.f32 %v3842_v23  ;;  %v3773_v24 = vsub.f32 0.0, %v3564_v10  ;;  %v3483_v29 = vadd.f32 %v3482_v2, %v7331_v22  ;;  %v3566_v34 = vadd.f32 %v3565_v63, %v7334_v37  ;;  %v3484_v5 = vpop.f32.mrf.mxu0  ;;  %v3567_v7 = vpop.f32.mrf.mxu1 }
 0x62a   : > { %5941 = vpow2.f32 %v3846_v4  ;;  %v3856_v32 = vmul.f32 1.442695, %v3771_v19  ;;  %v3485_v31 = vadd.f32 %v3484_v5, %v7337_v15  ;;  %v3568_v0 = vadd.f32 %v3567_v7, %v7340_v60 }
 0x62b   : > { %5943 = vpow2.f32 %v3854_v3  ;;  %v3860_v1 = vmul.f32 1.442695, %v3773_v24  ;;  %v3777_v11 = vsub.f32 0.0, %v3483_v29  ;;  %v3779_v6 = vsub.f32 0.0, %v3566_v34  ;;  %v3488_v9 = vpop.f32.mrf.mxu0  ;;  %v3571_v36 = vpop.f32.mrf.mxu1 }
 0x62c   : > { %5945 = vpow2.f32 %v3858_v30  ;;  %v3778_v44 = vsub.f32 0.0, %v3485_v31  ;;  %v3780_v13 = vsub.f32 0.0, %v3568_v0  ;;  %v3489_v27 = vadd.f32 %v3488_v9, %v7331_v22 }
 0x62d   : > { %5947 = vpow2.f32 %v3856_v32  ;;  %v3868_v47 = vmul.f32 1.442695, %v3777_v11  ;;  %v3872_v38 = vmul.f32 1.442695, %v3779_v6  ;;  %v3490_v48 = vpop.f32.mrf.mxu0  ;;  %v3573_v39 = vpop.f32.mrf.mxu1  ;;  %v3572_v61 = vadd.f32 %v3571_v36, %v7334_v37 }
 0x62e   : > { %5949 = vpow2.f32 %v3860_v1  ;;  %v3870_v41 = vmul.f32 1.442695, %v3778_v44  ;;  %v3874_v12 = vmul.f32 1.442695, %v3780_v13  ;;  %v3784_v62 = vsub.f32 0.0, %v3489_v27 }
 0x62f   : > { %v5928_v54 = vpop.eup %5927  ;;  %5951 = vpow2.f32 %v3868_v47  ;;  %v3492_v43 = vpop.f32.mrf.mxu0  ;;  %v3491_v23 = vadd.f32 %v3490_v48, %v7337_v15  ;;  %v3574_v10 = vadd.f32 %v3573_v39, %v7340_v60  ;;  %v3786_v5 = vsub.f32 0.0, %v3572_v61 }
 0x630   : > { %v3575_v16 = vpop.f32.mrf.mxu1  ;;  %v5930_v46 = vpop.eup %5929  ;;  %v3966_v33 = vadd.f32 1.0, %v5928_v54  ;;  %5953 = vpow2.f32 %v3872_v38  ;;  %v3493_v2 = vadd.f32 %v3492_v43, %v7331_v22  ;;  %v3882_v31 = vmul.f32 1.442695, %v3784_v62 }
 0x631   : > { %v5932_v18 = vpop.eup %5931  ;;  %v3968_v45 = vadd.f32 1.0, %v5930_v46  ;;  %5955 = vpow2.f32 %v3870_v41  ;;  %v3494_v49 = vpop.f32.mrf.mxu0  ;;  %v3576_v30 = vadd.f32 %v3575_v16, %v7334_v37  ;;  %v3785_v0 = vsub.f32 0.0, %v3491_v23 }
 0x632   : > { %v7358_v8 = vpop.f32.mrf.mxu1  ;;  %v5934_v42 = vpop.eup %5933  ;;  %5957 = vrcp.f32 %v3966_v33  ;;  %v3967_v50 = vadd.f32 1.0, %v5932_v18  ;;  %v3787_v36 = vsub.f32 0.0, %v3574_v10  ;;  %v3791_v44 = vsub.f32 0.0, %v3493_v2 }
 0x633   : > { %5959 = vrcp.f32 %v3968_v45  ;;  %v3969_v40 = vadd.f32 1.0, %v5934_v42  ;;  %v7361_v53 = vpop.f32.mrf.mxu0  ;;  %v3793_v48 = vsub.f32 0.0, %v3576_v30  ;;  %v3495_v39 = vadd.f32 %v3494_v49, %v7337_v15 }
 0x634   : > { %v7363_v56 = vpop.f32.mrf.mxu1  ;;  %v5936_v20 = vpop.eup %5935  ;;  %5961 = vrcp.f32 %v3967_v50  ;;  %v3886_v16 = vmul.f32 1.442695, %v3786_v5  ;;  %v3578_v46 = vadd.f32 %v7358_v8, %v7340_v60  ;;  %v3884_v45 = vmul.f32 1.442695, %v3785_v0 }
 0x635   : > { %v5938_v14 = vpop.eup %5937  ;;  %5963 = vrcp.f32 %v3969_v40  ;;  %v3973_v57 = vadd.f32 1.0, %v5936_v20  ;;  %v7365_v35 = vpop.f32.mrf.mxu0  ;;  %v3499_v42 = vadd.f32 %v7361_v53, %v7331_v22  ;;  %v3896_v40 = vmul.f32 1.442695, %v3791_v44 }
 0x636   : > { %v7367_v51 = vpop.f32.mrf.mxu1  ;;  %v5940_v52 = vpop.eup %5939  ;;  %v3975_v55 = vadd.f32 1.0, %v5938_v14  ;;  %5965 = vpow2.f32 %v3874_v12  ;;  %v3888_v12 = vmul.f32 1.442695, %v3787_v36  ;;  %v3582_v27 = vadd.f32 %v7363_v56, %v7334_v37 }
 0x637   : > { %v5942_v21 = vpop.eup %5941  ;;  %5967 = vrcp.f32 %v3973_v57  ;;  %v3974_v58 = vadd.f32 1.0, %v5940_v52  ;;  %v7371_v26 = vpop.f32.mrf.mxu0  ;;  %v3900_v14 = vmul.f32 1.442695, %v3793_v48  ;;  %v3792_v8 = vsub.f32 0.0, %v3495_v39 }
 0x638   : > { %v7373_v28 = vpop.f32.mrf.mxu1  ;;  %v5944_v25 = vpop.eup %5943  ;;  %5969 = vrcp.f32 %v3975_v55  ;;  %v3976_v4 = vadd.f32 1.0, %v5942_v21  ;;  %v3501_v57 = vadd.f32 %v7365_v35, %v7337_v15  ;;  %v3794_v21 = vsub.f32 0.0, %v3578_v46 }
 0x639   : > { %v5946_v63 = vpop.eup %5945  ;;  %5971 = vrcp.f32 %v3974_v58  ;;  %v3980_v3 = vadd.f32 1.0, %v5944_v25  ;;  %v7378_v19 = vpop.f32.mrf.mxu0  ;;  %v3584_v56 = vadd.f32 %v7367_v51, %v7340_v60  ;;  %v3798_v23 = vsub.f32 0.0, %v3499_v42 }
 0x63a   : > { %v7380_v24 = vpop.f32.mrf.mxu1  ;;  %v5948_v29 = vpop.eup %5947  ;;  %5973 = vrcp.f32 %v3976_v4  ;;  %v3982_v34 = vadd.f32 1.0, %v5946_v63  ;;  %v3503_v25 = vadd.f32 %v7371_v26, %v7331_v22  ;;  %v3800_v2 = vsub.f32 0.0, %v3582_v27 }
 0x63b   : > { %v5950_v7 = vpop.eup %5949  ;;  %5975 = vrcp.f32 %v3980_v3  ;;  %v3981_v32 = vadd.f32 1.0, %v5948_v29  ;;  %v7382_v1 = vpop.f32.mrf.mxu0  ;;  %v3586_v63 = vadd.f32 %v7373_v28, %v7334_v37  ;;  %v3898_v51 = vmul.f32 1.442695, %v3792_v8 }
 0x63c   : > { %v7384_v11 = vpop.f32.mrf.mxu1  ;;  %v5952_v6 = vpop.eup %5951  ;;  %5977 = vrcp.f32 %v3982_v34  ;;  %v3983_v9 = vadd.f32 1.0, %v5950_v7  ;;  %v3799_v30 = vsub.f32 0.0, %v3501_v57  ;;  %v3505_v29 = vadd.f32 %v7378_v19, %v7337_v15 }
 0x63d   : > { %v5954_v47 = vpop.eup %5953  ;;  %5979 = vrcp.f32 %v3981_v32  ;;  %v3987_v38 = vadd.f32 1.0, %v5952_v6  ;;  %v7387_v41 = vpop.f32.mrf.mxu0  ;;  %v3902_v7 = vmul.f32 1.442695, %v3794_v21  ;;  %v3801_v32 = vsub.f32 0.0, %v3584_v56 }
 0x63e   : > { %v7389_v13 = vpop.f32.mrf.mxu1  ;;  %v5956_v54 = vpop.eup %5955  ;;  %5981 = vrcp.f32 %v3983_v9  ;;  %v3989_v43 = vadd.f32 1.0, %v5954_v47  ;;  %v3910_v28 = vmul.f32 1.442695, %v3798_v23  ;;  %v3805_v6 = vsub.f32 0.0, %v3503_v25 }
 0x63f   : > { %v5958_v33 = vpop.eup %5957  ;;  %5983 = vrcp.f32 %v3987_v38  ;;  %v3988_v18 = vadd.f32 1.0, %v5956_v54  ;;  %v7401_v52 = vpop.f32.mrf.mxu0  ;;  %v3914_v19 = vmul.f32 1.442695, %v3800_v2  ;;  %v3807_v47 = vsub.f32 0.0, %v3586_v63 }
 0x640   : > { %v7395_v50 = vpop.f32.mrf.mxu1  ;;  %v5960_v49 = vpop.eup %5959  ;;  %5985 = vrcp.f32 %v3989_v43  ;;  %v3912_v48 = vmul.f32 1.442695, %v3799_v30  ;;  %v3806_v39 = vsub.f32 0.0, %v3505_v29  ;;  %v3916_v46 = vmul.f32 1.442695, %v3801_v32 }
 0x641   : > { %v5962_v20 = vpop.eup %5961  ;;  %5987 = vrcp.f32 %v3988_v18  ;;  %v7417_v34 = vpop.f32.mrf.mxu0  ;;  %v3924_v42 = vmul.f32 1.442695, %v3805_v6  ;;  %v3928_v27 = vmul.f32 1.442695, %v3807_v47  ;;  %v3137_v6 = vsub.s32 6, %v7317_v59 }
 0x642   : > { %v7403_v53 = vpop.f32.mrf.mxu1  ;;  %v5964_v55 = vpop.eup %5963  ;;  %v4874_v61 = vpack.c.bf16 %v5962_v20, %v5958_v33  ;;  %5989 = vpow2.f32 %v3882_v31  ;;  %v3588_v33 = vadd.f32 %v7380_v24, %v7340_v60 }
 0x643   : > { %v5966_v58 = vpop.eup %5965  ;;  %v4875_v62 = vpack.c.bf16 %v5964_v55, %v5960_v49  ;;  %5991 = vpow2.f32 %v3886_v16  ;;  %v7422_v54 = vpop.f32.mrf.mxu0 }
 0x644   : > { %v7409_v35 = vpop.f32.mrf.mxu1  ;;  %v5968_v4 = vpop.eup %5967  ;;  %4326 = vst [vmem:[%s6797_s15] sm:$0xff] %v4874_v61  ;;  %v3990_v10 = vadd.f32 1.0, %v5966_v58  ;;  %5993 = vpow2.f32 %v3884_v45  ;;  %v3808_v55 = vsub.f32 0.0, %v3588_v33 }
 0x645   : > { %v5970_v3 = vpop.eup %5969  ;;  %4327 = vst [vmem:[%s6797_s15 + $0x8] sm:$0xff] %v4875_v62  ;;  %5995 = vpow2.f32 %v3888_v12  ;;  %v7430_v8 = vpop.f32.mrf.mxu0 }
 0x646   : > { %v5421_v26 = vpop.f32.mrf.mxu1  ;;  %v5972_v5 = vpop.eup %5971  ;;  %5997 = vrcp.f32 %v3990_v10 }
 0x647   : > { %v5974_v31 = vpop.eup %5973  ;;  %v4878_v0 = vpack.c.bf16 %v5972_v5, %v5968_v4  ;;  %5999 = vpow2.f32 %v3896_v40  ;;  %v3129_v4 = vsub.s32 4, %v7317_v59  ;;  %v7437_v10 = vpop.f32.mrf.mxu0  ;;  %v3509_v26 = vadd.f32 %v7382_v1, %v7331_v22 }
 0x648   : > { %v7419_v9 = vpop.f32.mrf.mxu1  ;;  %v5976_v36 = vpop.eup %5975  ;;  %v4879_v44 = vpack.c.bf16 %v5974_v31, %v5970_v3  ;;  %6001 = vpow2.f32 %v3900_v14  ;;  %v3926_v14 = vmul.f32 1.442695, %v3806_v39  ;;  %v3592_v1 = vadd.f32 %v7384_v11, %v7334_v37 }
 0x649   : > { %v5978_v38 = vpop.eup %5977  ;;  %4330 = vst [vmem:[%s6797_s15 + $0x1c] sm:$0xff] %v4878_v0  ;;  %6003 = vpow2.f32 %v3898_v51  ;;  %v3930_v51 = vmul.f32 1.442695, %v3808_v55  ;;  %v3513_v11 = vadd.f32 %v7401_v52, %v7331_v22 }
 0x64a   : > { %v5422_v43 = vpop.f32.mrf.mxu1  ;;  %v5980_v16 = vpop.eup %5979  ;;  %4331 = vst [vmem:[%s6797_s15 + $0x24] sm:$0xff] %v4879_v44  ;;  %6005 = vpow2.f32 %v3902_v7 }
 0x64b   : > { %v5982_v18 = vpop.eup %5981  ;;  %v4882_v45 = vpack.c.bf16 %v5980_v16, %v5976_v36  ;;  %6007 = vpow2.f32 %v3910_v28  ;;  %v7444_v28 = vrot.slane %v7326_v17, %v3129_v4  ;;  %v7447_v36 = vpop.f32.mrf.mxu0  ;;  %v3812_v43 = vsub.f32 0.0, %v3509_v26 }
 0x64c   : > { %v7427_v49 = vpop.f32.mrf.mxu1  ;;  %v5984_v12 = vpop.eup %5983  ;;  %v4883_v40 = vpack.c.bf16 %v5982_v18, %v5978_v38  ;;  %6009 = vpow2.f32 %v3914_v19  ;;  %v3133_v38 = vsub.s32 5, %v7317_v59  ;;  %v3511_v16 = vadd.f32 %v7387_v41, %v7337_v15 }
 0x64d   : > { %v5986_v20 = vpop.eup %5985  ;;  %4334 = vst [vmem:[%s6797_s15 + $0x38] sm:$0xff] %v4882_v45  ;;  %6011 = vpow2.f32 %v3912_v48  ;;  %v3594_v45 = vadd.f32 %v7389_v13, %v7340_v60  ;;  %v7466_v41 = vpop.f32.mrf.mxu0 }
 0x64e   : > { %v5425_v57 = vpop.f32.mrf.mxu1  ;;  %v5988_v24 = vpop.eup %5987  ;;  %4335 = vst [vmem:[%s6797_s15 + $0x40] sm:$0xff] %v4883_v40  ;;  %6013 = vpow2.f32 %v3916_v46  ;;  %v7464_v40 = vrot.slane %v7326_v17, %v3137_v6  ;;  %v7469_v13 = vrot.slane %v7326_v17, %v3133_v38  ;;  %v3813_v55 = vsub.f32 0.0, %v3511_v16 }
 0x64f   : > { %v5990_v61 = vpop.eup %5989  ;;  %v4886_v21 = vpack.c.bf16 %v5988_v24, %v5984_v12  ;;  %6015 = vpow2.f32 %v3924_v42  ;;  %v3596_v12 = vadd.f32 %v7395_v50, %v7334_v37  ;;  %v3814_v57 = vsub.f32 0.0, %v3592_v1  ;;  %v7475_v4 = vpop.f32.mrf.mxu0 }
 0x650   : > { %v7433_v56 = vpop.f32.mrf.mxu1  ;;  %v5992_v58 = vpop.eup %5991  ;;  %v3994_v62 = vadd.f32 1.0, %v5990_v61  ;;  %6017 = vpow2.f32 %v3928_v27  ;;  %v3938_v24 = vmul.f32 1.442695, %v3812_v43  ;;  %v3515_v17 = vadd.f32 %v7417_v34, %v7337_v15 }
 0x651   : > { %v5994_v23 = vpop.eup %5993  ;;  %4338 = vst [vmem:[%s6797_s15 + $0x54] sm:$0xff] %v4886_v21  ;;  %v3996_v25 = vadd.f32 1.0, %v5992_v58  ;;  %6019 = vpow2.f32 %v3926_v14  ;;  %v3815_v21 = vsub.f32 0.0, %v3594_v45  ;;  %v3819_v58 = vsub.f32 0.0, %v3513_v11 }
 0x652   : > { %v5426_v2 = vpop.f32.mrf.mxu1  ;;  %v5996_v63 = vpop.eup %5995  ;;  %6021 = vrcp.f32 %v3994_v62  ;;  %v3995_v3 = vadd.f32 1.0, %v5994_v23  ;;  %v3718_v6 = vadd.f32 %v7409_v35, %v7464_v40 }
 0x653   : > { %v5998_v30 = vpop.eup %5997  ;;  %6023 = vrcp.f32 %v3996_v25  ;;  %v3997_v29 = vadd.f32 1.0, %v5996_v63  ;;  %v3821_v25 = vsub.f32 0.0, %v3596_v12  ;;  %v3944_v34 = vmul.f32 1.442695, %v3815_v21 }
 0x654   : > { %v7441_v5 = vpop.f32.mrf.mxu1  ;;  %v6000_v7 = vpop.eup %5999  ;;  %v4887_v32 = vpack.c.bf16 %v5998_v30, %v5986_v20  ;;  %6025 = vrcp.f32 %v3995_v3  ;;  %v3598_v30 = vadd.f32 %v7403_v53, %v7340_v60  ;;  %v3820_v60 = vsub.f32 0.0, %v3515_v17 }
 0x655   : > { %v6002_v31 = vpop.eup %6001  ;;  %6027 = vrcp.f32 %v3997_v29  ;;  %v4001_v0 = vadd.f32 1.0, %v6000_v7  ;;  %v3940_v7 = vmul.f32 1.442695, %v3813_v55  ;;  %v3637_v53 = vadd.f32 %v7430_v8, %v7469_v13 }
 0x656   : > { %v5429_v44 = vpop.f32.mrf.mxu1  ;;  %v6004_v19 = vpop.eup %6003  ;;  %4339 = vst [vmem:[%s6797_s15 + $0x5c] sm:$0xff] %v4887_v32  ;;  %v4003_v47 = vadd.f32 1.0, %v6002_v31  ;;  %6029 = vpow2.f32 %v3930_v51  ;;  %v3942_v51 = vmul.f32 1.442695, %v3814_v57  ;;  %v3635_v32 = vadd.f32 %v7422_v54, %v7444_v28 }
 0x657   : > { %v6006_v48 = vpop.eup %6005  ;;  %6031 = vrcp.f32 %v4001_v0  ;;  %v4002_v39 = vadd.f32 1.0, %v6004_v19  ;;  %v3952_v0 = vmul.f32 1.442695, %v3819_v58  ;;  %v3956_v19 = vmul.f32 1.442695, %v3821_v25 }
 0x658   : > { %v7455_v46 = vpop.f32.mrf.mxu1  ;;  %v6008_v33 = vpop.eup %6007  ;;  %6033 = vrcp.f32 %v4003_v47  ;;  %v4004_v18 = vadd.f32 1.0, %v6006_v48  ;;  %v3822_v48 = vsub.f32 0.0, %v3598_v30  ;;  %v3760_v16 = vsub.f32 0.0, %v3635_v32 }
 0x659   : > { %v6010_v42 = vpop.eup %6009  ;;  %6035 = vrcp.f32 %v4002_v39  ;;  %v4008_v59 = vadd.f32 1.0, %v6008_v33  ;;  %v7487_v47 = vpop.f32.mrf.mxu0  ;;  %v3639_v39 = vadd.f32 %v7437_v10, %v7444_v28  ;;  %v3721_v33 = vadd.f32 %v7419_v9, %v7464_v40 }
 0x65a   : > { %v5430_v27 = vpop.f32.mrf.mxu1  ;;  %v6012_v20 = vpop.eup %6011  ;;  %6037 = vrcp.f32 %v4004_v18  ;;  %v4010_v14 = vadd.f32 1.0, %v6010_v42  ;;  %v3762_v11 = vsub.f32 0.0, %v3718_v6  ;;  %v3641_v42 = vadd.f32 %v7447_v36, %v7469_v13 }
 0x65b   : > { %v6014_v22 = vpop.eup %6013  ;;  %6039 = vrcp.f32 %v4008_v59  ;;  %v4009_v52 = vadd.f32 1.0, %v6012_v20  ;;  %v3954_v10 = vmul.f32 1.442695, %v3820_v60  ;;  %v3761_v12 = vsub.f32 0.0, %v3637_v53  ;;  %v7501_v20 = vpop.f32.mrf.mxu0 }
 0x65c   : > { %v7471_v61 = vpop.f32.mrf.mxu1  ;;  %v6016_v37 = vpop.eup %6015  ;;  %6041 = vrcp.f32 %v4010_v14  ;;  %v4011_v50 = vadd.f32 1.0, %v6014_v22  ;;  %v3645_v27 = vadd.f32 %v7466_v41, %v7444_v28  ;;  %v3958_v57 = vmul.f32 1.442695, %v3822_v48 }
 0x65d   : > { %v6018_v62 = vpop.eup %6017  ;;  %6043 = vrcp.f32 %v4009_v52  ;;  %v4015_v23 = vadd.f32 1.0, %v6016_v37  ;;  %v3767_v22 = vsub.f32 0.0, %v3639_v39  ;;  %v3834_v36 = vmul.f32 1.442695, %v3760_v16  ;;  %v7506_v17 = vpop.f32.mrf.mxu0 }
 0x65e   : > { %v5433_v2 = vpop.f32.mrf.mxu1  ;;  %v6020_v63 = vpop.eup %6019  ;;  %6045 = vrcp.f32 %v4011_v50  ;;  %v4017_v3 = vadd.f32 1.0, %v6018_v62  ;;  %v3769_v55 = vsub.f32 0.0, %v3721_v33  ;;  %v3838_v41 = vmul.f32 1.442695, %v3762_v11 }
 0x65f   : > { %v6022_v29 = vpop.eup %6021  ;;  %6047 = vrcp.f32 %v4015_v23  ;;  %v4016_v26 = vadd.f32 1.0, %v6020_v63  ;;  %v3768_v58 = vsub.f32 0.0, %v3641_v42  ;;  %v3836_v23 = vmul.f32 1.442695, %v3761_v12  ;;  %v7512_v6 = vpop.f32.mrf.mxu0 }
 0x660   : > { %v7481_v31 = vpop.f32.mrf.mxu1  ;;  %v6024_v15 = vpop.eup %6023  ;;  %6049 = vrcp.f32 %v4017_v3  ;;  %v3774_v25 = vsub.f32 0.0, %v3645_v27  ;;  %v3848_v3 = vmul.f32 1.442695, %v3767_v22 }
 0x661   : > { %v6026_v44 = vpop.eup %6025  ;;  %6051 = vrcp.f32 %v4016_v26  ;;  %v3852_v26 = vmul.f32 1.442695, %v3769_v55  ;;  %v3658_v48 = vpop.f32.mrf.mxu0 }
 0x662   : > { %v5434_v54 = vpop.f32.mrf.mxu1  ;;  %v6028_v1 = vpop.eup %6027  ;;  %v4890_v38 = vpack.c.bf16 %v6026_v44, %v6022_v29  ;;  %6053 = vpow2.f32 %v3938_v24 }
 0x663   : > { %v6030_v35 = vpop.eup %6029  ;;  %v4891_v43 = vpack.c.bf16 %v6028_v1, %v6024_v15  ;;  %6055 = vpow2.f32 %v3942_v51  ;;  %v3726_v51 = vadd.f32 %v7427_v49, %v7464_v40  ;;  %v3850_v15 = vmul.f32 1.442695, %v3768_v58 }
 0x664   : > { %v7493_v18 = vpop.f32.mrf.mxu1  ;;  %v6032_v8 = vpop.eup %6031  ;;  %4342 = vst [vmem:[%s6797_s15 + $0x70] sm:$0xff] %v4890_v38  ;;  %v4018_v45 = vadd.f32 1.0, %v6030_v35  ;;  %6057 = vpow2.f32 %v3940_v7 }
 0x665   : > { %v6034_v59 = vpop.eup %6033  ;;  %4343 = vst [vmem:[%s6797_s15 + $0x78] sm:$0xff] %v4891_v43  ;;  %6059 = vpow2.f32 %v3944_v34 }
 0x666   : > { %v5437_v9 = vpop.f32.mrf.mxu1  ;;  %v6036_v14 = vpop.eup %6035  ;;  %6061 = vrcp.f32 %v4018_v45 }
 0x667   : > { %v6038_v52 = vpop.eup %6037  ;;  %v4894_v24 = vpack.c.bf16 %v6036_v14, %v6032_v8  ;;  %6063 = vpow2.f32 %v3952_v0  ;;  %v3862_v0 = vmul.f32 1.442695, %v3774_v25  ;;  %v3647_v8 = vadd.f32 %v7475_v4, %v7469_v13 }
 0x668   : > { %v7503_v37 = vpop.f32.mrf.mxu1  ;;  %v6040_v50 = vpop.eup %6039  ;;  %v4895_v21 = vpack.c.bf16 %v6038_v52, %v6034_v59  ;;  %6065 = vpow2.f32 %v3956_v19  ;;  %v3776_v19 = vsub.f32 0.0, %v3726_v51  ;;  %v3649_v9 = vadd.f32 %v7487_v47, %v7444_v28 }
 0x669   : > { %v6042_v62 = vpop.eup %6041  ;;  %4346 = vst [vmem:[%s6797_s15 + $0x8c] sm:$0xff] %v4894_v24  ;;  %6067 = vpow2.f32 %v3954_v10  ;;  %v3660_v10 = vpop.f32.mrf.mxu0  ;;  %v3775_v22 = vsub.f32 0.0, %v3647_v8  ;;  %v3729_v4 = vadd.f32 %v7433_v56, %v7464_v40  ;;  %v3734_v56 = vadd.f32 %v7441_v5, %v7464_v40 }
 0x66a   : > { %v5438_v2 = vpop.f32.mrf.mxu1  ;;  %v6044_v63 = vpop.eup %6043  ;;  %4347 = vst [vmem:[%s6797_s15 + $0x94] sm:$0xff] %v4895_v21  ;;  %6069 = vpow2.f32 %v3958_v57  ;;  %v3866_v43 = vmul.f32 1.442695, %v3776_v19  ;;  %v3655_v21 = vadd.f32 %v7506_v17, %v7444_v28  ;;  %v3657_v17 = vadd.f32 %v7512_v6, %v7469_v13 }
 0x66b   : > { %v6046_v30 = vpop.eup %6045  ;;  %v4898_v29 = vpack.c.bf16 %v6044_v63, %v6040_v50  ;;  %6071 = vpow2.f32 %v3834_v36  ;;  %v3651_v36 = vadd.f32 %v7501_v20, %v7469_v13  ;;  %v3664_v47 = vpop.f32.mrf.mxu0  ;;  %v3864_v2 = vmul.f32 1.442695, %v3775_v22 }
 0x66c   : > { %v6048_v7 = vpop.eup %6047  ;;  %v4899_v32 = vpack.c.bf16 %v6046_v30, %v6042_v62  ;;  %6073 = vpow2.f32 %v3838_v41  ;;  %v3781_v62 = vsub.f32 0.0, %v3649_v9  ;;  %v3783_v63 = vsub.f32 0.0, %v3729_v4 }
 0x66d   : > { %v6050_v34 = vpop.eup %6049  ;;  %4350 = vst [vmem:[%s6797_s15 + $0xa8] sm:$0xff] %v4898_v29  ;;  %6075 = vpow2.f32 %v3836_v23  ;;  %v3782_v51 = vsub.f32 0.0, %v3651_v36 }
 0x66e   : > { %v6052_v44 = vpop.eup %6051  ;;  %4351 = vst [vmem:[%s6797_s15 + $0xb0] sm:$0xff] %v4899_v32  ;;  %6077 = vpow2.f32 %v3848_v3  ;;  %v3666_v32 = vpop.f32.mrf.mxu0 }
 0x66f   : > { %v6054_v49 = vpop.eup %6053  ;;  %v4902_v60 = vpack.c.bf16 %v6052_v44, %v6048_v7  ;;  %6079 = vpow2.f32 %v3852_v26  ;;  %v3788_v26 = vsub.f32 0.0, %v3655_v21  ;;  %v3659_v7 = vadd.f32 %v3658_v48, %v7444_v28 }
 0x670   : > { %v6056_v53 = vpop.eup %6055  ;;  %v4022_v54 = vadd.f32 1.0, %v6054_v49  ;;  %6081 = vpow2.f32 %v3850_v15  ;;  %v3880_v49 = vmul.f32 1.442695, %v3783_v63 }
 0x671   : > { %v6058_v1 = vpop.eup %6057  ;;  %4354 = vst [vmem:[%s6797_s15 + $0xc4] sm:$0xff] %v4902_v60  ;;  %v4024_v38 = vadd.f32 1.0, %v6056_v53  ;;  %6083 = vpow2.f32 %v3862_v0  ;;  %v3790_v0 = vsub.f32 0.0, %v3734_v56  ;;  %v3737_v60 = vadd.f32 %v7455_v46, %v7464_v40 }
 0x672   : > { %v6060_v39 = vpop.eup %6059  ;;  %6085 = vrcp.f32 %v4022_v54  ;;  %v4023_v35 = vadd.f32 1.0, %v6058_v1  ;;  %v3878_v53 = vmul.f32 1.442695, %v3782_v51  ;;  %v3789_v54 = vsub.f32 0.0, %v3657_v17 }
 0x673   : > { %v6062_v16 = vpop.eup %6061  ;;  %6087 = vrcp.f32 %v4024_v38  ;;  %v4025_v33 = vadd.f32 1.0, %v6060_v39  ;;  %v3661_v1 = vadd.f32 %v3660_v10, %v7469_v13  ;;  %v3890_v48 = vmul.f32 1.442695, %v3788_v26 }
 0x674   : > { %v6064_v45 = vpop.eup %6063  ;;  %v4903_v11 = vpack.c.bf16 %v6062_v16, %v6050_v34  ;;  %6089 = vrcp.f32 %v4023_v35  ;;  %v3876_v34 = vmul.f32 1.442695, %v3781_v62  ;;  %v3795_v39 = vsub.f32 0.0, %v3659_v7 }
 0x675   : > { %v6066_v42 = vpop.eup %6065  ;;  %6091 = vrcp.f32 %v4025_v33  ;;  %v4029_v59 = vadd.f32 1.0, %v6064_v45  ;;  %v3665_v35 = vadd.f32 %v3664_v47, %v7444_v28  ;;  %v3894_v8 = vmul.f32 1.442695, %v3790_v0 }
 0x676   : > { %v6068_v12 = vpop.eup %6067  ;;  %4355 = vst [vmem:[%s6797_s15 + $0xcc] sm:$0xff] %v4903_v11  ;;  %v4031_v27 = vadd.f32 1.0, %v6066_v42  ;;  %6093 = vpow2.f32 %v3866_v43  ;;  %v3668_v43 = vpop.f32.mrf.mxu0  ;;  %v3742_v46 = vadd.f32 %v7471_v61, %v7464_v40  ;;  %v3797_v42 = vsub.f32 0.0, %v3737_v60 }
 0x677   : > { %v6070_v14 = vpop.eup %6069  ;;  %6095 = vrcp.f32 %v4029_v59  ;;  %v4030_v57 = vadd.f32 1.0, %v6068_v12  ;;  %v3667_v59 = vadd.f32 %v3666_v32, %v7469_v13  ;;  %v3669_v9 = vadd.f32 %v3668_v43, %v7444_v28 }
 0x678   : > { %v6072_v52 = vpop.eup %6071  ;;  %6097 = vrcp.f32 %v4031_v27  ;;  %v4032_v24 = vadd.f32 1.0, %v6070_v14  ;;  %v3796_v27 = vsub.f32 0.0, %v3661_v1  ;;  %v3802_v22 = vsub.f32 0.0, %v3665_v35  ;;  %v3670_v47 = vpop.f32.mrf.mxu0 }
 0x679   : > { %v6074_v55 = vpop.eup %6073  ;;  %6099 = vrcp.f32 %v4030_v57  ;;  %v3970_v50 = vadd.f32 1.0, %v6072_v52  ;;  %v3892_v57 = vmul.f32 1.442695, %v3789_v54  ;;  %v3745_v61 = vadd.f32 %v7481_v31, %v7464_v40 }
 0x67a   : > { %v6076_v41 = vpop.eup %6075  ;;  %6101 = vrcp.f32 %v4032_v24  ;;  %v3972_v58 = vadd.f32 1.0, %v6074_v55  ;;  %v3904_v52 = vmul.f32 1.442695, %v3795_v39  ;;  %v3804_v24 = vsub.f32 0.0, %v3742_v46 }
 0x67b   : > { %v6078_v23 = vpop.eup %6077  ;;  %6103 = vrcp.f32 %v3970_v50  ;;  %v3971_v25 = vadd.f32 1.0, %v6076_v41  ;;  %v3908_v50 = vmul.f32 1.442695, %v3797_v42  ;;  %v3803_v21 = vsub.f32 0.0, %v3667_v59 }
 0x67c   : > { %v6080_v20 = vpop.eup %6079  ;;  %6105 = vrcp.f32 %v3972_v58  ;;  %v3977_v3 = vadd.f32 1.0, %v6078_v23  ;;  %v3906_v62 = vmul.f32 1.442695, %v3796_v27  ;;  %v3809_v56 = vsub.f32 0.0, %v3669_v9 }
 0x67d   : > { %v6082_v30 = vpop.eup %6081  ;;  %6107 = vrcp.f32 %v3971_v25  ;;  %v3979_v29 = vadd.f32 1.0, %v6080_v20  ;;  %v3918_v31 = vmul.f32 1.442695, %v3802_v22  ;;  %v3811_v25 = vsub.f32 0.0, %v3745_v61 }
 0x67e   : > { %v6084_v5 = vpop.eup %6083  ;;  %6109 = vrcp.f32 %v3977_v3  ;;  %v3978_v15 = vadd.f32 1.0, %v6082_v30  ;;  %v3922_v20 = vmul.f32 1.442695, %v3804_v24  ;;  %v3671_v3 = vadd.f32 %v3670_v47, %v7469_v13 }
 0x67f   : > { %v6086_v44 = vpop.eup %6085  ;;  %6111 = vrcp.f32 %v3979_v29  ;;  %v3984_v19 = vadd.f32 1.0, %v6084_v5  ;;  %v3920_v30 = vmul.f32 1.442695, %v3803_v21  ;;  %v3932_v26 = vmul.f32 1.442695, %v3809_v56 }
 0x680   : > { %v6088_v6 = vpop.eup %6087  ;;  %6113 = vrcp.f32 %v3978_v15  ;;  %v3936_v5 = vmul.f32 1.442695, %v3811_v25  ;;  %v3674_v15 = vpop.f32.mrf.mxu0 }
 0x681   : > { %v6090_v38 = vpop.eup %6089  ;;  %6115 = vrcp.f32 %v3984_v19  ;;  %v3675_v42 = vadd.f32 %v3674_v15, %v7444_v28 }
 0x682   : > { %v6092_v16 = vpop.eup %6091  ;;  %v4906_v33 = vpack.c.bf16 %v6090_v38, %v6086_v44  ;;  %6117 = vpow2.f32 %v3864_v2  ;;  %v3810_v44 = vsub.f32 0.0, %v3671_v3  ;;  %v3676_v54 = vpop.f32.mrf.mxu0 }
 0x683   : > { %v6094_v45 = vpop.eup %6093  ;;  %v4907_v11 = vpack.c.bf16 %v6092_v16, %v6088_v6  ;;  %6119 = vpow2.f32 %v3876_v34 }
 0x684   : > { %v6096_v10 = vpop.eup %6095  ;;  %4358 = vst [vmem:[%s6797_s15 + $0xe0] sm:$0xff] %v4906_v33  ;;  %v3986_v12 = vadd.f32 1.0, %v6094_v45  ;;  %6121 = vpow2.f32 %v3880_v49  ;;  %v3678_v46 = vpop.f32.mrf.mxu0 }
 0x685   : > { %v6098_v14 = vpop.eup %6097  ;;  %4359 = vst [vmem:[%s6797_s15 + $0xe8] sm:$0xff] %v4907_v11  ;;  %6123 = vpow2.f32 %v3878_v53  ;;  %v3679_v61 = vadd.f32 %v3678_v46, %v7444_v28 }
 0x686   : > { %v6100_v4 = vpop.eup %6099  ;;  %6125 = vrcp.f32 %v3986_v12  ;;  %v3750_v12 = vadd.f32 %v7493_v18, %v7464_v40  ;;  %v3753_v18 = vadd.f32 %v7503_v37, %v7464_v40 }
 0x687   : > { %v6102_v36 = vpop.eup %6101  ;;  %v4910_v55 = vpack.c.bf16 %v6100_v4, %v6096_v10  ;;  %6127 = vpow2.f32 %v3890_v48  ;;  %v3934_v48 = vmul.f32 1.442695, %v3810_v44  ;;  %v3680_v4 = vpop.f32.mrf.mxu0 }
 0x688   : > { %v6104_v41 = vpop.eup %6103  ;;  %v4911_v58 = vpack.c.bf16 %v6102_v36, %v6098_v14  ;;  %6129 = vpow2.f32 %v3894_v8  ;;  %v3677_v14 = vadd.f32 %v3676_v54, %v7469_v13  ;;  %v3816_v36 = vsub.f32 0.0, %v3675_v42 }
 0x689   : > { %v6106_v23 = vpop.eup %6105  ;;  %4362 = vst [vmem:[%s6797_s15 + $0xfc] sm:$0xff] %v4910_v55  ;;  %6131 = vpow2.f32 %v3892_v57  ;;  %v3818_v21 = vsub.f32 0.0, %v3750_v12  ;;  %v3825_v40 = vsub.f32 0.0, %v3753_v18 }
 0x68a   : > { %v6108_v2 = vpop.eup %6107  ;;  %4363 = vst [vmem:[%s6797_s15 + $0x104] sm:$0xff] %v4911_v58  ;;  %v4877_v63 = vpack.c.bf16 %v6106_v23, %v6106_v23  ;;  %6133 = vpow2.f32 %v3904_v52  ;;  %v3817_v58 = vsub.f32 0.0, %v3677_v14  ;;  %v3823_v23 = vsub.f32 0.0, %v3679_v61 }
 0x68b   : > { %v6110_v51 = vpop.eup %6109  ;;  %v4876_v17 = vpack.c.bf16 %v6108_v2, %v6104_v41  ;;  %6135 = vpow2.f32 %v3908_v50  ;;  %v3946_v2 = vmul.f32 1.442695, %v3816_v36  ;;  %v3950_v3 = vmul.f32 1.442695, %v3818_v21 }
 0x68c   : > { %v6112_v29 = vpop.eup %6111  ;;  %4329 = vst [vmem:[%s6797_s15 + $0x18] sm:$0xf] %v4877_v63  ;;  %6137 = vpow2.f32 %v3906_v62  ;;  %v3681_v62 = vadd.f32 %v3680_v4, %v7469_v13  ;;  %v3948_v13 = vmul.f32 1.442695, %v3817_v58  ;;  %v3964_v15 = vmul.f32 1.442695, %v3825_v40 }
 0x68d   : > { %v6114_v7 = vpop.eup %6113  ;;  %4328 = vst [vmem:[%s6797_s15 + $0x10] sm:$0xff] %v4876_v17  ;;  %v4881_v32 = vpack.c.bf16 %v6112_v29, %v6112_v29  ;;  %6139 = vpow2.f32 %v3918_v31  ;;  %v3960_v29 = vmul.f32 1.442695, %v3823_v23 }
 0x68e   : > { %v7549_v34 = vpop.eup %6115  ;;  %v4880_v0 = vpack.c.bf16 %v6114_v7, %v6110_v51  ;;  %6141 = vpow2.f32 %v3922_v20  ;;  %v3824_v17 = vsub.f32 0.0, %v3681_v62 }
 0x68f   : > { %v6118_v19 = vpop.eup %6117  ;;  %4333 = vst [vmem:[%s6797_s15 + $0x34] sm:$0xf] %v4881_v32  ;;  %6143 = vpow2.f32 %v3920_v30 }
 0x690   : > { %v6120_v49 = vpop.eup %6119  ;;  %4332 = vst [vmem:[%s6797_s15 + $0x2c] sm:$0xff] %v4880_v0  ;;  %v3985_v60 = vadd.f32 1.0, %v6118_v19  ;;  %6145 = vpow2.f32 %v3932_v26  ;;  %v3962_v44 = vmul.f32 1.442695, %v3824_v17 }
 0x691   : > { %v6122_v6 = vpop.eup %6121  ;;  %v3991_v53 = vadd.f32 1.0, %v6120_v49  ;;  %6147 = vpow2.f32 %v3936_v5 }
 0x692   : > { %v6124_v1 = vpop.eup %6123  ;;  %6149 = vrcp.f32 %v3985_v60  ;;  %v3993_v38 = vadd.f32 1.0, %v6122_v6 }
 0x693   : > { %v6126_v39 = vpop.eup %6125  ;;  %6151 = vrcp.f32 %v3991_v53  ;;  %v3992_v35 = vadd.f32 1.0, %v6124_v1 }
 0x694   : > { %v6128_v43 = vpop.eup %6127  ;;  %v4885_v16 = vpack.c.bf16 %v6126_v39, %v6126_v39  ;;  %6153 = vrcp.f32 %v3993_v38 }
 0x695   : > { %v6130_v33 = vpop.eup %6129  ;;  %6155 = vrcp.f32 %v3992_v35  ;;  %v3998_v8 = vadd.f32 1.0, %v6128_v43 }
 0x696   : > { %v6132_v45 = vpop.eup %6131  ;;  %4337 = vst [vmem:[%s6797_s15 + $0x50] sm:$0xf] %v4885_v16  ;;  %v4000_v11 = vadd.f32 1.0, %v6130_v33  ;;  %6157 = vpow2.f32 %v3934_v48 }
 0x697   : > { %v6134_v59 = vpop.eup %6133  ;;  %6159 = vrcp.f32 %v3998_v8  ;;  %v3999_v10 = vadd.f32 1.0, %v6132_v45 }
 0x698   : > { %v6136_v27 = vpop.eup %6135  ;;  %6161 = vrcp.f32 %v4000_v11  ;;  %v4005_v9 = vadd.f32 1.0, %v6134_v59 }
 0x699   : > { %v6138_v57 = vpop.eup %6137  ;;  %6163 = vrcp.f32 %v3999_v10  ;;  %v4007_v22 = vadd.f32 1.0, %v6136_v27 }
 0x69a   : > { %v6140_v52 = vpop.eup %6139  ;;  %6165 = vrcp.f32 %v4005_v9  ;;  %v4006_v24 = vadd.f32 1.0, %v6138_v57 }
 0x69b   : > { %v6142_v55 = vpop.eup %6141  ;;  %6167 = vrcp.f32 %v4007_v22  ;;  %v4012_v50 = vadd.f32 1.0, %v6140_v52 }
 0x69c   : > { %v6144_v47 = vpop.eup %6143  ;;  %6169 = vrcp.f32 %v4006_v24  ;;  %v4014_v41 = vadd.f32 1.0, %v6142_v55 }
 0x69d   : > { %v6146_v56 = vpop.eup %6145  ;;  %6171 = vrcp.f32 %v4012_v50  ;;  %v4013_v28 = vadd.f32 1.0, %v6144_v47 }
 0x69e   : > { %v6148_v31 = vpop.eup %6147  ;;  %6173 = vrcp.f32 %v4014_v41  ;;  %v4019_v25 = vadd.f32 1.0, %v6146_v56 }
 0x69f   : > { %v6150_v63 = vpop.eup %6149  ;;  %6175 = vrcp.f32 %v4013_v28  ;;  %v4021_v20 = vadd.f32 1.0, %v6148_v31 }
 0x6a0   : > { %v6152_v37 = vpop.eup %6151  ;;  %v4884_v51 = vpack.c.bf16 %v6150_v63, %v7549_v34  ;;  %6177 = vrcp.f32 %v4019_v25 }
 0x6a1   : > { %v6154_v30 = vpop.eup %6153  ;;  %6179 = vrcp.f32 %v4021_v20 }
 0x6a2   : > { %v6156_v26 = vpop.eup %6155  ;;  %4336 = vst [vmem:[%s6797_s15 + $0x48] sm:$0xff] %v4884_v51  ;;  %v4889_v7 = vpack.c.bf16 %v6154_v30, %v6154_v30  ;;  %6181 = vpow2.f32 %v3946_v2 }
 0x6a3   : > { %v6158_v32 = vpop.eup %6157  ;;  %v4888_v5 = vpack.c.bf16 %v6156_v26, %v6152_v37  ;;  %6183 = vpow2.f32 %v3950_v3 }
 0x6a4   : > { %v6160_v0 = vpop.eup %6159  ;;  %4341 = vst [vmem:[%s6797_s15 + $0x6c] sm:$0xf] %v4889_v7  ;;  %v4020_v34 = vadd.f32 1.0, %v6158_v32  ;;  %6185 = vpow2.f32 %v3948_v13 }
 0x6a5   : > { %v6162_v19 = vpop.eup %6161  ;;  %4340 = vst [vmem:[%s6797_s15 + $0x64] sm:$0xff] %v4888_v5  ;;  %6187 = vpow2.f32 %v3960_v29 }
 0x6a6   : > { %v6164_v49 = vpop.eup %6163  ;;  %v4893_v60 = vpack.c.bf16 %v6162_v19, %v6162_v19  ;;  %6189 = vrcp.f32 %v4020_v34 }
 0x6a7   : > { %v6166_v6 = vpop.eup %6165  ;;  %v4892_v53 = vpack.c.bf16 %v6164_v49, %v6160_v0  ;;  %6191 = vpow2.f32 %v3964_v15 }
 0x6a8   : > { %v6168_v54 = vpop.eup %6167  ;;  %4345 = vst [vmem:[%s6797_s15 + $0x88] sm:$0xf] %v4893_v60  ;;  %6193 = vpow2.f32 %v3962_v44 }
 0x6a9   : > { %v6170_v1 = vpop.eup %6169  ;;  %4344 = vst [vmem:[%s6797_s15 + $0x80] sm:$0xff] %v4892_v53  ;;  %v4897_v38 = vpack.c.bf16 %v6168_v54, %v6168_v54 }
 0x6aa   : > { %v6172_v48 = vpop.eup %6171  ;;  %v4896_v39 = vpack.c.bf16 %v6170_v1, %v6166_v6 }
 0x6ab   : > { %v6174_v35 = vpop.eup %6173  ;;  %4349 = vst [vmem:[%s6797_s15 + $0xa4] sm:$0xf] %v4897_v38 }
 0x6ac   : > { %v6176_v43 = vpop.eup %6175  ;;  %4348 = vst [vmem:[%s6797_s15 + $0x9c] sm:$0xff] %v4896_v39  ;;  %v4901_v16 = vpack.c.bf16 %v6174_v35, %v6174_v35 }
 0x6ad   : > { %v6178_v33 = vpop.eup %6177  ;;  %v4900_v8 = vpack.c.bf16 %v6176_v43, %v6172_v48 }
 0x6ae   : > { %v6180_v46 = vpop.eup %6179  ;;  %4353 = vst [vmem:[%s6797_s15 + $0xc0] sm:$0xf] %v4901_v16 }
 0x6af   : > { %v6182_v45 = vpop.eup %6181  ;;  %4352 = vst [vmem:[%s6797_s15 + $0xb8] sm:$0xff] %v4900_v8  ;;  %v4905_v11 = vpack.c.bf16 %v6180_v46, %v6180_v46 }
 0x6b0   : > { %v6184_v42 = vpop.eup %6183  ;;  %v4026_v59 = vadd.f32 1.0, %v6182_v45 }
 0x6b1   : > { %v6186_v10 = vpop.eup %6185  ;;  %4357 = vst [vmem:[%s6797_s15 + $0xdc] sm:$0xf] %v4905_v11  ;;  %v4028_v12 = vadd.f32 1.0, %v6184_v42 }
 0x6b2   : > { %v6188_v27 = vpop.eup %6187  ;;  %6195 = vrcp.f32 %v4026_v59  ;;  %v4027_v9 = vadd.f32 1.0, %v6186_v10 }
 0x6b3   : > { %v6190_v14 = vpop.eup %6189  ;;  %6197 = vrcp.f32 %v4028_v12  ;;  %v4033_v57 = vadd.f32 1.0, %v6188_v27 }
 0x6b4   : > { %v6192_v22 = vpop.eup %6191  ;;  %v4904_v61 = vpack.c.bf16 %v6190_v14, %v6178_v33  ;;  %6199 = vrcp.f32 %v4027_v9 }
 0x6b5   : > { %v6194_v4 = vpop.eup %6193  ;;  %v4035_v52 = vadd.f32 1.0, %v6192_v22  ;;  %6201 = vrcp.f32 %v4033_v57 }
 0x6b6   : > { %4356 = vst [vmem:[%s6797_s15 + $0xd4] sm:$0xff] %v4904_v61  ;;  %v4034_v24 = vadd.f32 1.0, %v6194_v4 }
 0x6b7   : > { %6203 = vrcp.f32 %v4035_v52 }
 0x6b8   : > { %6205 = vrcp.f32 %v4034_v24 }
 0x6bf   : > { %v6196_v36 = vpop.eup %6195 }
 0x6c0   : > { %v6198_v55 = vpop.eup %6197 }
 0x6c1   : > { %v6200_v50 = vpop.eup %6199  ;;  %v4909_v21 = vpack.c.bf16 %v6198_v55, %v6198_v55 }
 0x6c2   : > { %v4908_v18 = vpack.c.bf16 %v6200_v50, %v6196_v36  ;;  %v6202_v47 = vpop.eup %6201 }
 0x6c3   : > { %4361 = vst [vmem:[%s6797_s15 + $0xf8] sm:$0xf] %v4909_v21 }
 0x6c4   : > { %v6204_v41 = vpop.eup %6203  ;;  %4360 = vst [vmem:[%s6797_s15 + $0xf0] sm:$0xff] %v4908_v18 }
 0x6c5   : > { %v6206_v58 = vpop.eup %6205  ;;  %v4913_v62 = vpack.c.bf16 %v6204_v41, %v6204_v41 }
 0x6c6   : > { %v4912_v56 = vpack.c.bf16 %v6206_v58, %v6202_v47 }
 0x6c7   : > { %4365 = vst [vmem:[%s6797_s15 + $0x114] sm:$0xf] %v4913_v62 }
 0x6c8   : > { %4364 = vst [vmem:[%s6797_s15 + $0x10c] sm:$0xff] %v4912_v56 }
 0x6c9   : > { %6302 = shalt.err (!%p6299_p4)
}
 0x6ca   : > { %s6303_s14 = scalar_lea.hbm %s7582_s25, 4480  ;;  %s6307_s4 = scalar_lea.hbm %s7788_s7, 26880 }
 0x6cb   : > { %p6304_p11 = scmp.ne.s32.totalorder %s7582_s25, %s6303_s14  ;;  %p6308_p12 = scmp.lt.s32.totalorder %s7582_s25, %s7788_s7 }
 0x6cc   : > { %p6309_p6 = scmp.lt.s32.totalorder %s6307_s4, %s6303_s14 }
 0x6cd   : > { %p6305_p1 = pnand %p6304_p11, %p7789_p0 }
 0x6ce   : > { %p6310_p13 = por %p6309_p6, %p6308_p12 }
 0x6cf   : > { %p6306_p10 = pneg %p6305_p1 }
 0x6d1   : > { %p6311_p7 = pnand %p6310_p13, %p6306_p10 }
 0x6d3   : > { %6314 = shalt.err (!%p6311_p7)
}
 0x6d4   : > { %s6458_s19 = smov 448   ;;  %s6459_s2 = smov 896  }
 0x6d5   : > { %s6460_s22 = smov 28  }
 0x6d6   : > { %5462 = dma.vmem_to_hbm [thread:$0]  (%p7789_p0), %s7584_s0, 4480, %s7582_s25, %s7590_s3, %s6458_s19, %s6459_s2, %s6460_s22  }
 0x6d7 PF: > { %p5484_p9 = scmp.ge.s32.totalorder %s6441_s26, 2  ;;  %s4407_s24 = sand.u32 1, %s6389_s29  }
 0x6d8   : > { %p7790_p8 = scmp.ne.s32.totalorder %s7733_s13, 0  ;;  %s4408_s18 = scalar_lea.sflag [#allocation5], %s4407_s24 }
 0x6da   : > { %p5476_p5 = pnand %p5484_p9, %p7790_p8 }
 0x6dc   : > { %p5477_p3 = pneg %p5476_p5 }
 0x6de   : > { %6384 = dma.done.wait (%p5477_p3), %s4408_s18, 4480  }
 0x6df   : > { %6386 = vsyncadd (%p5477_p3), %s4408_s18, 4294962816  ;;  %s32_s26 = sadd.s32 1, %s6441_s26   ;;  %s7792_s16 = sld [smem:[#allocation14_spill]] }
 0x6e0   : > { %p7618_p2 = scmp.ge.s32.totalorder %s32_s26, 8   ;;  %s7793_s15 = sld [smem:[#allocation25_spill]] }
 0x6e1   : > { %s7794_s0 = sld [smem:[#allocation15_spill]]  ;;  %s7803_s29 = smov %s6393_s30 }
 0x6e2   : > { %s7795_s18 = sld [smem:[#allocation24_spill]]  ;;  %s7807_s19 = smov %s6417_s20 }
 0x6e3   : > { %s7796_s25 = sld [smem:[#allocation16_spill]] }
 0x6e4   : > { %s7797_s13 = sld [smem:[#allocation23_spill]] }
 0x6e5   : > { %s7798_s22 = sld [smem:[#allocation19_spill]]  ;;  %s7804_s30 = smov %s7792_s16 }
 0x6e6   : > { %s7799_s23 = sld [smem:[#allocation20_spill]]  ;;  %s7805_s16 = smov %s6405_s17 }
 0x6e7   : > { %s7800_s24 = sld [smem:[#allocation21_spill]]  ;;  %s7806_s17 = smov %s7794_s0 }
 0x6e8   : > { %s7801_s3 = sld [smem:[#allocation22_spill]] }
 0x6e9   : > { %s7808_s20 = smov %s7796_s25 }
 0x6ea   : > { %s7809_s21 = smov %s7797_s13  ;;  %31 = sbr.rel (!%p7618_p2) target bundleno = 25 (0x19), region = 151 }
 0x6ee   : > { %s7810_s25 = smov %s7801_s3 }
 0x6ef   :  { %4421 = vsyncpa [#allocation4], 1 }
 0x6f0   :  { %4423 = vsyncpa [#allocation4 + $0x1], 1 }
 0x6f1   :  { %4424 = vsyncpa [#allocation7], 1 }
 0x6f2   :  { %4425 = vsyncpa [#allocation5], 1 }
 0x6f3   :  { %4427 = vsyncpa [#allocation5 + $0x1], 1 }

</bundles_post_ra>
